<compile_context>
chip_gen: v7x
topology: tpu7x:2x2x1
jax: 0.10.0
libtpu: 0.0.40
codegen_flags: <defaults>
</compile_context>

<pallas_src>
import functools
import numpy as np

import jax
import jax.numpy as jnp
from jax.experimental import pallas as pl
from jax.experimental.pallas import tpu as pltpu

LANE = 128
MATMUL_DTYPE = jnp.bfloat16          # bf16 MXU operands; jnp.float32 for exact parity
_CP = pltpu.CompilerParams(dimension_semantics=("parallel",))
_SQRT1_2 = 0.7071067811865476


def _gelu(x):
    # exact (erf) GELU, matching torch.nn.GELU() default
    return 0.5 * x * (1.0 + jax.lax.erf(x * _SQRT1_2))


# ------------------------ constant gather matrices --------------------------
# Built with numpy at trace time.  These are 0/1 matrices applied on the MXU
# in f32 (exact: each output row has exactly one unit term), replacing all
# masked/partial-row stores and in-kernel gathers.

def _np_phase_select(hi, wi, src_pitch):
    """(4, (Ho+1)*(Wo+1), M_src): stride-2 phase slabs with replicate clamp."""
    ho, wo = hi // 2, wi // 2
    hh, wh = ho + 1, wo + 1
    n_src = (hi - 1) * src_pitch + wi
    s = np.zeros((4, hh * wh, n_src), np.float32)
    for p in (0, 1):
        for q in (0, 1):
            for yy in range(hh):
                for xx in range(wh):
                    sy = min(max(2 * yy + p - 1, 0), hi - 1)
                    sx = min(max(2 * xx + q - 1, 0), wi - 1)
                    s[2 * p + q, yy * wh + xx, sy * src_pitch + sx] = 1.0
    return s


def _np_pad_select(h, w, src_pitch):
    """((H+2)*(W+2), M_src): embed valid pixels into a zero-padded 3x3-conv slab."""
    wp = w + 2
    n_src = (h - 1) * src_pitch + w
    r = np.zeros(((h + 2) * wp, n_src), np.float32)
    for y in range(h):
        for x in range(w):
            r[(y + 1) * wp + (x + 1), y * src_pitch + x] = 1.0
    return r


def _np_compact_select(h, w, src_pitch):
    """(H*W, M_src): compact pitch-P rows (with gap columns) to dense H*W rows."""
    n_src = (h - 1) * src_pitch + w
    c = np.zeros((h * w, n_src), np.float32)
    for y in range(h):
        for x in range(w):
            c[y * w + x, y * src_pitch + x] = 1.0
    return c


# ----------------------------- fused kernel --------------------------------
# "padded-flat" conv: feature maps live as (pixels, 128) slabs with a row pitch
# >= W; conv tap (i, j) is a constant row-offset slice, so every conv is a sum
# of shifted matmuls accumulated in vregs.  Gap rows hold garbage that is never
# selected by the gather matrices of the next stage.

def _build_fused_kernel(plan, output_norm):
    def kernel(*refs):
        it = iter(refs)
        x_ref = next(it)
        y = None                                     # (M, 128) f32 value, vreg-resident
        for lay in plan:
            kind = lay['kind']
            if kind == 'enc0':
                # stride-2 4x4 conv, phases packed along K in the wrapper -> 4 taps
                wh, m = lay['Wh'], lay['M']
                w_ref = next(it)
                s_ref = next(it)
                acc = None
                for t, (a, b) in enumerate(((0, 0), (0, 1), (1, 0), (1, 1))):
                    lhs = x_ref[0, pl.ds(a * wh + b, m), :].astype(MATMUL_DTYPE)
                    d = jnp.dot(lhs, w_ref[t], preferred_element_type=jnp.float32)
                    acc = d if acc is None else acc + d
                y = _gelu(acc + s_ref[...])          # folded conv-bias*BN + BN shift
            elif kind == 'enc':
                # in-kernel stride-2 conv: phase slabs built by selection matmuls
                wh, m = lay['Wh'], lay['M']
                sel_ref = next(it)
                w_ref = next(it)
                s_ref = next(it)
                acc = None
                t = 0
                for pq in range(4):
                    ph = jnp.dot(sel_ref[pq], y, preferred_element_type=jnp.float32)
                    for a in (0, 1):
                        for b in (0, 1):
                            lhs = ph[a * wh + b: a * wh + b + m, :].astype(MATMUL_DTYPE)
                            d = jnp.dot(lhs, w_ref[t],
                                        preferred_element_type=jnp.float32)
                            acc = d if acc is None else acc + d
                            t += 1
                y = _gelu(acc + s_ref[...])
            else:  # 'res'
                wp, m, has_proj = lay['Wp'], lay['M'], lay['has_proj']
                rin_ref = next(it)
                w1_ref = next(it)
                s1_ref = next(it)
                rmid_ref = next(it)
                w2_ref = next(it)
                b2_ref = next(it)
                wproj_ref = next(it) if has_proj else None
                offs = [i * wp + j for i in range(3) for j in range(3)]
                # zero-padded input slab (halo rows exactly 0) via one matmul
                xpad = jnp.dot(rin_ref[...], y, preferred_element_type=jnp.float32)
                h = _gelu(xpad)                       # GELU(0)=0 keeps the halo zero
                a1 = None
                for t, off in enumerate(offs):        # conv1 (3x3, pad 1), BN folded
                    lhs = h[off: off + m, :].astype(MATMUL_DTYPE)
                    d = jnp.dot(lhs, w1_ref[t], preferred_element_type=jnp.float32)
                    a1 = d if a1 is None else a1 + d
                # shift + GELU over the whole slab, then repack to a padded slab
                tmid = jnp.dot(rmid_ref[...], _gelu(a1 + s1_ref[...]),
                               preferred_element_type=jnp.float32)
                a2 = None
                for t, off in enumerate(offs):        # conv2 (3x3, pad 1)
                    lhs = tmid[off: off + m, :].astype(MATMUL_DTYPE)
                    d = jnp.dot(lhs, w2_ref[t], preferred_element_type=jnp.float32)
                    a2 = d if a2 is None else a2 + d
                res = xpad[wp + 1: wp + 1 + m, :]     # interior = original input x
                if has_proj:                          # 1x1 projection residual
                    a2 = a2 + jnp.dot(res.astype(MATMUL_DTYPE), wproj_ref[...],
                                      preferred_element_type=jnp.float32)
                else:                                 # identity residual
                    a2 = a2 + res
                y = a2 + b2_ref[...]
        # final compaction to dense rows + optional channel-max norm + one store
        c_ref = next(it)
        out_ref = next(it)
        z = jnp.dot(c_ref[...], y, preferred_element_type=jnp.float32)
        if output_norm:
            # matches torch `z / z.abs().max(dim=1, keepdim=True)`; padded lanes
            # are exactly 0 and never win the max.
            mx = jnp.max(jnp.abs(z), axis=-1, keepdims=True)
            z = z * pl.reciprocal(mx, approx=True)
        out_ref[0, :, :] = z
    return kernel


# ----------------------------- parameters ----------------------------------

def _conv_raw(key, cin, cout, kh, kw):
    kw_, kb_ = jax.random.split(key)
    fan_in = cin * kh * kw
    w = jax.random.normal(kw_, (cout, cin, kh, kw), jnp.float32) / jnp.sqrt(fan_in)
    b = 0.01 * jax.random.normal(kb_, (cout,), jnp.float32)
    return w, b


def _bn_affine(key, c, eps=1e-5):
    kg, kb = jax.random.split(key)
    gamma = 1.0 + 0.1 * jax.random.normal(kg, (c,), jnp.float32)
    beta = 0.1 * jax.random.normal(kb, (c,), jnp.float32)
    running_mean = jnp.zeros((c,), jnp.float32)
    running_var = jnp.ones((c,), jnp.float32)
    scale = gamma / jnp.sqrt(running_var + eps)
    shift = beta - running_mean * scale
    return scale, shift


def _prep_enc(raw, first):
    """Fold conv bias + BN into weight stacks / shift; lane-pad; bf16 weights."""
    w, b, scale, shift = raw['w'], raw['b'], raw['scale'], raw['shift']
    cout, cin = w.shape[0], w.shape[1]
    mats = []
    if first:
        # phase-packed K (wrapper packs phases along channels): 4 taps (a,b)
        assert 4 * cin <= LANE
        for a in (0, 1):
            for bb in (0, 1):
                blocks = [w[:, :, 2 * a + p, 2 * bb + q].T * scale[None, :]
                          for p in (0, 1) for q in (0, 1)]
                m = jnp.concatenate(blocks, axis=0)               # (4*cin, cout)
                mats.append(jnp.pad(m, ((0, LANE - 4 * cin), (0, LANE - cout))))
    else:
        # in-kernel enc layer: 16 per-tap matrices, channels in lanes 0..cin-1
        for p in (0, 1):
            for q in (0, 1):
                for a in (0, 1):
                    for bb in (0, 1):
                        m = w[:, :, 2 * a + p, 2 * bb + q].T * scale[None, :]
                        mats.append(jnp.pad(m, ((0, LANE - cin), (0, LANE - cout))))
    wstack = jnp.stack(mats, axis=0).astype(MATMUL_DTYPE)
    sh = jnp.pad(b * scale + shift, (0, LANE - cout)).reshape(1, LANE)
    return dict(wstack=wstack, shift=sh)


def _prep_res(raw):
    w1, b1, scale, shift = raw['w1'], raw['b1'], raw['scale'], raw['shift']
    w2, b2 = raw['w2'], raw['b2']
    mid, cin = w1.shape[0], w1.shape[1]
    cout = w2.shape[0]
    m1 = [jnp.pad(w1[:, :, i, j].T * scale[None, :],
                  ((0, LANE - cin), (0, LANE - mid)))
          for i in range(3) for j in range(3)]
    m2 = [jnp.pad(w2[:, :, i, j].T, ((0, LANE - mid), (0, LANE - cout)))
          for i in range(3) for j in range(3)]
    prep = dict(
        w1stack=jnp.stack(m1, 0).astype(MATMUL_DTYPE),
        s1=jnp.pad(b1 * scale + shift, (0, LANE - mid)).reshape(1, LANE),
        w2stack=jnp.stack(m2, 0).astype(MATMUL_DTYPE))
    b2_total = b2
    if 'wp' in raw:
        wp = raw['wp'][:, :, 0, 0].T                              # (cin, cout)
        prep['wproj'] = jnp.pad(wp, ((0, LANE - cin),
                                     (0, LANE - cout))).astype(MATMUL_DTYPE)
        b2_total = b2 + raw['bp']
    prep['b2'] = jnp.pad(b2_total, (0, LANE - cout)).reshape(1, LANE)
    return prep


def _enc_block_raw(key, cin, cout):
    k1, k2 = jax.random.split(key)
    w, b = _conv_raw(k1, cin, cout, 4, 4)
    scale, shift = _bn_affine(k2, cout)
    return dict(w=w, b=b, scale=scale, shift=shift)


def _res_block_raw(key, cin, cout):
    mid = cout                       # mid_channels defaults to out_channels
    k1, k2, k3, k4 = jax.random.split(key, 4)
    w1, b1 = _conv_raw(k1, cin, mid, 3, 3)
    scale, shift = _bn_affine(k2, mid)
    w2, b2 = _conv_raw(k3, mid, cout, 3, 3)
    raw = dict(w1=w1, b1=b1, scale=scale, shift=shift, w2=w2, b2=b2)
    if cin != cout:                  # 1x1 projection conv
        wp, bp = _conv_raw(k4, cin, cout, 1, 1)
        raw['wp'], raw['bp'] = wp, bp
    return raw


def init_vqvae_encoder_params(key, num_channels, init_dim, hid_dim,
                              downsample_rate, n_resnet_blocks):
    raw_layers = []
    d = init_dim
    key, k = jax.random.split(key)
    raw_layers.append(('enc', _enc_block_raw(k, num_channels, d)))
    d *= 2
    for _ in range(int(round(np.log2(downsample_rate))) - 1):
        key, k = jax.random.split(key)
        raw_layers.append(('enc', _enc_block_raw(k, d // 2, d)))
        for _ in range(n_resnet_blocks):
            key, k = jax.random.split(key)
            raw_layers.append(('res', _res_block_raw(k, d, d)))
        d *= 2
    key, k = jax.random.split(key)
    raw_layers.append(('res', _res_block_raw(k, d // 2, hid_dim)))

    layers = []
    for idx, (kind, raw) in enumerate(raw_layers):
        if kind == 'enc':
            assert raw['w'].shape[0] <= LANE and raw['w'].shape[1] <= LANE
            prep = _prep_enc(raw, first=(idx == 0))
        else:
            assert raw['w2'].shape[0] <= LANE and raw['w1'].shape[1] <= LANE
            prep = _prep_res(raw)
        layers.append((kind, raw, prep))
    return layers


# ----------------------------- forward (Pallas) -----------------------------

def vqvae_encoder_forward(x_nchw, layers, output_norm=True):
    """x: (b, c, h, w) NCHW like the PyTorch module.  Returns (b, hid, H', W')."""
    x = jnp.transpose(x_nchw, (0, 2, 3, 1)).astype(jnp.float32)     # -> NHWC
    B, H, W, C = x.shape
    assert H % 2 == 0 and W % 2 == 0 and 4 * C <= LANE

    # --- layer-0 input prep: replicate pad + phase pack along K + lane pad ---
    xp = jnp.pad(x, ((0, 0), (1, 1), (1, 1), (0, 0)), mode='edge')
    packed = jnp.concatenate(
        [xp[:, p::2, q::2, :] for p in (0, 1) for q in (0, 1)], axis=-1)
    _, Hh0, Wh0, C4 = packed.shape
    packed = jnp.pad(packed, ((0, 0), (0, 0), (0, 0), (0, LANE - C4)))
    x_slab = packed.reshape(B, Hh0 * Wh0, LANE)
    n0 = Hh0 * Wh0

    # --- static plan + gather matrices + kernel operands ---
    def _const_spec(arr):
        return pl.BlockSpec(arr.shape, lambda b, _n=arr.ndim: (0,) * _n)

    operands = [x_slab]
    in_specs = [pl.BlockSpec((1, n0, LANE), lambda b: (b, 0, 0))]
    plan = []

    cur_h, cur_w = H, W
    pitch = None                     # row pitch of the previous layer's output value
    for idx, (kind, _raw, prep) in enumerate(layers):
        if kind == 'enc':
            assert cur_h % 2 == 0 and cur_w % 2 == 0
            ho, wo = cur_h // 2, cur_w // 2
            wh = wo + 1
            m = (ho - 1) * wh + wo
            if idx == 0:
                plan.append(dict(kind='enc0', Wh=wh, M=m))
                operands += [prep['wstack'], prep['shift']]
                in_specs += [_const_spec(prep['wstack']), _const_spec(prep['shift'])]
            else:
                sel = jnp.asarray(_np_phase_select(cur_h, cur_w, pitch))
                plan.append(dict(kind='enc', Wh=wh, M=m))
                operands += [sel, prep['wstack'], prep['shift']]
                in_specs += [_const_spec(sel), _const_spec(prep['wstack']),
                             _const_spec(prep['shift'])]
            cur_h, cur_w, pitch = ho, wo, wh
        else:  # res
            wp = cur_w + 2
            m = (cur_h - 1) * wp + cur_w
            rin = jnp.asarray(_np_pad_select(cur_h, cur_w, pitch))
            rmid = jnp.asarray(_np_pad_select(cur_h, cur_w, wp))
            has_proj = 'wproj' in prep
            plan.append(dict(kind='res', Wp=wp, M=m, has_proj=has_proj))
            operands += [rin, prep['w1stack'], prep['s1'],
                         rmid, prep['w2stack'], prep['b2']]
            in_specs += [_const_spec(rin), _const_spec(prep['w1stack']),
                         _const_spec(prep['s1']), _const_spec(rmid),
                         _const_spec(prep['w2stack']), _const_spec(prep['b2'])]
            if has_proj:
                operands.append(prep['wproj'])
                in_specs.append(_const_spec(prep['wproj']))
            pitch = wp

    cmat = jnp.asarray(_np_compact_select(cur_h, cur_w, pitch))
    operands.append(cmat)
    in_specs.append(_const_spec(cmat))

    hw = cur_h * cur_w
    kernel = _build_fused_kernel(plan, output_norm)
    out = pl.pallas_call(
        kernel,
        out_shape=jax.ShapeDtypeStruct((B, hw, LANE), jnp.float32),
        grid=(B,),
        in_specs=in_specs,
        out_specs=pl.BlockSpec((1, hw, LANE), lambda b: (b, 0, 0)),
        compiler_params=_CP,
    )(*operands)

    hid = layers[-1][1]['w2'].shape[0]
    z = out[..., :hid].reshape(B, cur_h, cur_w, hid)
    # TODO(synk): num_tokens / H_prime / W_prime buffer mutation is python-side
    # module state with no tensor-output equivalent; it is not modeled here.
    return jnp.transpose(z, (0, 3, 1, 2))                           # back to NCHW


# ----------------------------- pure-JAX reference ---------------------------

def _conv_ref(x, w_oihw, b, stride, pad_mode):
    w_hwio = jnp.transpose(w_oihw, (2, 3, 1, 0))
    xp = jnp.pad(x, ((0, 0), (1, 1), (1, 1), (0, 0)),
                 mode='edge' if pad_mode == 'edge' else 'constant')
    y = jax.lax.conv_general_dilated(
        xp, w_hwio, window_strides=(stride, stride), padding='VALID',
        dimension_numbers=('NHWC', 'HWIO', 'NHWC'))
    return y + b


def reference_forward(x_nchw, layers, output_norm=True):
    x = jnp.transpose(x_nchw, (0, 2, 3, 1)).astype(jnp.float32)
    gelu = lambda v: jax.nn.gelu(v, approximate=False)
    for kind, raw, _prep in layers:
        if kind == 'enc':
            y = _conv_ref(x, raw['w'], raw['b'], 2, 'edge')
            x = gelu(y * raw['scale'] + raw['shift'])
        else:
            h = gelu(x)
            t = gelu(_conv_ref(h, raw['w1'], raw['b1'], 1, 'zero')
                     * raw['scale'] + raw['shift'])
            y2 = _conv_ref(t, raw['w2'], raw['b2'], 1, 'zero')
            if 'wp' in raw:
                proj = jnp.einsum('bhwc,dc->bhwd', x, raw['wp'][:, :, 0, 0]) + raw['bp']
            else:
                proj = x
            x = proj + y2
    if output_norm:
        x = x / jnp.max(jnp.abs(x), axis=-1, keepdims=True)
    return jnp.transpose(x, (0, 3, 1, 2))


# ----------------------------- main -----------------------------------------

if __name__ == "__main__":
    key = jax.random.PRNGKey(0)
    kx, kp = jax.random.split(key)

    B, C, H, W = 2, 4, 16, 16
    num_channels, init_dim, hid_dim = 4, 8, 32
    downsample_rate, n_resnet_blocks = 4, 1

    x = jax.random.normal(kx, (B, C, H, W), jnp.float32)
    layers = init_vqvae_encoder_params(kp, num_channels, init_dim, hid_dim,
                                       downsample_rate, n_resnet_blocks)

    fwd = jax.jit(functools.partial(vqvae_encoder_forward,
                                    layers=layers, output_norm=True))
    z = fwd(x)
    jax.block_until_ready(z)

    assert z.shape == (B, hid_dim, H // downsample_rate, W // downsample_rate), z.shape

    z_ref = reference_forward(x, layers, output_norm=True)
    # bf16 MXU operands add ~2^-8 relative rounding per conv; exact-f32 parity
    # (2e-3) is recovered by setting MATMUL_DTYPE = jnp.float32 above.
    tol = 2e-3 if MATMUL_DTYPE == jnp.float32 else 2e-2
    np.testing.assert_allclose(np.asarray(z), np.asarray(z_ref), atol=tol, rtol=tol)

    print("KERNEL_OK")
</pallas_src>

<mosaic_0001>
module attributes {stable_mosaic.version = 11 : i64} {
  func.func @kernel(%arg0: i32, %arg1: memref<1x81x128xf32, #tpu.memory_space<vmem>>, %arg2: memref<4x128x128xbf16, #tpu.memory_space<vmem>>, %arg3: memref<1x128xf32, #tpu.memory_space<vmem>>, %arg4: memref<4x25x71xf32, #tpu.memory_space<vmem>>, %arg5: memref<16x128x128xbf16, #tpu.memory_space<vmem>>, %arg6: memref<1x128xf32, #tpu.memory_space<vmem>>, %arg7: memref<36x19xf32, #tpu.memory_space<vmem>>, %arg8: memref<9x128x128xbf16, #tpu.memory_space<vmem>>, %arg9: memref<1x128xf32, #tpu.memory_space<vmem>>, %arg10: memref<36x22xf32, #tpu.memory_space<vmem>>, %arg11: memref<9x128x128xbf16, #tpu.memory_space<vmem>>, %arg12: memref<1x128xf32, #tpu.memory_space<vmem>>, %arg13: memref<36x22xf32, #tpu.memory_space<vmem>>, %arg14: memref<9x128x128xbf16, #tpu.memory_space<vmem>>, %arg15: memref<1x128xf32, #tpu.memory_space<vmem>>, %arg16: memref<36x22xf32, #tpu.memory_space<vmem>>, %arg17: memref<9x128x128xbf16, #tpu.memory_space<vmem>>, %arg18: memref<1x128xf32, #tpu.memory_space<vmem>>, %arg19: memref<128x128xbf16, #tpu.memory_space<vmem>>, %arg20: memref<16x22xf32, #tpu.memory_space<vmem>>, %arg21: memref<1x16x128xf32, #tpu.memory_space<vmem>>) attributes {dimension_semantics = [#tpu.dimension_semantics<parallel>], iteration_bounds = array<i64: 2>, scalar_prefetch = 0 : i64, scratch_operands = 0 : i64, tpu.core_type = #tpu.core_type<tc>, window_params = [{transform_indices = @transform_0, window_bounds = array<i64: 1, 81, 128>}, {pipeline_mode = #tpu.pipeline_mode<synchronous>, transform_indices = @transform_1, window_bounds = array<i64: 4, 128, 128>}, {pipeline_mode = #tpu.pipeline_mode<synchronous>, transform_indices = @transform_2, window_bounds = array<i64: 1, 128>}, {pipeline_mode = #tpu.pipeline_mode<synchronous>, transform_indices = @transform_3, window_bounds = array<i64: 4, 25, 71>}, {pipeline_mode = #tpu.pipeline_mode<synchronous>, transform_indices = @transform_4, window_bounds = array<i64: 16, 128, 128>}, {pipeline_mode = #tpu.pipeline_mode<synchronous>, transform_indices = @transform_5, window_bounds = array<i64: 1, 128>}, {pipeline_mode = #tpu.pipeline_mode<synchronous>, transform_indices = @transform_6, window_bounds = array<i64: 36, 19>}, {pipeline_mode = #tpu.pipeline_mode<synchronous>, transform_indices = @transform_7, window_bounds = array<i64: 9, 128, 128>}, {pipeline_mode = #tpu.pipeline_mode<synchronous>, transform_indices = @transform_8, window_bounds = array<i64: 1, 128>}, {pipeline_mode = #tpu.pipeline_mode<synchronous>, transform_indices = @transform_9, window_bounds = array<i64: 36, 22>}, {pipeline_mode = #tpu.pipeline_mode<synchronous>, transform_indices = @transform_10, window_bounds = array<i64: 9, 128, 128>}, {pipeline_mode = #tpu.pipeline_mode<synchronous>, transform_indices = @transform_11, window_bounds = array<i64: 1, 128>}, {pipeline_mode = #tpu.pipeline_mode<synchronous>, transform_indices = @transform_12, window_bounds = array<i64: 36, 22>}, {pipeline_mode = #tpu.pipeline_mode<synchronous>, transform_indices = @transform_13, window_bounds = array<i64: 9, 128, 128>}, {pipeline_mode = #tpu.pipeline_mode<synchronous>, transform_indices = @transform_14, window_bounds = array<i64: 1, 128>}, {pipeline_mode = #tpu.pipeline_mode<synchronous>, transform_indices = @transform_15, window_bounds = array<i64: 36, 22>}, {pipeline_mode = #tpu.pipeline_mode<synchronous>, transform_indices = @transform_16, window_bounds = array<i64: 9, 128, 128>}, {pipeline_mode = #tpu.pipeline_mode<synchronous>, transform_indices = @transform_17, window_bounds = array<i64: 1, 128>}, {pipeline_mode = #tpu.pipeline_mode<synchronous>, transform_indices = @transform_18, window_bounds = array<i64: 128, 128>}, {pipeline_mode = #tpu.pipeline_mode<synchronous>, transform_indices = @transform_19, window_bounds = array<i64: 16, 22>}, {transform_indices = @transform_20, window_bounds = array<i64: 1, 16, 128>}]} {
    %c0 = arith.constant 0 : index
    %c0_0 = arith.constant 0 : index
    %c0_1 = arith.constant 0 : index
    %0 = vector.load %arg1[%c0, %c0_0, %c0_1] : memref<1x81x128xf32, #tpu.memory_space<vmem>>, vector<1x71x128xf32>
    %1 = vector.shape_cast %0 : vector<1x71x128xf32> to vector<71x128xf32>
    %2 = arith.truncf %1 : vector<71x128xf32> to vector<71x128xbf16>
    %c0_2 = arith.constant 0 : index
    %c0_3 = arith.constant 0 : index
    %c0_4 = arith.constant 0 : index
    %3 = vector.load %arg2[%c0_2, %c0_3, %c0_4] : memref<4x128x128xbf16, #tpu.memory_space<vmem>>, vector<1x128x128xbf16>
    %4 = vector.shape_cast %3 : vector<1x128x128xbf16> to vector<128x128xbf16>
    %cst = arith.constant dense<0.000000e+00> : vector<71x128xf32>
    %5 = tpu.matmul %2, %4, %cst {dimension_numbers = #tpu.dot_dimension_numbers<[1], [0], [0], [1], [0, 0, 1, 1], [], []>} : vector<71x128xbf16>, vector<128x128xbf16>, vector<71x128xf32> -> vector<71x128xf32>
    %c0_5 = arith.constant 0 : index
    %c1 = arith.constant 1 : index
    %c0_6 = arith.constant 0 : index
    %6 = vector.load %arg1[%c0_5, %c1, %c0_6] : memref<1x81x128xf32, #tpu.memory_space<vmem>>, vector<1x71x128xf32>
    %7 = vector.shape_cast %6 : vector<1x71x128xf32> to vector<71x128xf32>
    %8 = arith.truncf %7 : vector<71x128xf32> to vector<71x128xbf16>
    %c1_7 = arith.constant 1 : index
    %c0_8 = arith.constant 0 : index
    %c0_9 = arith.constant 0 : index
    %9 = vector.load %arg2[%c1_7, %c0_8, %c0_9] : memref<4x128x128xbf16, #tpu.memory_space<vmem>>, vector<1x128x128xbf16>
    %10 = vector.shape_cast %9 : vector<1x128x128xbf16> to vector<128x128xbf16>
    %cst_10 = arith.constant dense<0.000000e+00> : vector<71x128xf32>
    %11 = tpu.matmul %8, %10, %cst_10 {dimension_numbers = #tpu.dot_dimension_numbers<[1], [0], [0], [1], [0, 0, 1, 1], [], []>} : vector<71x128xbf16>, vector<128x128xbf16>, vector<71x128xf32> -> vector<71x128xf32>
    %12 = arith.addf %5, %11 : vector<71x128xf32>
    %c0_11 = arith.constant 0 : index
    %c9 = arith.constant 9 : index
    %c0_12 = arith.constant 0 : index
    %13 = vector.load %arg1[%c0_11, %c9, %c0_12] : memref<1x81x128xf32, #tpu.memory_space<vmem>>, vector<1x71x128xf32>
    %14 = vector.shape_cast %13 : vector<1x71x128xf32> to vector<71x128xf32>
    %15 = arith.truncf %14 : vector<71x128xf32> to vector<71x128xbf16>
    %c2 = arith.constant 2 : index
    %c0_13 = arith.constant 0 : index
    %c0_14 = arith.constant 0 : index
    %16 = vector.load %arg2[%c2, %c0_13, %c0_14] : memref<4x128x128xbf16, #tpu.memory_space<vmem>>, vector<1x128x128xbf16>
    %17 = vector.shape_cast %16 : vector<1x128x128xbf16> to vector<128x128xbf16>
    %cst_15 = arith.constant dense<0.000000e+00> : vector<71x128xf32>
    %18 = tpu.matmul %15, %17, %cst_15 {dimension_numbers = #tpu.dot_dimension_numbers<[1], [0], [0], [1], [0, 0, 1, 1], [], []>} : vector<71x128xbf16>, vector<128x128xbf16>, vector<71x128xf32> -> vector<71x128xf32>
    %19 = arith.addf %12, %18 : vector<71x128xf32>
    %c0_16 = arith.constant 0 : index
    %c10 = arith.constant 10 : index
    %c0_17 = arith.constant 0 : index
    %20 = vector.load %arg1[%c0_16, %c10, %c0_17] : memref<1x81x128xf32, #tpu.memory_space<vmem>>, vector<1x71x128xf32>
    %21 = vector.shape_cast %20 : vector<1x71x128xf32> to vector<71x128xf32>
    %22 = arith.truncf %21 : vector<71x128xf32> to vector<71x128xbf16>
    %c3 = arith.constant 3 : index
    %c0_18 = arith.constant 0 : index
    %c0_19 = arith.constant 0 : index
    %23 = vector.load %arg2[%c3, %c0_18, %c0_19] : memref<4x128x128xbf16, #tpu.memory_space<vmem>>, vector<1x128x128xbf16>
    %24 = vector.shape_cast %23 : vector<1x128x128xbf16> to vector<128x128xbf16>
    %cst_20 = arith.constant dense<0.000000e+00> : vector<71x128xf32>
    %25 = tpu.matmul %22, %24, %cst_20 {dimension_numbers = #tpu.dot_dimension_numbers<[1], [0], [0], [1], [0, 0, 1, 1], [], []>} : vector<71x128xbf16>, vector<128x128xbf16>, vector<71x128xf32> -> vector<71x128xf32>
    %26 = arith.addf %19, %25 : vector<71x128xf32>
    %c0_21 = arith.constant 0 : index
    %c0_22 = arith.constant 0 : index
    %27 = vector.load %arg3[%c0_21, %c0_22] : memref<1x128xf32, #tpu.memory_space<vmem>>, vector<1x128xf32>
    %28 = vector.broadcast %27 : vector<1x128xf32> to vector<71x128xf32>
    %29 = arith.addf %26, %28 : vector<71x128xf32>
    %cst_23 = arith.constant 5.000000e-01 : f32
    %30 = vector.broadcast %cst_23 : f32 to vector<71x128xf32>
    %31 = arith.mulf %30, %29 : vector<71x128xf32>
    %cst_24 = arith.constant 0.707106769 : f32
    %32 = vector.broadcast %cst_24 : f32 to vector<71x128xf32>
    %33 = arith.mulf %29, %32 : vector<71x128xf32>
    %34 = math.erf %33 : vector<71x128xf32>
    %cst_25 = arith.constant 1.000000e+00 : f32
    %35 = vector.broadcast %cst_25 : f32 to vector<71x128xf32>
    %36 = arith.addf %35, %34 : vector<71x128xf32>
    %37 = arith.mulf %31, %36 : vector<71x128xf32>
    %c0_26 = arith.constant 0 : index
    %c0_27 = arith.constant 0 : index
    %c0_28 = arith.constant 0 : index
    %38 = vector.load %arg4[%c0_26, %c0_27, %c0_28] : memref<4x25x71xf32, #tpu.memory_space<vmem>>, vector<1x25x71xf32>
    %39 = vector.shape_cast %38 : vector<1x25x71xf32> to vector<25x71xf32>
    %cst_29 = arith.constant dense<0.000000e+00> : vector<25x128xf32>
    %40 = tpu.matmul %39, %37, %cst_29 {dimension_numbers = #tpu.dot_dimension_numbers<[1], [0], [0], [1], [0, 0, 1, 1], [], []>} : vector<25x71xf32>, vector<71x128xf32>, vector<25x128xf32> -> vector<25x128xf32>
    %41 = vector.extract_strided_slice %40 {offsets = [0, 0], sizes = [19, 128], strides = [1, 1]} : vector<25x128xf32> to vector<19x128xf32>
    %42 = arith.truncf %41 : vector<19x128xf32> to vector<19x128xbf16>
    %c0_30 = arith.constant 0 : index
    %c0_31 = arith.constant 0 : index
    %c0_32 = arith.constant 0 : index
    %43 = vector.load %arg5[%c0_30, %c0_31, %c0_32] : memref<16x128x128xbf16, #tpu.memory_space<vmem>>, vector<1x128x128xbf16>
    %44 = vector.shape_cast %43 : vector<1x128x128xbf16> to vector<128x128xbf16>
    %cst_33 = arith.constant dense<0.000000e+00> : vector<19x128xf32>
    %45 = tpu.matmul %42, %44, %cst_33 {dimension_numbers = #tpu.dot_dimension_numbers<[1], [0], [0], [1], [0, 0, 1, 1], [], []>} : vector<19x128xbf16>, vector<128x128xbf16>, vector<19x128xf32> -> vector<19x128xf32>
    %46 = vector.extract_strided_slice %40 {offsets = [1, 0], sizes = [19, 128], strides = [1, 1]} : vector<25x128xf32> to vector<19x128xf32>
    %47 = arith.truncf %46 : vector<19x128xf32> to vector<19x128xbf16>
    %c1_34 = arith.constant 1 : index
    %c0_35 = arith.constant 0 : index
    %c0_36 = arith.constant 0 : index
    %48 = vector.load %arg5[%c1_34, %c0_35, %c0_36] : memref<16x128x128xbf16, #tpu.memory_space<vmem>>, vector<1x128x128xbf16>
    %49 = vector.shape_cast %48 : vector<1x128x128xbf16> to vector<128x128xbf16>
    %cst_37 = arith.constant dense<0.000000e+00> : vector<19x128xf32>
    %50 = tpu.matmul %47, %49, %cst_37 {dimension_numbers = #tpu.dot_dimension_numbers<[1], [0], [0], [1], [0, 0, 1, 1], [], []>} : vector<19x128xbf16>, vector<128x128xbf16>, vector<19x128xf32> -> vector<19x128xf32>
    %51 = arith.addf %45, %50 : vector<19x128xf32>
    %52 = vector.extract_strided_slice %40 {offsets = [5, 0], sizes = [19, 128], strides = [1, 1]} : vector<25x128xf32> to vector<19x128xf32>
    %53 = arith.truncf %52 : vector<19x128xf32> to vector<19x128xbf16>
    %c2_38 = arith.constant 2 : index
    %c0_39 = arith.constant 0 : index
    %c0_40 = arith.constant 0 : index
    %54 = vector.load %arg5[%c2_38, %c0_39, %c0_40] : memref<16x128x128xbf16, #tpu.memory_space<vmem>>, vector<1x128x128xbf16>
    %55 = vector.shape_cast %54 : vector<1x128x128xbf16> to vector<128x128xbf16>
    %cst_41 = arith.constant dense<0.000000e+00> : vector<19x128xf32>
    %56 = tpu.matmul %53, %55, %cst_41 {dimension_numbers = #tpu.dot_dimension_numbers<[1], [0], [0], [1], [0, 0, 1, 1], [], []>} : vector<19x128xbf16>, vector<128x128xbf16>, vector<19x128xf32> -> vector<19x128xf32>
    %57 = arith.addf %51, %56 : vector<19x128xf32>
    %58 = vector.extract_strided_slice %40 {offsets = [6, 0], sizes = [19, 128], strides = [1, 1]} : vector<25x128xf32> to vector<19x128xf32>
    %59 = arith.truncf %58 : vector<19x128xf32> to vector<19x128xbf16>
    %c3_42 = arith.constant 3 : index
    %c0_43 = arith.constant 0 : index
    %c0_44 = arith.constant 0 : index
    %60 = vector.load %arg5[%c3_42, %c0_43, %c0_44] : memref<16x128x128xbf16, #tpu.memory_space<vmem>>, vector<1x128x128xbf16>
    %61 = vector.shape_cast %60 : vector<1x128x128xbf16> to vector<128x128xbf16>
    %cst_45 = arith.constant dense<0.000000e+00> : vector<19x128xf32>
    %62 = tpu.matmul %59, %61, %cst_45 {dimension_numbers = #tpu.dot_dimension_numbers<[1], [0], [0], [1], [0, 0, 1, 1], [], []>} : vector<19x128xbf16>, vector<128x128xbf16>, vector<19x128xf32> -> vector<19x128xf32>
    %63 = arith.addf %57, %62 : vector<19x128xf32>
    %c1_46 = arith.constant 1 : index
    %c0_47 = arith.constant 0 : index
    %c0_48 = arith.constant 0 : index
    %64 = vector.load %arg4[%c1_46, %c0_47, %c0_48] : memref<4x25x71xf32, #tpu.memory_space<vmem>>, vector<1x25x71xf32>
    %65 = vector.shape_cast %64 : vector<1x25x71xf32> to vector<25x71xf32>
    %cst_49 = arith.constant dense<0.000000e+00> : vector<25x128xf32>
    %66 = tpu.matmul %65, %37, %cst_49 {dimension_numbers = #tpu.dot_dimension_numbers<[1], [0], [0], [1], [0, 0, 1, 1], [], []>} : vector<25x71xf32>, vector<71x128xf32>, vector<25x128xf32> -> vector<25x128xf32>
    %67 = vector.extract_strided_slice %66 {offsets = [0, 0], sizes = [19, 128], strides = [1, 1]} : vector<25x128xf32> to vector<19x128xf32>
    %68 = arith.truncf %67 : vector<19x128xf32> to vector<19x128xbf16>
    %c4 = arith.constant 4 : index
    %c0_50 = arith.constant 0 : index
    %c0_51 = arith.constant 0 : index
    %69 = vector.load %arg5[%c4, %c0_50, %c0_51] : memref<16x128x128xbf16, #tpu.memory_space<vmem>>, vector<1x128x128xbf16>
    %70 = vector.shape_cast %69 : vector<1x128x128xbf16> to vector<128x128xbf16>
    %cst_52 = arith.constant dense<0.000000e+00> : vector<19x128xf32>
    %71 = tpu.matmul %68, %70, %cst_52 {dimension_numbers = #tpu.dot_dimension_numbers<[1], [0], [0], [1], [0, 0, 1, 1], [], []>} : vector<19x128xbf16>, vector<128x128xbf16>, vector<19x128xf32> -> vector<19x128xf32>
    %72 = arith.addf %63, %71 : vector<19x128xf32>
    %73 = vector.extract_strided_slice %66 {offsets = [1, 0], sizes = [19, 128], strides = [1, 1]} : vector<25x128xf32> to vector<19x128xf32>
    %74 = arith.truncf %73 : vector<19x128xf32> to vector<19x128xbf16>
    %c5 = arith.constant 5 : index
    %c0_53 = arith.constant 0 : index
    %c0_54 = arith.constant 0 : index
    %75 = vector.load %arg5[%c5, %c0_53, %c0_54] : memref<16x128x128xbf16, #tpu.memory_space<vmem>>, vector<1x128x128xbf16>
    %76 = vector.shape_cast %75 : vector<1x128x128xbf16> to vector<128x128xbf16>
    %cst_55 = arith.constant dense<0.000000e+00> : vector<19x128xf32>
    %77 = tpu.matmul %74, %76, %cst_55 {dimension_numbers = #tpu.dot_dimension_numbers<[1], [0], [0], [1], [0, 0, 1, 1], [], []>} : vector<19x128xbf16>, vector<128x128xbf16>, vector<19x128xf32> -> vector<19x128xf32>
    %78 = arith.addf %72, %77 : vector<19x128xf32>
    %79 = vector.extract_strided_slice %66 {offsets = [5, 0], sizes = [19, 128], strides = [1, 1]} : vector<25x128xf32> to vector<19x128xf32>
    %80 = arith.truncf %79 : vector<19x128xf32> to vector<19x128xbf16>
    %c6 = arith.constant 6 : index
    %c0_56 = arith.constant 0 : index
    %c0_57 = arith.constant 0 : index
    %81 = vector.load %arg5[%c6, %c0_56, %c0_57] : memref<16x128x128xbf16, #tpu.memory_space<vmem>>, vector<1x128x128xbf16>
    %82 = vector.shape_cast %81 : vector<1x128x128xbf16> to vector<128x128xbf16>
    %cst_58 = arith.constant dense<0.000000e+00> : vector<19x128xf32>
    %83 = tpu.matmul %80, %82, %cst_58 {dimension_numbers = #tpu.dot_dimension_numbers<[1], [0], [0], [1], [0, 0, 1, 1], [], []>} : vector<19x128xbf16>, vector<128x128xbf16>, vector<19x128xf32> -> vector<19x128xf32>
    %84 = arith.addf %78, %83 : vector<19x128xf32>
    %85 = vector.extract_strided_slice %66 {offsets = [6, 0], sizes = [19, 128], strides = [1, 1]} : vector<25x128xf32> to vector<19x128xf32>
    %86 = arith.truncf %85 : vector<19x128xf32> to vector<19x128xbf16>
    %c7 = arith.constant 7 : index
    %c0_59 = arith.constant 0 : index
    %c0_60 = arith.constant 0 : index
    %87 = vector.load %arg5[%c7, %c0_59, %c0_60] : memref<16x128x128xbf16, #tpu.memory_space<vmem>>, vector<1x128x128xbf16>
    %88 = vector.shape_cast %87 : vector<1x128x128xbf16> to vector<128x128xbf16>
    %cst_61 = arith.constant dense<0.000000e+00> : vector<19x128xf32>
    %89 = tpu.matmul %86, %88, %cst_61 {dimension_numbers = #tpu.dot_dimension_numbers<[1], [0], [0], [1], [0, 0, 1, 1], [], []>} : vector<19x128xbf16>, vector<128x128xbf16>, vector<19x128xf32> -> vector<19x128xf32>
    %90 = arith.addf %84, %89 : vector<19x128xf32>
    %c2_62 = arith.constant 2 : index
    %c0_63 = arith.constant 0 : index
    %c0_64 = arith.constant 0 : index
    %91 = vector.load %arg4[%c2_62, %c0_63, %c0_64] : memref<4x25x71xf32, #tpu.memory_space<vmem>>, vector<1x25x71xf32>
    %92 = vector.shape_cast %91 : vector<1x25x71xf32> to vector<25x71xf32>
    %cst_65 = arith.constant dense<0.000000e+00> : vector<25x128xf32>
    %93 = tpu.matmul %92, %37, %cst_65 {dimension_numbers = #tpu.dot_dimension_numbers<[1], [0], [0], [1], [0, 0, 1, 1], [], []>} : vector<25x71xf32>, vector<71x128xf32>, vector<25x128xf32> -> vector<25x128xf32>
    %94 = vector.extract_strided_slice %93 {offsets = [0, 0], sizes = [19, 128], strides = [1, 1]} : vector<25x128xf32> to vector<19x128xf32>
    %95 = arith.truncf %94 : vector<19x128xf32> to vector<19x128xbf16>
    %c8 = arith.constant 8 : index
    %c0_66 = arith.constant 0 : index
    %c0_67 = arith.constant 0 : index
    %96 = vector.load %arg5[%c8, %c0_66, %c0_67] : memref<16x128x128xbf16, #tpu.memory_space<vmem>>, vector<1x128x128xbf16>
    %97 = vector.shape_cast %96 : vector<1x128x128xbf16> to vector<128x128xbf16>
    %cst_68 = arith.constant dense<0.000000e+00> : vector<19x128xf32>
    %98 = tpu.matmul %95, %97, %cst_68 {dimension_numbers = #tpu.dot_dimension_numbers<[1], [0], [0], [1], [0, 0, 1, 1], [], []>} : vector<19x128xbf16>, vector<128x128xbf16>, vector<19x128xf32> -> vector<19x128xf32>
    %99 = arith.addf %90, %98 : vector<19x128xf32>
    %100 = vector.extract_strided_slice %93 {offsets = [1, 0], sizes = [19, 128], strides = [1, 1]} : vector<25x128xf32> to vector<19x128xf32>
    %101 = arith.truncf %100 : vector<19x128xf32> to vector<19x128xbf16>
    %c9_69 = arith.constant 9 : index
    %c0_70 = arith.constant 0 : index
    %c0_71 = arith.constant 0 : index
    %102 = vector.load %arg5[%c9_69, %c0_70, %c0_71] : memref<16x128x128xbf16, #tpu.memory_space<vmem>>, vector<1x128x128xbf16>
    %103 = vector.shape_cast %102 : vector<1x128x128xbf16> to vector<128x128xbf16>
    %cst_72 = arith.constant dense<0.000000e+00> : vector<19x128xf32>
    %104 = tpu.matmul %101, %103, %cst_72 {dimension_numbers = #tpu.dot_dimension_numbers<[1], [0], [0], [1], [0, 0, 1, 1], [], []>} : vector<19x128xbf16>, vector<128x128xbf16>, vector<19x128xf32> -> vector<19x128xf32>
    %105 = arith.addf %99, %104 : vector<19x128xf32>
    %106 = vector.extract_strided_slice %93 {offsets = [5, 0], sizes = [19, 128], strides = [1, 1]} : vector<25x128xf32> to vector<19x128xf32>
    %107 = arith.truncf %106 : vector<19x128xf32> to vector<19x128xbf16>
    %c10_73 = arith.constant 10 : index
    %c0_74 = arith.constant 0 : index
    %c0_75 = arith.constant 0 : index
    %108 = vector.load %arg5[%c10_73, %c0_74, %c0_75] : memref<16x128x128xbf16, #tpu.memory_space<vmem>>, vector<1x128x128xbf16>
    %109 = vector.shape_cast %108 : vector<1x128x128xbf16> to vector<128x128xbf16>
    %cst_76 = arith.constant dense<0.000000e+00> : vector<19x128xf32>
    %110 = tpu.matmul %107, %109, %cst_76 {dimension_numbers = #tpu.dot_dimension_numbers<[1], [0], [0], [1], [0, 0, 1, 1], [], []>} : vector<19x128xbf16>, vector<128x128xbf16>, vector<19x128xf32> -> vector<19x128xf32>
    %111 = arith.addf %105, %110 : vector<19x128xf32>
    %112 = vector.extract_strided_slice %93 {offsets = [6, 0], sizes = [19, 128], strides = [1, 1]} : vector<25x128xf32> to vector<19x128xf32>
    %113 = arith.truncf %112 : vector<19x128xf32> to vector<19x128xbf16>
    %c11 = arith.constant 11 : index
    %c0_77 = arith.constant 0 : index
    %c0_78 = arith.constant 0 : index
    %114 = vector.load %arg5[%c11, %c0_77, %c0_78] : memref<16x128x128xbf16, #tpu.memory_space<vmem>>, vector<1x128x128xbf16>
    %115 = vector.shape_cast %114 : vector<1x128x128xbf16> to vector<128x128xbf16>
    %cst_79 = arith.constant dense<0.000000e+00> : vector<19x128xf32>
    %116 = tpu.matmul %113, %115, %cst_79 {dimension_numbers = #tpu.dot_dimension_numbers<[1], [0], [0], [1], [0, 0, 1, 1], [], []>} : vector<19x128xbf16>, vector<128x128xbf16>, vector<19x128xf32> -> vector<19x128xf32>
    %117 = arith.addf %111, %116 : vector<19x128xf32>
    %c3_80 = arith.constant 3 : index
    %c0_81 = arith.constant 0 : index
    %c0_82 = arith.constant 0 : index
    %118 = vector.load %arg4[%c3_80, %c0_81, %c0_82] : memref<4x25x71xf32, #tpu.memory_space<vmem>>, vector<1x25x71xf32>
    %119 = vector.shape_cast %118 : vector<1x25x71xf32> to vector<25x71xf32>
    %cst_83 = arith.constant dense<0.000000e+00> : vector<25x128xf32>
    %120 = tpu.matmul %119, %37, %cst_83 {dimension_numbers = #tpu.dot_dimension_numbers<[1], [0], [0], [1], [0, 0, 1, 1], [], []>} : vector<25x71xf32>, vector<71x128xf32>, vector<25x128xf32> -> vector<25x128xf32>
    %121 = vector.extract_strided_slice %120 {offsets = [0, 0], sizes = [19, 128], strides = [1, 1]} : vector<25x128xf32> to vector<19x128xf32>
    %122 = arith.truncf %121 : vector<19x128xf32> to vector<19x128xbf16>
    %c12 = arith.constant 12 : index
    %c0_84 = arith.constant 0 : index
    %c0_85 = arith.constant 0 : index
    %123 = vector.load %arg5[%c12, %c0_84, %c0_85] : memref<16x128x128xbf16, #tpu.memory_space<vmem>>, vector<1x128x128xbf16>
    %124 = vector.shape_cast %123 : vector<1x128x128xbf16> to vector<128x128xbf16>
    %cst_86 = arith.constant dense<0.000000e+00> : vector<19x128xf32>
    %125 = tpu.matmul %122, %124, %cst_86 {dimension_numbers = #tpu.dot_dimension_numbers<[1], [0], [0], [1], [0, 0, 1, 1], [], []>} : vector<19x128xbf16>, vector<128x128xbf16>, vector<19x128xf32> -> vector<19x128xf32>
    %126 = arith.addf %117, %125 : vector<19x128xf32>
    %127 = vector.extract_strided_slice %120 {offsets = [1, 0], sizes = [19, 128], strides = [1, 1]} : vector<25x128xf32> to vector<19x128xf32>
    %128 = arith.truncf %127 : vector<19x128xf32> to vector<19x128xbf16>
    %c13 = arith.constant 13 : index
    %c0_87 = arith.constant 0 : index
    %c0_88 = arith.constant 0 : index
    %129 = vector.load %arg5[%c13, %c0_87, %c0_88] : memref<16x128x128xbf16, #tpu.memory_space<vmem>>, vector<1x128x128xbf16>
    %130 = vector.shape_cast %129 : vector<1x128x128xbf16> to vector<128x128xbf16>
    %cst_89 = arith.constant dense<0.000000e+00> : vector<19x128xf32>
    %131 = tpu.matmul %128, %130, %cst_89 {dimension_numbers = #tpu.dot_dimension_numbers<[1], [0], [0], [1], [0, 0, 1, 1], [], []>} : vector<19x128xbf16>, vector<128x128xbf16>, vector<19x128xf32> -> vector<19x128xf32>
    %132 = arith.addf %126, %131 : vector<19x128xf32>
    %133 = vector.extract_strided_slice %120 {offsets = [5, 0], sizes = [19, 128], strides = [1, 1]} : vector<25x128xf32> to vector<19x128xf32>
    %134 = arith.truncf %133 : vector<19x128xf32> to vector<19x128xbf16>
    %c14 = arith.constant 14 : index
    %c0_90 = arith.constant 0 : index
    %c0_91 = arith.constant 0 : index
    %135 = vector.load %arg5[%c14, %c0_90, %c0_91] : memref<16x128x128xbf16, #tpu.memory_space<vmem>>, vector<1x128x128xbf16>
    %136 = vector.shape_cast %135 : vector<1x128x128xbf16> to vector<128x128xbf16>
    %cst_92 = arith.constant dense<0.000000e+00> : vector<19x128xf32>
    %137 = tpu.matmul %134, %136, %cst_92 {dimension_numbers = #tpu.dot_dimension_numbers<[1], [0], [0], [1], [0, 0, 1, 1], [], []>} : vector<19x128xbf16>, vector<128x128xbf16>, vector<19x128xf32> -> vector<19x128xf32>
    %138 = arith.addf %132, %137 : vector<19x128xf32>
    %139 = vector.extract_strided_slice %120 {offsets = [6, 0], sizes = [19, 128], strides = [1, 1]} : vector<25x128xf32> to vector<19x128xf32>
    %140 = arith.truncf %139 : vector<19x128xf32> to vector<19x128xbf16>
    %c15 = arith.constant 15 : index
    %c0_93 = arith.constant 0 : index
    %c0_94 = arith.constant 0 : index
    %141 = vector.load %arg5[%c15, %c0_93, %c0_94] : memref<16x128x128xbf16, #tpu.memory_space<vmem>>, vector<1x128x128xbf16>
    %142 = vector.shape_cast %141 : vector<1x128x128xbf16> to vector<128x128xbf16>
    %cst_95 = arith.constant dense<0.000000e+00> : vector<19x128xf32>
    %143 = tpu.matmul %140, %142, %cst_95 {dimension_numbers = #tpu.dot_dimension_numbers<[1], [0], [0], [1], [0, 0, 1, 1], [], []>} : vector<19x128xbf16>, vector<128x128xbf16>, vector<19x128xf32> -> vector<19x128xf32>
    %144 = arith.addf %138, %143 : vector<19x128xf32>
    %c0_96 = arith.constant 0 : index
    %c0_97 = arith.constant 0 : index
    %145 = vector.load %arg6[%c0_96, %c0_97] : memref<1x128xf32, #tpu.memory_space<vmem>>, vector<1x128xf32>
    %146 = vector.broadcast %145 : vector<1x128xf32> to vector<19x128xf32>
    %147 = arith.addf %144, %146 : vector<19x128xf32>
    %cst_98 = arith.constant 5.000000e-01 : f32
    %148 = vector.broadcast %cst_98 : f32 to vector<19x128xf32>
    %149 = arith.mulf %148, %147 : vector<19x128xf32>
    %cst_99 = arith.constant 0.707106769 : f32
    %150 = vector.broadcast %cst_99 : f32 to vector<19x128xf32>
    %151 = arith.mulf %147, %150 : vector<19x128xf32>
    %152 = math.erf %151 : vector<19x128xf32>
    %cst_100 = arith.constant 1.000000e+00 : f32
    %153 = vector.broadcast %cst_100 : f32 to vector<19x128xf32>
    %154 = arith.addf %153, %152 : vector<19x128xf32>
    %155 = arith.mulf %149, %154 : vector<19x128xf32>
    %c0_101 = arith.constant 0 : index
    %c0_102 = arith.constant 0 : index
    %156 = vector.load %arg7[%c0_101, %c0_102] : memref<36x19xf32, #tpu.memory_space<vmem>>, vector<36x19xf32>
    %cst_103 = arith.constant dense<0.000000e+00> : vector<36x128xf32>
    %157 = tpu.matmul %156, %155, %cst_103 {dimension_numbers = #tpu.dot_dimension_numbers<[1], [0], [0], [1], [0, 0, 1, 1], [], []>} : vector<36x19xf32>, vector<19x128xf32>, vector<36x128xf32> -> vector<36x128xf32>
    %cst_104 = arith.constant 5.000000e-01 : f32
    %158 = vector.broadcast %cst_104 : f32 to vector<36x128xf32>
    %159 = arith.mulf %158, %157 : vector<36x128xf32>
    %cst_105 = arith.constant 0.707106769 : f32
    %160 = vector.broadcast %cst_105 : f32 to vector<36x128xf32>
    %161 = arith.mulf %157, %160 : vector<36x128xf32>
    %162 = math.erf %161 : vector<36x128xf32>
    %cst_106 = arith.constant 1.000000e+00 : f32
    %163 = vector.broadcast %cst_106 : f32 to vector<36x128xf32>
    %164 = arith.addf %163, %162 : vector<36x128xf32>
    %165 = arith.mulf %159, %164 : vector<36x128xf32>
    %166 = vector.extract_strided_slice %165 {offsets = [0, 0], sizes = [22, 128], strides = [1, 1]} : vector<36x128xf32> to vector<22x128xf32>
    %167 = arith.truncf %166 : vector<22x128xf32> to vector<22x128xbf16>
    %c0_107 = arith.constant 0 : index
    %c0_108 = arith.constant 0 : index
    %c0_109 = arith.constant 0 : index
    %168 = vector.load %arg8[%c0_107, %c0_108, %c0_109] : memref<9x128x128xbf16, #tpu.memory_space<vmem>>, vector<1x128x128xbf16>
    %169 = vector.shape_cast %168 : vector<1x128x128xbf16> to vector<128x128xbf16>
    %cst_110 = arith.constant dense<0.000000e+00> : vector<22x128xf32>
    %170 = tpu.matmul %167, %169, %cst_110 {dimension_numbers = #tpu.dot_dimension_numbers<[1], [0], [0], [1], [0, 0, 1, 1], [], []>} : vector<22x128xbf16>, vector<128x128xbf16>, vector<22x128xf32> -> vector<22x128xf32>
    %171 = vector.extract_strided_slice %165 {offsets = [1, 0], sizes = [22, 128], strides = [1, 1]} : vector<36x128xf32> to vector<22x128xf32>
    %172 = arith.truncf %171 : vector<22x128xf32> to vector<22x128xbf16>
    %c1_111 = arith.constant 1 : index
    %c0_112 = arith.constant 0 : index
    %c0_113 = arith.constant 0 : index
    %173 = vector.load %arg8[%c1_111, %c0_112, %c0_113] : memref<9x128x128xbf16, #tpu.memory_space<vmem>>, vector<1x128x128xbf16>
    %174 = vector.shape_cast %173 : vector<1x128x128xbf16> to vector<128x128xbf16>
    %cst_114 = arith.constant dense<0.000000e+00> : vector<22x128xf32>
    %175 = tpu.matmul %172, %174, %cst_114 {dimension_numbers = #tpu.dot_dimension_numbers<[1], [0], [0], [1], [0, 0, 1, 1], [], []>} : vector<22x128xbf16>, vector<128x128xbf16>, vector<22x128xf32> -> vector<22x128xf32>
    %176 = arith.addf %170, %175 : vector<22x128xf32>
    %177 = vector.extract_strided_slice %165 {offsets = [2, 0], sizes = [22, 128], strides = [1, 1]} : vector<36x128xf32> to vector<22x128xf32>
    %178 = arith.truncf %177 : vector<22x128xf32> to vector<22x128xbf16>
    %c2_115 = arith.constant 2 : index
    %c0_116 = arith.constant 0 : index
    %c0_117 = arith.constant 0 : index
    %179 = vector.load %arg8[%c2_115, %c0_116, %c0_117] : memref<9x128x128xbf16, #tpu.memory_space<vmem>>, vector<1x128x128xbf16>
    %180 = vector.shape_cast %179 : vector<1x128x128xbf16> to vector<128x128xbf16>
    %cst_118 = arith.constant dense<0.000000e+00> : vector<22x128xf32>
    %181 = tpu.matmul %178, %180, %cst_118 {dimension_numbers = #tpu.dot_dimension_numbers<[1], [0], [0], [1], [0, 0, 1, 1], [], []>} : vector<22x128xbf16>, vector<128x128xbf16>, vector<22x128xf32> -> vector<22x128xf32>
    %182 = arith.addf %176, %181 : vector<22x128xf32>
    %183 = vector.extract_strided_slice %165 {offsets = [6, 0], sizes = [22, 128], strides = [1, 1]} : vector<36x128xf32> to vector<22x128xf32>
    %184 = arith.truncf %183 : vector<22x128xf32> to vector<22x128xbf16>
    %c3_119 = arith.constant 3 : index
    %c0_120 = arith.constant 0 : index
    %c0_121 = arith.constant 0 : index
    %185 = vector.load %arg8[%c3_119, %c0_120, %c0_121] : memref<9x128x128xbf16, #tpu.memory_space<vmem>>, vector<1x128x128xbf16>
    %186 = vector.shape_cast %185 : vector<1x128x128xbf16> to vector<128x128xbf16>
    %cst_122 = arith.constant dense<0.000000e+00> : vector<22x128xf32>
    %187 = tpu.matmul %184, %186, %cst_122 {dimension_numbers = #tpu.dot_dimension_numbers<[1], [0], [0], [1], [0, 0, 1, 1], [], []>} : vector<22x128xbf16>, vector<128x128xbf16>, vector<22x128xf32> -> vector<22x128xf32>
    %188 = arith.addf %182, %187 : vector<22x128xf32>
    %189 = vector.extract_strided_slice %165 {offsets = [7, 0], sizes = [22, 128], strides = [1, 1]} : vector<36x128xf32> to vector<22x128xf32>
    %190 = arith.truncf %189 : vector<22x128xf32> to vector<22x128xbf16>
    %c4_123 = arith.constant 4 : index
    %c0_124 = arith.constant 0 : index
    %c0_125 = arith.constant 0 : index
    %191 = vector.load %arg8[%c4_123, %c0_124, %c0_125] : memref<9x128x128xbf16, #tpu.memory_space<vmem>>, vector<1x128x128xbf16>
    %192 = vector.shape_cast %191 : vector<1x128x128xbf16> to vector<128x128xbf16>
    %cst_126 = arith.constant dense<0.000000e+00> : vector<22x128xf32>
    %193 = tpu.matmul %190, %192, %cst_126 {dimension_numbers = #tpu.dot_dimension_numbers<[1], [0], [0], [1], [0, 0, 1, 1], [], []>} : vector<22x128xbf16>, vector<128x128xbf16>, vector<22x128xf32> -> vector<22x128xf32>
    %194 = arith.addf %188, %193 : vector<22x128xf32>
    %195 = vector.extract_strided_slice %165 {offsets = [8, 0], sizes = [22, 128], strides = [1, 1]} : vector<36x128xf32> to vector<22x128xf32>
    %196 = arith.truncf %195 : vector<22x128xf32> to vector<22x128xbf16>
    %c5_127 = arith.constant 5 : index
    %c0_128 = arith.constant 0 : index
    %c0_129 = arith.constant 0 : index
    %197 = vector.load %arg8[%c5_127, %c0_128, %c0_129] : memref<9x128x128xbf16, #tpu.memory_space<vmem>>, vector<1x128x128xbf16>
    %198 = vector.shape_cast %197 : vector<1x128x128xbf16> to vector<128x128xbf16>
    %cst_130 = arith.constant dense<0.000000e+00> : vector<22x128xf32>
    %199 = tpu.matmul %196, %198, %cst_130 {dimension_numbers = #tpu.dot_dimension_numbers<[1], [0], [0], [1], [0, 0, 1, 1], [], []>} : vector<22x128xbf16>, vector<128x128xbf16>, vector<22x128xf32> -> vector<22x128xf32>
    %200 = arith.addf %194, %199 : vector<22x128xf32>
    %201 = vector.extract_strided_slice %165 {offsets = [12, 0], sizes = [22, 128], strides = [1, 1]} : vector<36x128xf32> to vector<22x128xf32>
    %202 = arith.truncf %201 : vector<22x128xf32> to vector<22x128xbf16>
    %c6_131 = arith.constant 6 : index
    %c0_132 = arith.constant 0 : index
    %c0_133 = arith.constant 0 : index
    %203 = vector.load %arg8[%c6_131, %c0_132, %c0_133] : memref<9x128x128xbf16, #tpu.memory_space<vmem>>, vector<1x128x128xbf16>
    %204 = vector.shape_cast %203 : vector<1x128x128xbf16> to vector<128x128xbf16>
    %cst_134 = arith.constant dense<0.000000e+00> : vector<22x128xf32>
    %205 = tpu.matmul %202, %204, %cst_134 {dimension_numbers = #tpu.dot_dimension_numbers<[1], [0], [0], [1], [0, 0, 1, 1], [], []>} : vector<22x128xbf16>, vector<128x128xbf16>, vector<22x128xf32> -> vector<22x128xf32>
    %206 = arith.addf %200, %205 : vector<22x128xf32>
    %207 = vector.extract_strided_slice %165 {offsets = [13, 0], sizes = [22, 128], strides = [1, 1]} : vector<36x128xf32> to vector<22x128xf32>
    %208 = arith.truncf %207 : vector<22x128xf32> to vector<22x128xbf16>
    %c7_135 = arith.constant 7 : index
    %c0_136 = arith.constant 0 : index
    %c0_137 = arith.constant 0 : index
    %209 = vector.load %arg8[%c7_135, %c0_136, %c0_137] : memref<9x128x128xbf16, #tpu.memory_space<vmem>>, vector<1x128x128xbf16>
    %210 = vector.shape_cast %209 : vector<1x128x128xbf16> to vector<128x128xbf16>
    %cst_138 = arith.constant dense<0.000000e+00> : vector<22x128xf32>
    %211 = tpu.matmul %208, %210, %cst_138 {dimension_numbers = #tpu.dot_dimension_numbers<[1], [0], [0], [1], [0, 0, 1, 1], [], []>} : vector<22x128xbf16>, vector<128x128xbf16>, vector<22x128xf32> -> vector<22x128xf32>
    %212 = arith.addf %206, %211 : vector<22x128xf32>
    %213 = vector.extract_strided_slice %165 {offsets = [14, 0], sizes = [22, 128], strides = [1, 1]} : vector<36x128xf32> to vector<22x128xf32>
    %214 = arith.truncf %213 : vector<22x128xf32> to vector<22x128xbf16>
    %c8_139 = arith.constant 8 : index
    %c0_140 = arith.constant 0 : index
    %c0_141 = arith.constant 0 : index
    %215 = vector.load %arg8[%c8_139, %c0_140, %c0_141] : memref<9x128x128xbf16, #tpu.memory_space<vmem>>, vector<1x128x128xbf16>
    %216 = vector.shape_cast %215 : vector<1x128x128xbf16> to vector<128x128xbf16>
    %cst_142 = arith.constant dense<0.000000e+00> : vector<22x128xf32>
    %217 = tpu.matmul %214, %216, %cst_142 {dimension_numbers = #tpu.dot_dimension_numbers<[1], [0], [0], [1], [0, 0, 1, 1], [], []>} : vector<22x128xbf16>, vector<128x128xbf16>, vector<22x128xf32> -> vector<22x128xf32>
    %218 = arith.addf %212, %217 : vector<22x128xf32>
    %c0_143 = arith.constant 0 : index
    %c0_144 = arith.constant 0 : index
    %219 = vector.load %arg10[%c0_143, %c0_144] : memref<36x22xf32, #tpu.memory_space<vmem>>, vector<36x22xf32>
    %c0_145 = arith.constant 0 : index
    %c0_146 = arith.constant 0 : index
    %220 = vector.load %arg9[%c0_145, %c0_146] : memref<1x128xf32, #tpu.memory_space<vmem>>, vector<1x128xf32>
    %221 = vector.broadcast %220 : vector<1x128xf32> to vector<22x128xf32>
    %222 = arith.addf %218, %221 : vector<22x128xf32>
    %cst_147 = arith.constant 5.000000e-01 : f32
    %223 = vector.broadcast %cst_147 : f32 to vector<22x128xf32>
    %224 = arith.mulf %223, %222 : vector<22x128xf32>
    %cst_148 = arith.constant 0.707106769 : f32
    %225 = vector.broadcast %cst_148 : f32 to vector<22x128xf32>
    %226 = arith.mulf %222, %225 : vector<22x128xf32>
    %227 = math.erf %226 : vector<22x128xf32>
    %cst_149 = arith.constant 1.000000e+00 : f32
    %228 = vector.broadcast %cst_149 : f32 to vector<22x128xf32>
    %229 = arith.addf %228, %227 : vector<22x128xf32>
    %230 = arith.mulf %224, %229 : vector<22x128xf32>
    %cst_150 = arith.constant dense<0.000000e+00> : vector<36x128xf32>
    %231 = tpu.matmul %219, %230, %cst_150 {dimension_numbers = #tpu.dot_dimension_numbers<[1], [0], [0], [1], [0, 0, 1, 1], [], []>} : vector<36x22xf32>, vector<22x128xf32>, vector<36x128xf32> -> vector<36x128xf32>
    %232 = vector.extract_strided_slice %231 {offsets = [0, 0], sizes = [22, 128], strides = [1, 1]} : vector<36x128xf32> to vector<22x128xf32>
    %233 = arith.truncf %232 : vector<22x128xf32> to vector<22x128xbf16>
    %c0_151 = arith.constant 0 : index
    %c0_152 = arith.constant 0 : index
    %c0_153 = arith.constant 0 : index
    %234 = vector.load %arg11[%c0_151, %c0_152, %c0_153] : memref<9x128x128xbf16, #tpu.memory_space<vmem>>, vector<1x128x128xbf16>
    %235 = vector.shape_cast %234 : vector<1x128x128xbf16> to vector<128x128xbf16>
    %cst_154 = arith.constant dense<0.000000e+00> : vector<22x128xf32>
    %236 = tpu.matmul %233, %235, %cst_154 {dimension_numbers = #tpu.dot_dimension_numbers<[1], [0], [0], [1], [0, 0, 1, 1], [], []>} : vector<22x128xbf16>, vector<128x128xbf16>, vector<22x128xf32> -> vector<22x128xf32>
    %237 = vector.extract_strided_slice %231 {offsets = [1, 0], sizes = [22, 128], strides = [1, 1]} : vector<36x128xf32> to vector<22x128xf32>
    %238 = arith.truncf %237 : vector<22x128xf32> to vector<22x128xbf16>
    %c1_155 = arith.constant 1 : index
    %c0_156 = arith.constant 0 : index
    %c0_157 = arith.constant 0 : index
    %239 = vector.load %arg11[%c1_155, %c0_156, %c0_157] : memref<9x128x128xbf16, #tpu.memory_space<vmem>>, vector<1x128x128xbf16>
    %240 = vector.shape_cast %239 : vector<1x128x128xbf16> to vector<128x128xbf16>
    %cst_158 = arith.constant dense<0.000000e+00> : vector<22x128xf32>
    %241 = tpu.matmul %238, %240, %cst_158 {dimension_numbers = #tpu.dot_dimension_numbers<[1], [0], [0], [1], [0, 0, 1, 1], [], []>} : vector<22x128xbf16>, vector<128x128xbf16>, vector<22x128xf32> -> vector<22x128xf32>
    %242 = arith.addf %236, %241 : vector<22x128xf32>
    %243 = vector.extract_strided_slice %231 {offsets = [2, 0], sizes = [22, 128], strides = [1, 1]} : vector<36x128xf32> to vector<22x128xf32>
    %244 = arith.truncf %243 : vector<22x128xf32> to vector<22x128xbf16>
    %c2_159 = arith.constant 2 : index
    %c0_160 = arith.constant 0 : index
    %c0_161 = arith.constant 0 : index
    %245 = vector.load %arg11[%c2_159, %c0_160, %c0_161] : memref<9x128x128xbf16, #tpu.memory_space<vmem>>, vector<1x128x128xbf16>
    %246 = vector.shape_cast %245 : vector<1x128x128xbf16> to vector<128x128xbf16>
    %cst_162 = arith.constant dense<0.000000e+00> : vector<22x128xf32>
    %247 = tpu.matmul %244, %246, %cst_162 {dimension_numbers = #tpu.dot_dimension_numbers<[1], [0], [0], [1], [0, 0, 1, 1], [], []>} : vector<22x128xbf16>, vector<128x128xbf16>, vector<22x128xf32> -> vector<22x128xf32>
    %248 = arith.addf %242, %247 : vector<22x128xf32>
    %249 = vector.extract_strided_slice %231 {offsets = [6, 0], sizes = [22, 128], strides = [1, 1]} : vector<36x128xf32> to vector<22x128xf32>
    %250 = arith.truncf %249 : vector<22x128xf32> to vector<22x128xbf16>
    %c3_163 = arith.constant 3 : index
    %c0_164 = arith.constant 0 : index
    %c0_165 = arith.constant 0 : index
    %251 = vector.load %arg11[%c3_163, %c0_164, %c0_165] : memref<9x128x128xbf16, #tpu.memory_space<vmem>>, vector<1x128x128xbf16>
    %252 = vector.shape_cast %251 : vector<1x128x128xbf16> to vector<128x128xbf16>
    %cst_166 = arith.constant dense<0.000000e+00> : vector<22x128xf32>
    %253 = tpu.matmul %250, %252, %cst_166 {dimension_numbers = #tpu.dot_dimension_numbers<[1], [0], [0], [1], [0, 0, 1, 1], [], []>} : vector<22x128xbf16>, vector<128x128xbf16>, vector<22x128xf32> -> vector<22x128xf32>
    %254 = arith.addf %248, %253 : vector<22x128xf32>
    %255 = vector.extract_strided_slice %231 {offsets = [7, 0], sizes = [22, 128], strides = [1, 1]} : vector<36x128xf32> to vector<22x128xf32>
    %256 = arith.truncf %255 : vector<22x128xf32> to vector<22x128xbf16>
    %c4_167 = arith.constant 4 : index
    %c0_168 = arith.constant 0 : index
    %c0_169 = arith.constant 0 : index
    %257 = vector.load %arg11[%c4_167, %c0_168, %c0_169] : memref<9x128x128xbf16, #tpu.memory_space<vmem>>, vector<1x128x128xbf16>
    %258 = vector.shape_cast %257 : vector<1x128x128xbf16> to vector<128x128xbf16>
    %cst_170 = arith.constant dense<0.000000e+00> : vector<22x128xf32>
    %259 = tpu.matmul %256, %258, %cst_170 {dimension_numbers = #tpu.dot_dimension_numbers<[1], [0], [0], [1], [0, 0, 1, 1], [], []>} : vector<22x128xbf16>, vector<128x128xbf16>, vector<22x128xf32> -> vector<22x128xf32>
    %260 = arith.addf %254, %259 : vector<22x128xf32>
    %261 = vector.extract_strided_slice %231 {offsets = [8, 0], sizes = [22, 128], strides = [1, 1]} : vector<36x128xf32> to vector<22x128xf32>
    %262 = arith.truncf %261 : vector<22x128xf32> to vector<22x128xbf16>
    %c5_171 = arith.constant 5 : index
    %c0_172 = arith.constant 0 : index
    %c0_173 = arith.constant 0 : index
    %263 = vector.load %arg11[%c5_171, %c0_172, %c0_173] : memref<9x128x128xbf16, #tpu.memory_space<vmem>>, vector<1x128x128xbf16>
    %264 = vector.shape_cast %263 : vector<1x128x128xbf16> to vector<128x128xbf16>
    %cst_174 = arith.constant dense<0.000000e+00> : vector<22x128xf32>
    %265 = tpu.matmul %262, %264, %cst_174 {dimension_numbers = #tpu.dot_dimension_numbers<[1], [0], [0], [1], [0, 0, 1, 1], [], []>} : vector<22x128xbf16>, vector<128x128xbf16>, vector<22x128xf32> -> vector<22x128xf32>
    %266 = arith.addf %260, %265 : vector<22x128xf32>
    %267 = vector.extract_strided_slice %231 {offsets = [12, 0], sizes = [22, 128], strides = [1, 1]} : vector<36x128xf32> to vector<22x128xf32>
    %268 = arith.truncf %267 : vector<22x128xf32> to vector<22x128xbf16>
    %c6_175 = arith.constant 6 : index
    %c0_176 = arith.constant 0 : index
    %c0_177 = arith.constant 0 : index
    %269 = vector.load %arg11[%c6_175, %c0_176, %c0_177] : memref<9x128x128xbf16, #tpu.memory_space<vmem>>, vector<1x128x128xbf16>
    %270 = vector.shape_cast %269 : vector<1x128x128xbf16> to vector<128x128xbf16>
    %cst_178 = arith.constant dense<0.000000e+00> : vector<22x128xf32>
    %271 = tpu.matmul %268, %270, %cst_178 {dimension_numbers = #tpu.dot_dimension_numbers<[1], [0], [0], [1], [0, 0, 1, 1], [], []>} : vector<22x128xbf16>, vector<128x128xbf16>, vector<22x128xf32> -> vector<22x128xf32>
    %272 = arith.addf %266, %271 : vector<22x128xf32>
    %273 = vector.extract_strided_slice %231 {offsets = [13, 0], sizes = [22, 128], strides = [1, 1]} : vector<36x128xf32> to vector<22x128xf32>
    %274 = arith.truncf %273 : vector<22x128xf32> to vector<22x128xbf16>
    %c7_179 = arith.constant 7 : index
    %c0_180 = arith.constant 0 : index
    %c0_181 = arith.constant 0 : index
    %275 = vector.load %arg11[%c7_179, %c0_180, %c0_181] : memref<9x128x128xbf16, #tpu.memory_space<vmem>>, vector<1x128x128xbf16>
    %276 = vector.shape_cast %275 : vector<1x128x128xbf16> to vector<128x128xbf16>
    %cst_182 = arith.constant dense<0.000000e+00> : vector<22x128xf32>
    %277 = tpu.matmul %274, %276, %cst_182 {dimension_numbers = #tpu.dot_dimension_numbers<[1], [0], [0], [1], [0, 0, 1, 1], [], []>} : vector<22x128xbf16>, vector<128x128xbf16>, vector<22x128xf32> -> vector<22x128xf32>
    %278 = arith.addf %272, %277 : vector<22x128xf32>
    %279 = vector.extract_strided_slice %231 {offsets = [14, 0], sizes = [22, 128], strides = [1, 1]} : vector<36x128xf32> to vector<22x128xf32>
    %280 = arith.truncf %279 : vector<22x128xf32> to vector<22x128xbf16>
    %c8_183 = arith.constant 8 : index
    %c0_184 = arith.constant 0 : index
    %c0_185 = arith.constant 0 : index
    %281 = vector.load %arg11[%c8_183, %c0_184, %c0_185] : memref<9x128x128xbf16, #tpu.memory_space<vmem>>, vector<1x128x128xbf16>
    %282 = vector.shape_cast %281 : vector<1x128x128xbf16> to vector<128x128xbf16>
    %cst_186 = arith.constant dense<0.000000e+00> : vector<22x128xf32>
    %283 = tpu.matmul %280, %282, %cst_186 {dimension_numbers = #tpu.dot_dimension_numbers<[1], [0], [0], [1], [0, 0, 1, 1], [], []>} : vector<22x128xbf16>, vector<128x128xbf16>, vector<22x128xf32> -> vector<22x128xf32>
    %284 = arith.addf %278, %283 : vector<22x128xf32>
    %285 = vector.extract_strided_slice %157 {offsets = [7, 0], sizes = [22, 128], strides = [1, 1]} : vector<36x128xf32> to vector<22x128xf32>
    %286 = arith.addf %284, %285 : vector<22x128xf32>
    %c0_187 = arith.constant 0 : index
    %c0_188 = arith.constant 0 : index
    %287 = vector.load %arg12[%c0_187, %c0_188] : memref<1x128xf32, #tpu.memory_space<vmem>>, vector<1x128xf32>
    %288 = vector.broadcast %287 : vector<1x128xf32> to vector<22x128xf32>
    %289 = arith.addf %286, %288 : vector<22x128xf32>
    %c0_189 = arith.constant 0 : index
    %c0_190 = arith.constant 0 : index
    %290 = vector.load %arg13[%c0_189, %c0_190] : memref<36x22xf32, #tpu.memory_space<vmem>>, vector<36x22xf32>
    %cst_191 = arith.constant dense<0.000000e+00> : vector<36x128xf32>
    %291 = tpu.matmul %290, %289, %cst_191 {dimension_numbers = #tpu.dot_dimension_numbers<[1], [0], [0], [1], [0, 0, 1, 1], [], []>} : vector<36x22xf32>, vector<22x128xf32>, vector<36x128xf32> -> vector<36x128xf32>
    %cst_192 = arith.constant 5.000000e-01 : f32
    %292 = vector.broadcast %cst_192 : f32 to vector<36x128xf32>
    %293 = arith.mulf %292, %291 : vector<36x128xf32>
    %cst_193 = arith.constant 0.707106769 : f32
    %294 = vector.broadcast %cst_193 : f32 to vector<36x128xf32>
    %295 = arith.mulf %291, %294 : vector<36x128xf32>
    %296 = math.erf %295 : vector<36x128xf32>
    %cst_194 = arith.constant 1.000000e+00 : f32
    %297 = vector.broadcast %cst_194 : f32 to vector<36x128xf32>
    %298 = arith.addf %297, %296 : vector<36x128xf32>
    %299 = arith.mulf %293, %298 : vector<36x128xf32>
    %300 = vector.extract_strided_slice %299 {offsets = [0, 0], sizes = [22, 128], strides = [1, 1]} : vector<36x128xf32> to vector<22x128xf32>
    %301 = arith.truncf %300 : vector<22x128xf32> to vector<22x128xbf16>
    %c0_195 = arith.constant 0 : index
    %c0_196 = arith.constant 0 : index
    %c0_197 = arith.constant 0 : index
    %302 = vector.load %arg14[%c0_195, %c0_196, %c0_197] : memref<9x128x128xbf16, #tpu.memory_space<vmem>>, vector<1x128x128xbf16>
    %303 = vector.shape_cast %302 : vector<1x128x128xbf16> to vector<128x128xbf16>
    %cst_198 = arith.constant dense<0.000000e+00> : vector<22x128xf32>
    %304 = tpu.matmul %301, %303, %cst_198 {dimension_numbers = #tpu.dot_dimension_numbers<[1], [0], [0], [1], [0, 0, 1, 1], [], []>} : vector<22x128xbf16>, vector<128x128xbf16>, vector<22x128xf32> -> vector<22x128xf32>
    %305 = vector.extract_strided_slice %299 {offsets = [1, 0], sizes = [22, 128], strides = [1, 1]} : vector<36x128xf32> to vector<22x128xf32>
    %306 = arith.truncf %305 : vector<22x128xf32> to vector<22x128xbf16>
    %c1_199 = arith.constant 1 : index
    %c0_200 = arith.constant 0 : index
    %c0_201 = arith.constant 0 : index
    %307 = vector.load %arg14[%c1_199, %c0_200, %c0_201] : memref<9x128x128xbf16, #tpu.memory_space<vmem>>, vector<1x128x128xbf16>
    %308 = vector.shape_cast %307 : vector<1x128x128xbf16> to vector<128x128xbf16>
    %cst_202 = arith.constant dense<0.000000e+00> : vector<22x128xf32>
    %309 = tpu.matmul %306, %308, %cst_202 {dimension_numbers = #tpu.dot_dimension_numbers<[1], [0], [0], [1], [0, 0, 1, 1], [], []>} : vector<22x128xbf16>, vector<128x128xbf16>, vector<22x128xf32> -> vector<22x128xf32>
    %310 = arith.addf %304, %309 : vector<22x128xf32>
    %311 = vector.extract_strided_slice %299 {offsets = [2, 0], sizes = [22, 128], strides = [1, 1]} : vector<36x128xf32> to vector<22x128xf32>
    %312 = arith.truncf %311 : vector<22x128xf32> to vector<22x128xbf16>
    %c2_203 = arith.constant 2 : index
    %c0_204 = arith.constant 0 : index
    %c0_205 = arith.constant 0 : index
    %313 = vector.load %arg14[%c2_203, %c0_204, %c0_205] : memref<9x128x128xbf16, #tpu.memory_space<vmem>>, vector<1x128x128xbf16>
    %314 = vector.shape_cast %313 : vector<1x128x128xbf16> to vector<128x128xbf16>
    %cst_206 = arith.constant dense<0.000000e+00> : vector<22x128xf32>
    %315 = tpu.matmul %312, %314, %cst_206 {dimension_numbers = #tpu.dot_dimension_numbers<[1], [0], [0], [1], [0, 0, 1, 1], [], []>} : vector<22x128xbf16>, vector<128x128xbf16>, vector<22x128xf32> -> vector<22x128xf32>
    %316 = arith.addf %310, %315 : vector<22x128xf32>
    %317 = vector.extract_strided_slice %299 {offsets = [6, 0], sizes = [22, 128], strides = [1, 1]} : vector<36x128xf32> to vector<22x128xf32>
    %318 = arith.truncf %317 : vector<22x128xf32> to vector<22x128xbf16>
    %c3_207 = arith.constant 3 : index
    %c0_208 = arith.constant 0 : index
    %c0_209 = arith.constant 0 : index
    %319 = vector.load %arg14[%c3_207, %c0_208, %c0_209] : memref<9x128x128xbf16, #tpu.memory_space<vmem>>, vector<1x128x128xbf16>
    %320 = vector.shape_cast %319 : vector<1x128x128xbf16> to vector<128x128xbf16>
    %cst_210 = arith.constant dense<0.000000e+00> : vector<22x128xf32>
    %321 = tpu.matmul %318, %320, %cst_210 {dimension_numbers = #tpu.dot_dimension_numbers<[1], [0], [0], [1], [0, 0, 1, 1], [], []>} : vector<22x128xbf16>, vector<128x128xbf16>, vector<22x128xf32> -> vector<22x128xf32>
    %322 = arith.addf %316, %321 : vector<22x128xf32>
    %323 = vector.extract_strided_slice %299 {offsets = [7, 0], sizes = [22, 128], strides = [1, 1]} : vector<36x128xf32> to vector<22x128xf32>
    %324 = arith.truncf %323 : vector<22x128xf32> to vector<22x128xbf16>
    %c4_211 = arith.constant 4 : index
    %c0_212 = arith.constant 0 : index
    %c0_213 = arith.constant 0 : index
    %325 = vector.load %arg14[%c4_211, %c0_212, %c0_213] : memref<9x128x128xbf16, #tpu.memory_space<vmem>>, vector<1x128x128xbf16>
    %326 = vector.shape_cast %325 : vector<1x128x128xbf16> to vector<128x128xbf16>
    %cst_214 = arith.constant dense<0.000000e+00> : vector<22x128xf32>
    %327 = tpu.matmul %324, %326, %cst_214 {dimension_numbers = #tpu.dot_dimension_numbers<[1], [0], [0], [1], [0, 0, 1, 1], [], []>} : vector<22x128xbf16>, vector<128x128xbf16>, vector<22x128xf32> -> vector<22x128xf32>
    %328 = arith.addf %322, %327 : vector<22x128xf32>
    %329 = vector.extract_strided_slice %299 {offsets = [8, 0], sizes = [22, 128], strides = [1, 1]} : vector<36x128xf32> to vector<22x128xf32>
    %330 = arith.truncf %329 : vector<22x128xf32> to vector<22x128xbf16>
    %c5_215 = arith.constant 5 : index
    %c0_216 = arith.constant 0 : index
    %c0_217 = arith.constant 0 : index
    %331 = vector.load %arg14[%c5_215, %c0_216, %c0_217] : memref<9x128x128xbf16, #tpu.memory_space<vmem>>, vector<1x128x128xbf16>
    %332 = vector.shape_cast %331 : vector<1x128x128xbf16> to vector<128x128xbf16>
    %cst_218 = arith.constant dense<0.000000e+00> : vector<22x128xf32>
    %333 = tpu.matmul %330, %332, %cst_218 {dimension_numbers = #tpu.dot_dimension_numbers<[1], [0], [0], [1], [0, 0, 1, 1], [], []>} : vector<22x128xbf16>, vector<128x128xbf16>, vector<22x128xf32> -> vector<22x128xf32>
    %334 = arith.addf %328, %333 : vector<22x128xf32>
    %335 = vector.extract_strided_slice %299 {offsets = [12, 0], sizes = [22, 128], strides = [1, 1]} : vector<36x128xf32> to vector<22x128xf32>
    %336 = arith.truncf %335 : vector<22x128xf32> to vector<22x128xbf16>
    %c6_219 = arith.constant 6 : index
    %c0_220 = arith.constant 0 : index
    %c0_221 = arith.constant 0 : index
    %337 = vector.load %arg14[%c6_219, %c0_220, %c0_221] : memref<9x128x128xbf16, #tpu.memory_space<vmem>>, vector<1x128x128xbf16>
    %338 = vector.shape_cast %337 : vector<1x128x128xbf16> to vector<128x128xbf16>
    %cst_222 = arith.constant dense<0.000000e+00> : vector<22x128xf32>
    %339 = tpu.matmul %336, %338, %cst_222 {dimension_numbers = #tpu.dot_dimension_numbers<[1], [0], [0], [1], [0, 0, 1, 1], [], []>} : vector<22x128xbf16>, vector<128x128xbf16>, vector<22x128xf32> -> vector<22x128xf32>
    %340 = arith.addf %334, %339 : vector<22x128xf32>
    %341 = vector.extract_strided_slice %299 {offsets = [13, 0], sizes = [22, 128], strides = [1, 1]} : vector<36x128xf32> to vector<22x128xf32>
    %342 = arith.truncf %341 : vector<22x128xf32> to vector<22x128xbf16>
    %c7_223 = arith.constant 7 : index
    %c0_224 = arith.constant 0 : index
    %c0_225 = arith.constant 0 : index
    %343 = vector.load %arg14[%c7_223, %c0_224, %c0_225] : memref<9x128x128xbf16, #tpu.memory_space<vmem>>, vector<1x128x128xbf16>
    %344 = vector.shape_cast %343 : vector<1x128x128xbf16> to vector<128x128xbf16>
    %cst_226 = arith.constant dense<0.000000e+00> : vector<22x128xf32>
    %345 = tpu.matmul %342, %344, %cst_226 {dimension_numbers = #tpu.dot_dimension_numbers<[1], [0], [0], [1], [0, 0, 1, 1], [], []>} : vector<22x128xbf16>, vector<128x128xbf16>, vector<22x128xf32> -> vector<22x128xf32>
    %346 = arith.addf %340, %345 : vector<22x128xf32>
    %347 = vector.extract_strided_slice %299 {offsets = [14, 0], sizes = [22, 128], strides = [1, 1]} : vector<36x128xf32> to vector<22x128xf32>
    %348 = arith.truncf %347 : vector<22x128xf32> to vector<22x128xbf16>
    %c8_227 = arith.constant 8 : index
    %c0_228 = arith.constant 0 : index
    %c0_229 = arith.constant 0 : index
    %349 = vector.load %arg14[%c8_227, %c0_228, %c0_229] : memref<9x128x128xbf16, #tpu.memory_space<vmem>>, vector<1x128x128xbf16>
    %350 = vector.shape_cast %349 : vector<1x128x128xbf16> to vector<128x128xbf16>
    %cst_230 = arith.constant dense<0.000000e+00> : vector<22x128xf32>
    %351 = tpu.matmul %348, %350, %cst_230 {dimension_numbers = #tpu.dot_dimension_numbers<[1], [0], [0], [1], [0, 0, 1, 1], [], []>} : vector<22x128xbf16>, vector<128x128xbf16>, vector<22x128xf32> -> vector<22x128xf32>
    %352 = arith.addf %346, %351 : vector<22x128xf32>
    %c0_231 = arith.constant 0 : index
    %c0_232 = arith.constant 0 : index
    %353 = vector.load %arg16[%c0_231, %c0_232] : memref<36x22xf32, #tpu.memory_space<vmem>>, vector<36x22xf32>
    %c0_233 = arith.constant 0 : index
    %c0_234 = arith.constant 0 : index
    %354 = vector.load %arg15[%c0_233, %c0_234] : memref<1x128xf32, #tpu.memory_space<vmem>>, vector<1x128xf32>
    %355 = vector.broadcast %354 : vector<1x128xf32> to vector<22x128xf32>
    %356 = arith.addf %352, %355 : vector<22x128xf32>
    %cst_235 = arith.constant 5.000000e-01 : f32
    %357 = vector.broadcast %cst_235 : f32 to vector<22x128xf32>
    %358 = arith.mulf %357, %356 : vector<22x128xf32>
    %cst_236 = arith.constant 0.707106769 : f32
    %359 = vector.broadcast %cst_236 : f32 to vector<22x128xf32>
    %360 = arith.mulf %356, %359 : vector<22x128xf32>
    %361 = math.erf %360 : vector<22x128xf32>
    %cst_237 = arith.constant 1.000000e+00 : f32
    %362 = vector.broadcast %cst_237 : f32 to vector<22x128xf32>
    %363 = arith.addf %362, %361 : vector<22x128xf32>
    %364 = arith.mulf %358, %363 : vector<22x128xf32>
    %cst_238 = arith.constant dense<0.000000e+00> : vector<36x128xf32>
    %365 = tpu.matmul %353, %364, %cst_238 {dimension_numbers = #tpu.dot_dimension_numbers<[1], [0], [0], [1], [0, 0, 1, 1], [], []>} : vector<36x22xf32>, vector<22x128xf32>, vector<36x128xf32> -> vector<36x128xf32>
    %366 = vector.extract_strided_slice %365 {offsets = [0, 0], sizes = [22, 128], strides = [1, 1]} : vector<36x128xf32> to vector<22x128xf32>
    %367 = arith.truncf %366 : vector<22x128xf32> to vector<22x128xbf16>
    %c0_239 = arith.constant 0 : index
    %c0_240 = arith.constant 0 : index
    %c0_241 = arith.constant 0 : index
    %368 = vector.load %arg17[%c0_239, %c0_240, %c0_241] : memref<9x128x128xbf16, #tpu.memory_space<vmem>>, vector<1x128x128xbf16>
    %369 = vector.shape_cast %368 : vector<1x128x128xbf16> to vector<128x128xbf16>
    %cst_242 = arith.constant dense<0.000000e+00> : vector<22x128xf32>
    %370 = tpu.matmul %367, %369, %cst_242 {dimension_numbers = #tpu.dot_dimension_numbers<[1], [0], [0], [1], [0, 0, 1, 1], [], []>} : vector<22x128xbf16>, vector<128x128xbf16>, vector<22x128xf32> -> vector<22x128xf32>
    %371 = vector.extract_strided_slice %365 {offsets = [1, 0], sizes = [22, 128], strides = [1, 1]} : vector<36x128xf32> to vector<22x128xf32>
    %372 = arith.truncf %371 : vector<22x128xf32> to vector<22x128xbf16>
    %c1_243 = arith.constant 1 : index
    %c0_244 = arith.constant 0 : index
    %c0_245 = arith.constant 0 : index
    %373 = vector.load %arg17[%c1_243, %c0_244, %c0_245] : memref<9x128x128xbf16, #tpu.memory_space<vmem>>, vector<1x128x128xbf16>
    %374 = vector.shape_cast %373 : vector<1x128x128xbf16> to vector<128x128xbf16>
    %cst_246 = arith.constant dense<0.000000e+00> : vector<22x128xf32>
    %375 = tpu.matmul %372, %374, %cst_246 {dimension_numbers = #tpu.dot_dimension_numbers<[1], [0], [0], [1], [0, 0, 1, 1], [], []>} : vector<22x128xbf16>, vector<128x128xbf16>, vector<22x128xf32> -> vector<22x128xf32>
    %376 = arith.addf %370, %375 : vector<22x128xf32>
    %377 = vector.extract_strided_slice %365 {offsets = [2, 0], sizes = [22, 128], strides = [1, 1]} : vector<36x128xf32> to vector<22x128xf32>
    %378 = arith.truncf %377 : vector<22x128xf32> to vector<22x128xbf16>
    %c2_247 = arith.constant 2 : index
    %c0_248 = arith.constant 0 : index
    %c0_249 = arith.constant 0 : index
    %379 = vector.load %arg17[%c2_247, %c0_248, %c0_249] : memref<9x128x128xbf16, #tpu.memory_space<vmem>>, vector<1x128x128xbf16>
    %380 = vector.shape_cast %379 : vector<1x128x128xbf16> to vector<128x128xbf16>
    %cst_250 = arith.constant dense<0.000000e+00> : vector<22x128xf32>
    %381 = tpu.matmul %378, %380, %cst_250 {dimension_numbers = #tpu.dot_dimension_numbers<[1], [0], [0], [1], [0, 0, 1, 1], [], []>} : vector<22x128xbf16>, vector<128x128xbf16>, vector<22x128xf32> -> vector<22x128xf32>
    %382 = arith.addf %376, %381 : vector<22x128xf32>
    %383 = vector.extract_strided_slice %365 {offsets = [6, 0], sizes = [22, 128], strides = [1, 1]} : vector<36x128xf32> to vector<22x128xf32>
    %384 = arith.truncf %383 : vector<22x128xf32> to vector<22x128xbf16>
    %c3_251 = arith.constant 3 : index
    %c0_252 = arith.constant 0 : index
    %c0_253 = arith.constant 0 : index
    %385 = vector.load %arg17[%c3_251, %c0_252, %c0_253] : memref<9x128x128xbf16, #tpu.memory_space<vmem>>, vector<1x128x128xbf16>
    %386 = vector.shape_cast %385 : vector<1x128x128xbf16> to vector<128x128xbf16>
    %cst_254 = arith.constant dense<0.000000e+00> : vector<22x128xf32>
    %387 = tpu.matmul %384, %386, %cst_254 {dimension_numbers = #tpu.dot_dimension_numbers<[1], [0], [0], [1], [0, 0, 1, 1], [], []>} : vector<22x128xbf16>, vector<128x128xbf16>, vector<22x128xf32> -> vector<22x128xf32>
    %388 = arith.addf %382, %387 : vector<22x128xf32>
    %389 = vector.extract_strided_slice %365 {offsets = [7, 0], sizes = [22, 128], strides = [1, 1]} : vector<36x128xf32> to vector<22x128xf32>
    %390 = arith.truncf %389 : vector<22x128xf32> to vector<22x128xbf16>
    %c4_255 = arith.constant 4 : index
    %c0_256 = arith.constant 0 : index
    %c0_257 = arith.constant 0 : index
    %391 = vector.load %arg17[%c4_255, %c0_256, %c0_257] : memref<9x128x128xbf16, #tpu.memory_space<vmem>>, vector<1x128x128xbf16>
    %392 = vector.shape_cast %391 : vector<1x128x128xbf16> to vector<128x128xbf16>
    %cst_258 = arith.constant dense<0.000000e+00> : vector<22x128xf32>
    %393 = tpu.matmul %390, %392, %cst_258 {dimension_numbers = #tpu.dot_dimension_numbers<[1], [0], [0], [1], [0, 0, 1, 1], [], []>} : vector<22x128xbf16>, vector<128x128xbf16>, vector<22x128xf32> -> vector<22x128xf32>
    %394 = arith.addf %388, %393 : vector<22x128xf32>
    %395 = vector.extract_strided_slice %365 {offsets = [8, 0], sizes = [22, 128], strides = [1, 1]} : vector<36x128xf32> to vector<22x128xf32>
    %396 = arith.truncf %395 : vector<22x128xf32> to vector<22x128xbf16>
    %c5_259 = arith.constant 5 : index
    %c0_260 = arith.constant 0 : index
    %c0_261 = arith.constant 0 : index
    %397 = vector.load %arg17[%c5_259, %c0_260, %c0_261] : memref<9x128x128xbf16, #tpu.memory_space<vmem>>, vector<1x128x128xbf16>
    %398 = vector.shape_cast %397 : vector<1x128x128xbf16> to vector<128x128xbf16>
    %cst_262 = arith.constant dense<0.000000e+00> : vector<22x128xf32>
    %399 = tpu.matmul %396, %398, %cst_262 {dimension_numbers = #tpu.dot_dimension_numbers<[1], [0], [0], [1], [0, 0, 1, 1], [], []>} : vector<22x128xbf16>, vector<128x128xbf16>, vector<22x128xf32> -> vector<22x128xf32>
    %400 = arith.addf %394, %399 : vector<22x128xf32>
    %401 = vector.extract_strided_slice %365 {offsets = [12, 0], sizes = [22, 128], strides = [1, 1]} : vector<36x128xf32> to vector<22x128xf32>
    %402 = arith.truncf %401 : vector<22x128xf32> to vector<22x128xbf16>
    %c6_263 = arith.constant 6 : index
    %c0_264 = arith.constant 0 : index
    %c0_265 = arith.constant 0 : index
    %403 = vector.load %arg17[%c6_263, %c0_264, %c0_265] : memref<9x128x128xbf16, #tpu.memory_space<vmem>>, vector<1x128x128xbf16>
    %404 = vector.shape_cast %403 : vector<1x128x128xbf16> to vector<128x128xbf16>
    %cst_266 = arith.constant dense<0.000000e+00> : vector<22x128xf32>
    %405 = tpu.matmul %402, %404, %cst_266 {dimension_numbers = #tpu.dot_dimension_numbers<[1], [0], [0], [1], [0, 0, 1, 1], [], []>} : vector<22x128xbf16>, vector<128x128xbf16>, vector<22x128xf32> -> vector<22x128xf32>
    %406 = arith.addf %400, %405 : vector<22x128xf32>
    %407 = vector.extract_strided_slice %365 {offsets = [13, 0], sizes = [22, 128], strides = [1, 1]} : vector<36x128xf32> to vector<22x128xf32>
    %408 = arith.truncf %407 : vector<22x128xf32> to vector<22x128xbf16>
    %c7_267 = arith.constant 7 : index
    %c0_268 = arith.constant 0 : index
    %c0_269 = arith.constant 0 : index
    %409 = vector.load %arg17[%c7_267, %c0_268, %c0_269] : memref<9x128x128xbf16, #tpu.memory_space<vmem>>, vector<1x128x128xbf16>
    %410 = vector.shape_cast %409 : vector<1x128x128xbf16> to vector<128x128xbf16>
    %cst_270 = arith.constant dense<0.000000e+00> : vector<22x128xf32>
    %411 = tpu.matmul %408, %410, %cst_270 {dimension_numbers = #tpu.dot_dimension_numbers<[1], [0], [0], [1], [0, 0, 1, 1], [], []>} : vector<22x128xbf16>, vector<128x128xbf16>, vector<22x128xf32> -> vector<22x128xf32>
    %412 = arith.addf %406, %411 : vector<22x128xf32>
    %413 = vector.extract_strided_slice %365 {offsets = [14, 0], sizes = [22, 128], strides = [1, 1]} : vector<36x128xf32> to vector<22x128xf32>
    %414 = arith.truncf %413 : vector<22x128xf32> to vector<22x128xbf16>
    %c8_271 = arith.constant 8 : index
    %c0_272 = arith.constant 0 : index
    %c0_273 = arith.constant 0 : index
    %415 = vector.load %arg17[%c8_271, %c0_272, %c0_273] : memref<9x128x128xbf16, #tpu.memory_space<vmem>>, vector<1x128x128xbf16>
    %416 = vector.shape_cast %415 : vector<1x128x128xbf16> to vector<128x128xbf16>
    %cst_274 = arith.constant dense<0.000000e+00> : vector<22x128xf32>
    %417 = tpu.matmul %414, %416, %cst_274 {dimension_numbers = #tpu.dot_dimension_numbers<[1], [0], [0], [1], [0, 0, 1, 1], [], []>} : vector<22x128xbf16>, vector<128x128xbf16>, vector<22x128xf32> -> vector<22x128xf32>
    %418 = arith.addf %412, %417 : vector<22x128xf32>
    %419 = vector.extract_strided_slice %291 {offsets = [7, 0], sizes = [22, 128], strides = [1, 1]} : vector<36x128xf32> to vector<22x128xf32>
    %420 = arith.truncf %419 : vector<22x128xf32> to vector<22x128xbf16>
    %c0_275 = arith.constant 0 : index
    %c0_276 = arith.constant 0 : index
    %421 = vector.load %arg19[%c0_275, %c0_276] : memref<128x128xbf16, #tpu.memory_space<vmem>>, vector<128x128xbf16>
    %cst_277 = arith.constant dense<0.000000e+00> : vector<22x128xf32>
    %422 = tpu.matmul %420, %421, %cst_277 {dimension_numbers = #tpu.dot_dimension_numbers<[1], [0], [0], [1], [0, 0, 1, 1], [], []>} : vector<22x128xbf16>, vector<128x128xbf16>, vector<22x128xf32> -> vector<22x128xf32>
    %423 = arith.addf %418, %422 : vector<22x128xf32>
    %c0_278 = arith.constant 0 : index
    %c0_279 = arith.constant 0 : index
    %424 = vector.load %arg18[%c0_278, %c0_279] : memref<1x128xf32, #tpu.memory_space<vmem>>, vector<1x128xf32>
    %425 = vector.broadcast %424 : vector<1x128xf32> to vector<22x128xf32>
    %426 = arith.addf %423, %425 : vector<22x128xf32>
    %c0_280 = arith.constant 0 : index
    %c0_281 = arith.constant 0 : index
    %427 = vector.load %arg20[%c0_280, %c0_281] : memref<16x22xf32, #tpu.memory_space<vmem>>, vector<16x22xf32>
    %cst_282 = arith.constant dense<0.000000e+00> : vector<16x128xf32>
    %428 = tpu.matmul %427, %426, %cst_282 {dimension_numbers = #tpu.dot_dimension_numbers<[1], [0], [0], [1], [0, 0, 1, 1], [], []>} : vector<16x22xf32>, vector<22x128xf32>, vector<16x128xf32> -> vector<16x128xf32>
    %429 = math.absf %428 : vector<16x128xf32>
    %cst_283 = arith.constant dense<0xFF800000> : vector<16xf32>
    %430 = vector.multi_reduction <maximumf>, %429, %cst_283 [1] : vector<16x128xf32> to vector<16xf32>
    %431 = vector.shape_cast %430 : vector<16xf32> to vector<16x1xf32>
    %432 = tpu.reciprocal %431 {approx = true} : vector<16x1xf32> -> vector<16x1xf32>
    %433 = vector.broadcast %432 : vector<16x1xf32> to vector<16x128xf32>
    %434 = arith.mulf %428, %433 : vector<16x128xf32>
    %c0_284 = arith.constant 0 : index
    %c0_285 = arith.constant 0 : index
    %c0_286 = arith.constant 0 : index
    %435 = vector.load %arg21[%c0_284, %c0_285, %c0_286] : memref<1x16x128xf32, #tpu.memory_space<vmem>>, vector<1x16x128xf32>
    %436 = vector.shape_cast %435 : vector<1x16x128xf32> to vector<16x128xf32>
    %437 = vector.shape_cast %434 : vector<16x128xf32> to vector<1x16x128xf32>
    tpu.vector_store %arg21[%c0_284, %c0_285, %c0_286], %437 {strides = array<i32>} : memref<1x16x128xf32, #tpu.memory_space<vmem>>, vector<1x16x128xf32>,
    return
  }
  func.func @transform_0(%arg0: i32) -> (i32, i32, i32) {
    %c0_i32 = arith.constant 0 : i32
    %c0_i32_0 = arith.constant 0 : i32
    %c0_i32_1 = arith.constant 0 : i32
    return %arg0, %c0_i32, %c0_i32_0 : i32, i32, i32
  }
  func.func @transform_1(%arg0: i32) -> (i32, i32, i32) {
    %c0_i32 = arith.constant 0 : i32
    %c0_i32_0 = arith.constant 0 : i32
    %c0_i32_1 = arith.constant 0 : i32
    %c0_i32_2 = arith.constant 0 : i32
    return %c0_i32, %c0_i32_0, %c0_i32_1 : i32, i32, i32
  }
  func.func @transform_2(%arg0: i32) -> (i32, i32) {
    %c0_i32 = arith.constant 0 : i32
    %c0_i32_0 = arith.constant 0 : i32
    %c0_i32_1 = arith.constant 0 : i32
    return %c0_i32, %c0_i32_0 : i32, i32
  }
  func.func @transform_3(%arg0: i32) -> (i32, i32, i32) {
    %c0_i32 = arith.constant 0 : i32
    %c0_i32_0 = arith.constant 0 : i32
    %c0_i32_1 = arith.constant 0 : i32
    %c0_i32_2 = arith.constant 0 : i32
    return %c0_i32, %c0_i32_0, %c0_i32_1 : i32, i32, i32
  }
  func.func @transform_4(%arg0: i32) -> (i32, i32, i32) {
    %c0_i32 = arith.constant 0 : i32
    %c0_i32_0 = arith.constant 0 : i32
    %c0_i32_1 = arith.constant 0 : i32
    %c0_i32_2 = arith.constant 0 : i32
    return %c0_i32, %c0_i32_0, %c0_i32_1 : i32, i32, i32
  }
  func.func @transform_5(%arg0: i32) -> (i32, i32) {
    %c0_i32 = arith.constant 0 : i32
    %c0_i32_0 = arith.constant 0 : i32
    %c0_i32_1 = arith.constant 0 : i32
    return %c0_i32, %c0_i32_0 : i32, i32
  }
  func.func @transform_6(%arg0: i32) -> (i32, i32) {
    %c0_i32 = arith.constant 0 : i32
    %c0_i32_0 = arith.constant 0 : i32
    %c0_i32_1 = arith.constant 0 : i32
    return %c0_i32, %c0_i32_0 : i32, i32
  }
  func.func @transform_7(%arg0: i32) -> (i32, i32, i32) {
    %c0_i32 = arith.constant 0 : i32
    %c0_i32_0 = arith.constant 0 : i32
    %c0_i32_1 = arith.constant 0 : i32
    %c0_i32_2 = arith.constant 0 : i32
    return %c0_i32, %c0_i32_0, %c0_i32_1 : i32, i32, i32
  }
  func.func @transform_8(%arg0: i32) -> (i32, i32) {
    %c0_i32 = arith.constant 0 : i32
    %c0_i32_0 = arith.constant 0 : i32
    %c0_i32_1 = arith.constant 0 : i32
    return %c0_i32, %c0_i32_0 : i32, i32
  }
  func.func @transform_9(%arg0: i32) -> (i32, i32) {
    %c0_i32 = arith.constant 0 : i32
    %c0_i32_0 = arith.constant 0 : i32
    %c0_i32_1 = arith.constant 0 : i32
    return %c0_i32, %c0_i32_0 : i32, i32
  }
  func.func @transform_10(%arg0: i32) -> (i32, i32, i32) {
    %c0_i32 = arith.constant 0 : i32
    %c0_i32_0 = arith.constant 0 : i32
    %c0_i32_1 = arith.constant 0 : i32
    %c0_i32_2 = arith.constant 0 : i32
    return %c0_i32, %c0_i32_0, %c0_i32_1 : i32, i32, i32
  }
  func.func @transform_11(%arg0: i32) -> (i32, i32) {
    %c0_i32 = arith.constant 0 : i32
    %c0_i32_0 = arith.constant 0 : i32
    %c0_i32_1 = arith.constant 0 : i32
    return %c0_i32, %c0_i32_0 : i32, i32
  }
  func.func @transform_12(%arg0: i32) -> (i32, i32) {
    %c0_i32 = arith.constant 0 : i32
    %c0_i32_0 = arith.constant 0 : i32
    %c0_i32_1 = arith.constant 0 : i32
    return %c0_i32, %c0_i32_0 : i32, i32
  }
  func.func @transform_13(%arg0: i32) -> (i32, i32, i32) {
    %c0_i32 = arith.constant 0 : i32
    %c0_i32_0 = arith.constant 0 : i32
    %c0_i32_1 = arith.constant 0 : i32
    %c0_i32_2 = arith.constant 0 : i32
    return %c0_i32, %c0_i32_0, %c0_i32_1 : i32, i32, i32
  }
  func.func @transform_14(%arg0: i32) -> (i32, i32) {
    %c0_i32 = arith.constant 0 : i32
    %c0_i32_0 = arith.constant 0 : i32
    %c0_i32_1 = arith.constant 0 : i32
    return %c0_i32, %c0_i32_0 : i32, i32
  }
  func.func @transform_15(%arg0: i32) -> (i32, i32) {
    %c0_i32 = arith.constant 0 : i32
    %c0_i32_0 = arith.constant 0 : i32
    %c0_i32_1 = arith.constant 0 : i32
    return %c0_i32, %c0_i32_0 : i32, i32
  }
  func.func @transform_16(%arg0: i32) -> (i32, i32, i32) {
    %c0_i32 = arith.constant 0 : i32
    %c0_i32_0 = arith.constant 0 : i32
    %c0_i32_1 = arith.constant 0 : i32
    %c0_i32_2 = arith.constant 0 : i32
    return %c0_i32, %c0_i32_0, %c0_i32_1 : i32, i32, i32
  }
  func.func @transform_17(%arg0: i32) -> (i32, i32) {
    %c0_i32 = arith.constant 0 : i32
    %c0_i32_0 = arith.constant 0 : i32
    %c0_i32_1 = arith.constant 0 : i32
    return %c0_i32, %c0_i32_0 : i32, i32
  }
  func.func @transform_18(%arg0: i32) -> (i32, i32) {
    %c0_i32 = arith.constant 0 : i32
    %c0_i32_0 = arith.constant 0 : i32
    %c0_i32_1 = arith.constant 0 : i32
    return %c0_i32, %c0_i32_0 : i32, i32
  }
  func.func @transform_19(%arg0: i32) -> (i32, i32) {
    %c0_i32 = arith.constant 0 : i32
    %c0_i32_0 = arith.constant 0 : i32
    %c0_i32_1 = arith.constant 0 : i32
    return %c0_i32, %c0_i32_0 : i32, i32
  }
  func.func @transform_20(%arg0: i32) -> (i32, i32, i32) {
    %c0_i32 = arith.constant 0 : i32
    %c0_i32_0 = arith.constant 0 : i32
    %c0_i32_1 = arith.constant 0 : i32
    return %arg0, %c0_i32, %c0_i32_0 : i32, i32, i32
  }
}

</mosaic_0001>

<bundles_post_ra>
// kernel: vqvae_encoder_forward.1
= control target key start
LH: loop header
LB: loop body
LE: loop exit
PB: predicated region body
PF: predicated region fallthrough
CT: control target
= control target key end

     0   :  { %s15620_s0 = inlined_call_operand.vmem [shape: f32[2,81,128], index: 0, kind: input, shape index: {}]   ;;  %s15621_s1 = inlined_call_operand.vmem [shape: bf16[4,128,128], index: 1, kind: input, shape index: {}]   ;;  %s15622_s2 = inlined_call_operand.vmem [shape: f32[1,128], index: 2, kind: input, shape index: {}]   ;;  %s15623_s3 = inlined_call_operand.vmem [shape: f32[4,25,71], index: 3, kind: input, shape index: {}]   ;;  %s15624_s4 = inlined_call_operand.vmem [shape: bf16[16,128,128], index: 4, kind: input, shape index: {}]   ;;  %s15625_s5 = inlined_call_operand.vmem [shape: f32[1,128], index: 5, kind: input, shape index: {}]   ;;  %s15626_s6 = inlined_call_operand.vmem [shape: f32[36,19], index: 6, kind: input, shape index: {}]   ;;  %s15627_s7 = inlined_call_operand.vmem [shape: bf16[9,128,128], index: 7, kind: input, shape index: {}]   ;;  %s15628_s8 = inlined_call_operand.vmem [shape: f32[1,128], index: 8, kind: input, shape index: {}]   ;;  %s15629_s9 = inlined_call_operand.vmem [shape: f32[36,22], index: 9, kind: input, shape index: {}, may-alias: {9,12,15}]   ;;  %s15630_s10 = inlined_call_operand.vmem [shape: bf16[9,128,128], index: 10, kind: input, shape index: {}]   ;;  %s15631_s11 = inlined_call_operand.vmem [shape: f32[1,128], index: 11, kind: input, shape index: {}]   ;;  %s15632_s12 = inlined_call_operand.vmem [shape: f32[36,22], index: 12, kind: input, shape index: {}, may-alias: {9,12,15}]   ;;  %s15633_s13 = inlined_call_operand.vmem [shape: bf16[9,128,128], index: 13, kind: input, shape index: {}]   ;;  %s15634_s14 = inlined_call_operand.vmem [shape: f32[1,128], index: 14, kind: input, shape index: {}]   ;;  %s15635_s15 = inlined_call_operand.vmem [shape: f32[36,22], index: 15, kind: input, shape index: {}, may-alias: {9,12,15}]   ;;  %s15636_s16 = inlined_call_operand.vmem [shape: bf16[9,128,128], index: 16, kind: input, shape index: {}]   ;;  %s15637_s17 = inlined_call_operand.vmem [shape: f32[1,128], index: 17, kind: input, shape index: {}]   ;;  %s15638_s18 = inlined_call_operand.vmem [shape: bf16[128,128], index: 18, kind: input, shape index: {}]   ;;  %s15639_s19 = inlined_call_operand.vmem [shape: f32[16,22], index: 19, kind: input, shape index: {}]   ;;  %s15640_s20 = inlined_call_operand.hbm [shape: f32[2,16,128], index: 20, kind: output, shape index: {}]  }
   0x1   :  { %15652 = sst [smem:[#allocation11_spill]] %s15620_s0 }
   0x2   :  { %15653 = sst [smem:[#allocation12_spill]] %s15621_s1 }
   0x3   :  { %15654 = sst [smem:[#allocation13_spill]] %s15622_s2 }
   0x4   :  { %15655 = sst [smem:[#allocation14_spill]] %s15623_s3 }
   0x5   :  { %15656 = sst [smem:[#allocation15_spill]] %s15624_s4 }
   0x6   :  { %25 = vsyncpa [#allocation3], 0 }
   0x7   :  { %27 = vsyncpa [#allocation3 + $0x1], 0  ;;  %s13336_s1 = smov 0   ;;  %s13338_s22 = smov 0  }
   0x8   :  { %s13340_s23 = smov 0   ;;  %s13342_s24 = smov 0  }
   0x9 LB: > { %15657 = sst [smem:[#allocation5_spill]] %s13211_s1  ;;  %s13357_s2 = sadd.s32 4294967295, %s13223_s24   ;;  %s13223_s24 = sphi %s13342_s24, %s15673_s24   ;;  %s13219_s23 = sphi %s13340_s23, %s15675_s23   ;;  %s13215_s22 = sphi %s13338_s22, %s15677_s22   ;;  %s13211_s1 = sphi %s13336_s1, %s15676_s1  }
   0xa   : > { %15658 = sst [smem:[#allocation6_spill]] %s13219_s23  ;;  %s9123_s25 = sadd.s32 4294967294, %s13223_s24  }
   0xb   : > { %15659 = sst [smem:[#allocation7_spill]] %s13223_s24  ;;  %s13361_s3 = sadd.s32 1, %s13223_s24  }
   0xc   : > { %15660 = sst [smem:[#allocation8_spill]] %s13361_s3  ;;  %s465_s26 = sadd.s32 1, %s13219_s23 }
   0xd   : > { %s462_s27 = ssub.s32 %s13223_s24, %s13361_s3  ;;  %p475_p0 = scmp.ne.s32.totalorder %s13219_s23, %s13215_s22 }
   0xe   : > { %p463_p1 = scmp.eq.s32.totalorder %s462_s27, 0  ;;  %p476_p2 = scmp.eq.s32.totalorder %s13357_s2, 1 }
   0xf   : > { %p481_p3 = scmp.ne.s32.totalorder %s13215_s22, %s13211_s1  ;;  %p482_p4 = scmp.eq.s32.totalorder %s9123_s25, 1 }
  0x10   : > { %s13372_s28 = scalar_select %p463_p1, %s13219_s23, %s465_s26  }
  0x11   : > { %p13374_p5 = por %p476_p2, %p475_p0  ;;  %p13378_p6 = por %p482_p4, %p481_p3 }
  0x12   : > { %15661 = sst [smem:[#allocation9_spill]] %s13372_s28  ;;  %p9126_p7 = scmp.ge.s32.totalorder %s13223_s24, 1 }
  0x13   : > { %s15663_s29 = scalar_select %p13378_p6, 1, 0 }
  0x14   : > { %p565_p8 = scmp.lt.s32.totalorder %s13223_s24, 3 }
  0x15   : > { %15664 = sst [smem:[#allocation10_spill]] %s15663_s29 }
  0x16   : > { %p566_p9 = pnand %p9126_p7, %p565_p8 }
  0x17   : > { %s15665_s21 = sld [smem:[#allocation12_spill]] (!%p566_p9)  ;;  %v13225_v1 = vmov (!%p566_p9), 0.0   ;;  %vm13226_vm0 = vmmov (!%p566_p9), 0   ;;  %p623_p10 = scmp.lt.s32.totalorder (!%p566_p9), %s13357_s2, 1  ;;  %vm1315_vm1 = vcmask (!%p566_p9), 580608   ;;  %vm1328_vm2 = vcmask (!%p566_p9), 1046528  }
  0x18   : > { %569 = sbr.rel (%p566_p9) target bundleno = 4473 (0x1179), region = 100  ;;  %11127 = vmatprep.subr.bf16.mxu0 (!%p566_p9), %v13225_v1  ;;  %11163 = vmatprep.subr.bf16.mxu1 (!%p566_p9), %v13225_v1  ;;  %s15666_s0 = sld [smem:[#allocation11_spill]] (!%p566_p9)  ;;  %vm1808_vm3 = vcmask (!%p566_p9), 1044480   ;;  %vm1452_vm4 = vsmask.f32 (!%p566_p9), 7424  ;;  %vm3765_vm6 = vcmask (!%p566_p9), 1042432  }
  0x19   : > { %11143 = vmatprep.mubr.msk.bf16.mxu0 (!%p566_p9), %vm13226_vm0, %v13225_v1  ;;  %11179 = vmatprep.mubr.msk.bf16.mxu1 (!%p566_p9), %vm13226_vm0, %v13225_v1  ;;  %s15667_s27 = sld [smem:[#allocation14_spill]] (!%p566_p9)  ;;  %vm1679_vm5 = vsmask.f32 (!%p566_p9), 5376  ;;  %vm3749_vm7 = vcmask (!%p566_p9), 154624   ;;  %vm6267_vm8 = vcmask (!%p566_p9), 1040384   ;;  %vm4644_vm10 = vcmask (!%p566_p9), 1045504  }
  0x1a   : > { %vm4392_vm9 = vsmask.f32 (!%p566_p9), 4352  ;;  %vm5035_vm11 = vcmask (!%p566_p9), 179200   ;;  %s620_s24 = sand.u32 (!%p566_p9), 1, %s13215_s22   ;;  %s10455_s29 = sshll.u32 (!%p566_p9), %s13357_s2, 8 }
  0x1b   : > { %s15575_s25 = scalar_lea.hbm (!%p566_p9), %s15640_s20, %s10455_s29 }
  0x1d   : > { %v12645_v0 = vld [vmem:[%s15665_s21 + $0x40] sm:$0xff] (!%p566_p9)   ;;  %v12647_v3 = vld [vmem:[%s15665_s21 + $0x48] sm:$0xff] (!%p566_p9)   ;;  %v12649_v5 = vld [vmem:[%s15665_s21 + $0x50] sm:$0xff] (!%p566_p9)  }
  0x1e   : > { %v12646_v2 = vld [vmem:[%s15665_s21] sm:$0xff] (!%p566_p9)   ;;  %11128 = vmatpush3.bf16.msra.mxu0 (!%p566_p9), %v12645_v0  ;;  %v12648_v4 = vld [vmem:[%s15665_s21 + $0x8] sm:$0xff] (!%p566_p9)   ;;  %v12650_v6 = vld [vmem:[%s15665_s21 + $0x10] sm:$0xff] (!%p566_p9)  }
  0x1f   : > { %11164 = vmatpush3.bf16.msra.mxu1 %v12646_v2  ;;  %11129 = vmatprep.subr.bf16.mxu0 %v13225_v1  ;;  %v12651_v7 = vld [vmem:[%s15665_s21 + $0x58] sm:$0xff]   ;;  %s624_s23 = scalar_select %p623_p10, %s13357_s2, 1  ;;  %v12653_v9 = vld [vmem:[%s15665_s21 + $0x60] sm:$0xff]   ;;  %v12655_v11 = vld [vmem:[%s15665_s21 + $0x68] sm:$0xff]  }
  0x20   : > { %11165 = vmatprep.subr.bf16.mxu1 %v13225_v1  ;;  %v12652_v8 = vld [vmem:[%s15665_s21 + $0x18] sm:$0xff]   ;;  %v12654_v10 = vld [vmem:[%s15665_s21 + $0x20] sm:$0xff]   ;;  %v12656_v12 = vld [vmem:[%s15665_s21 + $0x28] sm:$0xff]   ;;  %s13228_s2 = smov [#allocation2]  }
  0x21   : > { %s12600_s3 = smul.u32 88, %s624_s23  ;;  %v12657_v13 = vld [vmem:[%s15665_s21 + $0x70] sm:$0xff]   ;;  %v12659_v15 = vld [vmem:[%s15665_s21 + $0x78] sm:$0xff]   ;;  %v12661_v23 = vld [vmem:[%s15665_s21 + $0x80] sm:$0xff]  }
  0x22   : > { %11130 = vmatpush3.bf16.msra.mxu0 %v12647_v3  ;;  %v12658_v14 = vld [vmem:[%s15665_s21 + $0x30] sm:$0xff]   ;;  %v12660_v17 = vld [vmem:[%s15665_s21 + $0x38] sm:$0xff]   ;;  %v12662_v24 = vld [vmem:[%s15665_s21 + $0xc0] sm:$0xff]  }
  0x23   : > { %11166 = vmatpush3.bf16.msra.mxu1 %v12648_v4  ;;  %11131 = vmatprep.subr.bf16.mxu0 %v13225_v1  ;;  %s13441_s1 = scalar_lea.vmem %s15666_s0, %s12600_s3  ;;  %v12663_v29 = vld [vmem:[%s15665_s21 + $0x88] sm:$0xff]   ;;  %v12665_v33 = vld [vmem:[%s15665_s21 + $0x90] sm:$0xff]   ;;  %v12667_v39 = vld [vmem:[%s15665_s21 + $0x98] sm:$0xff]   ;;  %s15668_s0 = sld [smem:[#allocation15_spill]] }
  0x24   : > { %11167 = vmatprep.subr.bf16.mxu1 %v13225_v1  ;;  %v659_v16 = vld [vmem:[%s13441_s1 + $0x1] sm:$0xff]  ;;  %v13459_v18 = vld [vmem:[%s13441_s1 + $0x9] sm:$0xff]  ;;  %v13475_v25 = vld [vmem:[%s13441_s1 + $0x11] sm:$0xff]  ;;  %s15669_s3 = sld [smem:[#allocation13_spill]] }
  0x25   : > { %v629_v19 = vld [vmem:[%s13441_s1] sm:$0xff]  ;;  %v630_v20 = vld [vmem:[%s13441_s1 + $0x8] sm:$0xff]  ;;  %v668_v21 = vpack.c.bf16 %v13459_v18, %v659_v16  ;;  %v631_v27 = vld [vmem:[%s13441_s1 + $0x10] sm:$0xff]  ;;  %v939_v63 = vpack.c.bf16 %v13475_v25, %v13459_v18 }
  0x26   : > { %11132 = vmatpush3.bf16.msra.mxu0 %v12649_v5  ;;  %v638_v22 = vpack.c.bf16 %v630_v20, %v629_v19  ;;  %v13478_v26 = vld [vmem:[%s13441_s1 + $0x19] sm:$0xff]  ;;  %v12664_v30 = vld [vmem:[%s15665_s21 + $0xc8] sm:$0xff]   ;;  %v12666_v36 = vld [vmem:[%s15665_s21 + $0xd0] sm:$0xff]  }
  0x27   : > { %11168 = vmatpush3.bf16.msra.mxu1 %v12650_v6  ;;  %11133 = vmatprep.subr.bf16.mxu0 %v13225_v1  ;;  %v632_v28 = vld [vmem:[%s13441_s1 + $0x18] sm:$0xff]  ;;  %v669_v31 = vpack.c.bf16 %v13478_v26, %v13475_v25  ;;  %v13500_v34 = vld [vmem:[%s13441_s1 + $0x21] sm:$0xff]  ;;  %v13503_v35 = vld [vmem:[%s13441_s1 + $0x29] sm:$0xff] }
  0x28   : > { %11169 = vmatprep.subr.bf16.mxu1 %v13225_v1  ;;  %v639_v32 = vpack.c.bf16 %v632_v28, %v631_v27  ;;  %v633_v37 = vld [vmem:[%s13441_s1 + $0x20] sm:$0xff]  ;;  %v634_v38 = vld [vmem:[%s13441_s1 + $0x28] sm:$0xff]  ;;  %v12668_v40 = vld [vmem:[%s15665_s21 + $0xd8] sm:$0xff]   ;;  %v670_v41 = vpack.c.bf16 %v13503_v35, %v13500_v34  ;;  %v940_v4 = vpack.c.bf16 %v13500_v34, %v13478_v26 }
  0x29   : > { %v12669_v42 = vld [vmem:[%s15665_s21 + $0xa0] sm:$0xff]   ;;  %v640_v43 = vpack.c.bf16 %v634_v38, %v633_v37  ;;  %v13533_v45 = vld [vmem:[%s13441_s1 + $0x31] sm:$0xff]  ;;  %v12671_v49 = vld [vmem:[%s15665_s21 + $0xa8] sm:$0xff]  }
  0x2a   : > { %11134 = vmatpush3.bf16.msra.mxu0 %v12651_v7  ;;  %v12670_v44 = vld [vmem:[%s15665_s21 + $0xe0] sm:$0xff]   ;;  %v635_v47 = vld [vmem:[%s13441_s1 + $0x30] sm:$0xff]  ;;  %v636_v48 = vld [vmem:[%s13441_s1 + $0x38] sm:$0xff] }
  0x2b   : > { %11170 = vmatpush3.bf16.msra.mxu1 %v12652_v8  ;;  %11135 = vmatprep.subr.bf16.mxu0 %v13225_v1  ;;  %v13536_v46 = vld [vmem:[%s13441_s1 + $0x39] sm:$0xff]  ;;  %v12672_v50 = vld [vmem:[%s15665_s21 + $0xe8] sm:$0xff]   ;;  %v12673_v52 = vld [vmem:[%s15665_s21 + $0xb0] sm:$0xff]   ;;  %v641_v53 = vpack.c.bf16 %v636_v48, %v635_v47  ;;  %v941_v8 = vpack.c.bf16 %v13533_v45, %v13503_v35 }
  0x2c   : > { %11171 = vmatprep.subr.bf16.mxu1 %v13225_v1  ;;  %v671_v51 = vpack.c.bf16 %v13536_v46, %v13533_v45  ;;  %v12674_v54 = vld [vmem:[%s15665_s21 + $0xf0] sm:$0xff]   ;;  %v667_v55 = vld [vmem:[%s13441_s1 + $0x41] sm:$0x7f]  ;;  %v12675_v57 = vld [vmem:[%s15665_s21 + $0xb8] sm:$0xff]  }
  0x2d   : > { %v637_v56 = vld [vmem:[%s13441_s1 + $0x40] sm:$0x7f]  ;;  %v12676_v58 = vld [vmem:[%s15665_s21 + $0xf8] sm:$0xff]   ;;  %v672_v59 = vpack.c.bf16 %v667_v55, %v667_v55  ;;  %v1090_v61 = vld [vmem:[%s13441_s1 + $0xa] sm:$0xff]  ;;  %s15579_s21 = scalar_lea.sflag [#allocation3], %s620_s24 }
  0x2e   : > { %11136 = vmatpush3.bf16.msra.mxu0 %v12653_v9  ;;  %v642_v60 = vpack.c.bf16 %v637_v56, %v637_v56  ;;  %v1091_v62 = vld [vmem:[%s13441_s1 + $0x12] sm:$0xff]  ;;  %v1092_v2 = vld [vmem:[%s13441_s1 + $0x1a] sm:$0xff]  ;;  %v1093_v3 = vld [vmem:[%s13441_s1 + $0x22] sm:$0xff] }
  0x2f   : > { %11172 = vmatpush3.bf16.msra.mxu1 %v12654_v10  ;;  %11137 = vmatprep.subr.bf16.mxu0 %v13225_v1  ;;  %v1099_v0 = vpack.c.bf16 %v1091_v62, %v1090_v61  ;;  %v1100_v5 = vpack.c.bf16 %v1093_v3, %v1092_v2  ;;  %v1094_v6 = vld [vmem:[%s13441_s1 + $0x2a] sm:$0xff]  ;;  %v1095_v7 = vld [vmem:[%s13441_s1 + $0x32] sm:$0xff]  ;;  %v937_v10 = vld [vmem:[%s13441_s1 + $0x41] sm:$0xff] }
  0x30   : > { %11173 = vmatprep.subr.bf16.mxu1 %v13225_v1  ;;  %v1101_v9 = vpack.c.bf16 %v1095_v7, %v1094_v6  ;;  %v1098_v16 = vld [vmem:[%s13441_s1 + $0x4a] sm:$0x7f]  ;;  %v1311_v19 = vld [vmem:[%s15667_s27] sm:$0xff] }
  0x31   : > { %v1103_v18 = vpack.c.bf16 %v1098_v16, %v1098_v16  ;;  %v12679_v20 = vld [vmem:[%s15668_s0 + $0x40] sm:$0xff]   ;;  %v12689_v25 = vld [vmem:[%s15668_s0 + $0x68] sm:$0xff]  }
  0x32   : > { %11138 = vmatpush3.bf16.msra.mxu0 %v12655_v11  ;;  %v1096_v11 = vld [vmem:[%s13441_s1 + $0x3a] sm:$0xff] }
  0x33   : > { %11174 = vmatpush3.bf16.msra.mxu1 %v12656_v12  ;;  %11139 = vmatprep.subr.bf16.mxu0 %v13225_v1  ;;  %v1097_v12 = vld [vmem:[%s13441_s1 + $0x42] sm:$0xff] }
  0x34   : > { %11175 = vmatprep.subr.bf16.mxu1 %v13225_v1 }
  0x36   : > { %11140 = vmatpush3.bf16.msra.mxu0 %v12657_v13  ;;  %v942_v13 = vpack.c.bf16 %v937_v10, %v13536_v46 }
  0x37   : > { %11176 = vmatpush3.bf16.msra.mxu1 %v12658_v14  ;;  %11141 = vmatprep.subr.bf16.mxu0 %v13225_v1  ;;  %v1102_v14 = vpack.c.bf16 %v1097_v12, %v1096_v11 }
  0x38   : > { %11177 = vmatprep.subr.bf16.mxu1 %v13225_v1 }
  0x3a   : > { %11142 = vmatpush3.bf16.msra.mxu0 %v12659_v15  ;;  %v938_v15 = vld [vmem:[%s13441_s1 + $0x49] sm:$0x7f] }
  0x3b   : > { %11178 = vmatpush3.bf16.msra.mxu1 %v12660_v17  ;;  %11199 = vmatprep.subr.bf16.mxu0 %v13225_v1  ;;  %v943_v17 = vpack.c.bf16 %v938_v15, %v938_v15 }
  0x3c   : > { %11235 = vmatprep.subr.bf16.mxu1 %v13225_v1 }
  0x3d   : > { %11144 = vmatmul.mubr.bf16.vlgmr.msra.gmra.mrb[0].mxu0 %v668_v21  ;;  %v12681_v21 = vld [vmem:[%s15668_s0 + $0x48] sm:$0xff]  }
  0x3e   : > { %11180 = vmatmul.mubr.bf16.vlgmr.msra.gmra.mrb[0].mxu1 %v638_v22  ;;  %11147 = vmatprep.mubr.msk.bf16.mxu0 %vm13226_vm0, %v13225_v1  ;;  %v12683_v22 = vld [vmem:[%s15668_s0 + $0x50] sm:$0xff]  }
  0x3f   : > { %11183 = vmatprep.mubr.msk.bf16.mxu1 %vm13226_vm0, %v13225_v1  ;;  %11200 = vmatpush3.bf16.msra.mxu0 %v12661_v23  ;;  %v12685_v23 = vld [vmem:[%s15668_s0 + $0x58] sm:$0xff]  }
  0x40   : > { %11236 = vmatpush3.bf16.msra.mxu1 %v12662_v24  ;;  %11201 = vmatprep.subr.bf16.mxu0 %v13225_v1  ;;  %v12687_v24 = vld [vmem:[%s15668_s0 + $0x60] sm:$0xff]  }
  0x41   : > { %11237 = vmatprep.subr.bf16.mxu1 %v13225_v1 }
  0x43   : > { %11202 = vmatpush3.bf16.msra.mxu0 %v12663_v29 }
  0x44   : > { %11238 = vmatpush3.bf16.msra.mxu1 %v12664_v30  ;;  %11203 = vmatprep.subr.bf16.mxu0 %v13225_v1 }
  0x45   : > { %11148 = vmatmul.mubr.bf16.gmra.mrb[4].mxu0 %v669_v31  ;;  %11239 = vmatprep.subr.bf16.mxu1 %v13225_v1 }
  0x46   : > { %11184 = vmatmul.mubr.bf16.gmra.mrb[4].mxu1 %v639_v32  ;;  %11151 = vmatprep.mubr.msk.bf16.mxu0 %vm13226_vm0, %v13225_v1 }
  0x47   : > { %11187 = vmatprep.mubr.msk.bf16.mxu1 %vm13226_vm0, %v13225_v1  ;;  %11204 = vmatpush3.bf16.msra.mxu0 %v12665_v33 }
  0x48   : > { %11240 = vmatpush3.bf16.msra.mxu1 %v12666_v36  ;;  %11205 = vmatprep.subr.bf16.mxu0 %v13225_v1 }
  0x49   : > { %11241 = vmatprep.subr.bf16.mxu1 %v13225_v1 }
  0x4b   : > { %11206 = vmatpush3.bf16.msra.mxu0 %v12667_v39 }
  0x4c   : > { %11242 = vmatpush3.bf16.msra.mxu1 %v12668_v40  ;;  %11207 = vmatprep.subr.bf16.mxu0 %v13225_v1 }
  0x4d   : > { %11152 = vmatmul.mubr.bf16.gmra.mrb[8].mxu0 %v670_v41  ;;  %11243 = vmatprep.subr.bf16.mxu1 %v13225_v1 }
  0x4e   : > { %11188 = vmatmul.mubr.bf16.gmra.mrb[8].mxu1 %v640_v43  ;;  %11155 = vmatprep.mubr.msk.bf16.mxu0 %vm13226_vm0, %v13225_v1 }
  0x4f   : > { %11191 = vmatprep.mubr.msk.bf16.mxu1 %vm13226_vm0, %v13225_v1  ;;  %11208 = vmatpush3.bf16.msra.mxu0 %v12669_v42 }
  0x50   : > { %11244 = vmatpush3.bf16.msra.mxu1 %v12670_v44  ;;  %11209 = vmatprep.subr.bf16.mxu0 %v13225_v1 }
  0x51   : > { %11245 = vmatprep.subr.bf16.mxu1 %v13225_v1 }
  0x53   : > { %11210 = vmatpush3.bf16.msra.mxu0 %v12671_v49 }
  0x54   : > { %11246 = vmatpush3.bf16.msra.mxu1 %v12672_v50  ;;  %11211 = vmatprep.subr.bf16.mxu0 %v13225_v1 }
  0x55   : > { %11156 = vmatmul.mubr.bf16.gmra.mrb[12].mxu0 %v671_v51  ;;  %11247 = vmatprep.subr.bf16.mxu1 %v13225_v1 }
  0x56   : > { %11192 = vmatmul.mubr.bf16.gmra.mrb[12].mxu1 %v641_v53  ;;  %11159 = vmatprep.mubr.msk.bf16.mxu0 %vm13226_vm0, %v13225_v1 }
  0x57   : > { %11195 = vmatprep.mubr.msk.bf16.mxu1 %vm13226_vm0, %v13225_v1  ;;  %11212 = vmatpush3.bf16.msra.mxu0 %v12673_v52 }
  0x58   : > { %11248 = vmatpush3.bf16.msra.mxu1 %v12674_v54  ;;  %11213 = vmatprep.subr.bf16.mxu0 %v13225_v1 }
  0x59   : > { %11249 = vmatprep.subr.bf16.mxu1 %v13225_v1 }
  0x5b   : > { %11214 = vmatpush3.bf16.msra.mxu0 %v12675_v57 }
  0x5c   : > { %11250 = vmatpush3.bf16.msra.mxu1 %v12676_v58 }
  0x5d   : > { %11160 = vmatmul.mubr.bf16.gmra.mrb[16].mxu0 %v672_v59  ;;  %11295 = vmatprep.subr.bf16.mxu1 %v12679_v20 }
  0x5e   : > { %11196 = vmatmul.mubr.bf16.gmra.mrb[16].mxu1 %v642_v60  ;;  %11215 = vmatprep.mubr.msk.bf16.mxu0 %vm13226_vm0, %v13225_v1 }
  0x5f   : > { %11251 = vmatprep.mubr.msk.bf16.mxu1 %vm13226_vm0, %v13225_v1 }
  0x65   : > { %11216 = vmatmul.mubr.bf16.vlgmr.msra.gmra.mrb[20].mxu0 %v939_v63 }
  0x66   : > { %11252 = vmatmul.mubr.bf16.vlgmr.msra.gmra.mrb[20].mxu1 %v1099_v0  ;;  %11219 = vmatprep.mubr.msk.bf16.mxu0 %vm13226_vm0, %v13225_v1 }
  0x67   : > { %11255 = vmatprep.mubr.msk.bf16.mxu1 %vm13226_vm0, %v13225_v1  ;;  %11296 = vmatpush3.bf16.msra.mxu1 %v12679_v20 }
  0x68   : > { %11297 = vmatprep.subr.bf16.mxu1 %v12681_v21 }
  0x6b   : > { %11298 = vmatpush3.bf16.msra.mxu1 %v12681_v21 }
  0x6c   : > { %11299 = vmatprep.subr.bf16.mxu1 %v12683_v22 }
  0x6d   : > { %11220 = vmatmul.mubr.bf16.gmra.mrb[24].mxu0 %v940_v4 }
  0x6e   : > { %11256 = vmatmul.mubr.bf16.gmra.mrb[24].mxu1 %v1100_v5  ;;  %11223 = vmatprep.mubr.msk.bf16.mxu0 %vm13226_vm0, %v13225_v1 }
  0x6f   : > { %11259 = vmatprep.mubr.msk.bf16.mxu1 %vm13226_vm0, %v13225_v1  ;;  %11300 = vmatpush3.bf16.msra.mxu1 %v12683_v22 }
  0x70   : > { %11301 = vmatprep.subr.bf16.mxu1 %v12685_v23 }
  0x73   : > { %11302 = vmatpush3.bf16.msra.mxu1 %v12685_v23 }
  0x74   : > { %11303 = vmatprep.subr.bf16.mxu1 %v12687_v24 }
  0x75   : > { %11224 = vmatmul.mubr.bf16.gmra.mrb[28].mxu0 %v941_v8 }
  0x76   : > { %11260 = vmatmul.mubr.bf16.gmra.mrb[28].mxu1 %v1101_v9  ;;  %11227 = vmatprep.mubr.msk.bf16.mxu0 %vm13226_vm0, %v13225_v1 }
  0x77   : > { %11263 = vmatprep.mubr.msk.bf16.mxu1 %vm13226_vm0, %v13225_v1  ;;  %11304 = vmatpush3.bf16.msra.mxu1 %v12687_v24 }
  0x78   : > { %11305 = vmatprep.subr.bf16.mxu1 %v12689_v25 }
  0x7b   : > { %11306 = vmatpush3.bf16.msra.mxu1 %v12689_v25 }
  0x7d   : > { %11228 = vmatmul.mubr.bf16.gmra.mrb[32].mxu0 %v942_v13  ;;  %v13651_v13 = vld [vmem:[%s15669_s3] ss:$0 sm:$0xff]  ;;  %s9127_s3 = sshll.u32 %s620_s24, 4 }
  0x7e   : > { %11264 = vmatmul.mubr.bf16.gmra.mrb[32].mxu1 %v1102_v14  ;;  %11231 = vmatprep.mubr.msk.bf16.mxu0 %vm13226_vm0, %v13225_v1  ;;  %s622_s30 = scalar_lea.vmem [#allocation2], %s9127_s3  ;;  %s13165_s3 = sshll.u32 %s13228_s2, 4  ;;  %s13166_s3 = int_to_ptr.vmem [resolvable:$false] %s13165_s3 }
  0x7f   : > { %11267 = vmatprep.mubr.msk.bf16.mxu1 %vm13226_vm0, %v13225_v1  ;;  %s9061_s1 = sshll.u32 %s622_s30, 4  ;;  %s13167_s23 = scalar_lea.vmem %s13166_s3, 512  ;;  %s15577_s1 = int_to_ptr.vmem [resolvable:$true] %s9061_s1 }
  0x80   : > { %s13161_s26 = scalar_lea.vmem %s15577_s1, 256  ;;  %p13168_p0 = scmp.lt.s32.totalorder %s15577_s1, %s13166_s3 }
  0x81   : > { %p13162_p11 = scmp.ne.s32.totalorder %s15577_s1, %s13161_s26  ;;  %p13169_p1 = scmp.lt.s32.totalorder %s13167_s23, %s13161_s26 }
  0x83   : > { %p13163_p12 = pnand %p13162_p11, %p13374_p5  ;;  %p13170_p2 = por %p13169_p1, %p13168_p0 }
  0x85   : > { %11232 = vmatmul.mubr.bf16.gmra.mrb[36].mxu0 %v943_v17  ;;  %p13164_p13 = pneg %p13163_p12 }
  0x86   : > { %11268 = vmatmul.mubr.bf16.gmra.mrb[36].mxu1 %v1103_v18  ;;  %11289 = vmatprep.mubr.msk.f32.mxu0 %vm1315_vm1, %v1311_v19 }
  0x87   : > { %p13171_p3 = pnand %p13170_p2, %p13164_p13 }
 0x110   : > { %v772_v26 = vpop.f32.mrb[0].mxu0 }
 0x111   : > { %v892_v27 = vpop.f32.mrb[0].mxu1  ;;  %v11145_v28 = vpop.f32.mrb[1].mxu0 }
 0x112   : > { %v893_v29 = vadd.f32 %v892_v27, %v772_v26  ;;  %v11181_v30 = vpop.f32.mrb[1].mxu1  ;;  %v775_v31 = vpop.f32.mrb[2].mxu0 }
 0x113   : > { %v895_v32 = vpop.f32.mrb[2].mxu1  ;;  %v11146_v33 = vpop.f32.mrb[3].mxu0 }
 0x114   : > { %v896_v34 = vadd.f32 %v895_v32, %v775_v31  ;;  %v11182_v35 = vpop.f32.mrb[3].mxu1 }
 0x118   : > { %v780_v36 = vpop.f32.mrb[4].mxu0 }
 0x119   : > { %v900_v37 = vpop.f32.mrb[4].mxu1  ;;  %v11149_v38 = vpop.f32.mrb[5].mxu0 }
 0x11a   : > { %v901_v39 = vadd.f32 %v900_v37, %v780_v36  ;;  %v11185_v40 = vpop.f32.mrb[5].mxu1  ;;  %v783_v41 = vpop.f32.mrb[6].mxu0 }
 0x11b   : > { %v903_v42 = vpop.f32.mrb[6].mxu1  ;;  %v11150_v43 = vpop.f32.mrb[7].mxu0 }
 0x11c   : > { %v904_v44 = vadd.f32 %v903_v42, %v783_v41  ;;  %v11186_v45 = vpop.f32.mrb[7].mxu1 }
 0x120   : > { %v788_v46 = vpop.f32.mrb[8].mxu0 }
 0x121   : > { %v908_v47 = vpop.f32.mrb[8].mxu1  ;;  %v11153_v48 = vpop.f32.mrb[9].mxu0 }
 0x122   : > { %v13638_v49 = vadd.f32 %v908_v47, %v788_v46  ;;  %v11189_v50 = vpop.f32.mrb[9].mxu1  ;;  %v791_v51 = vpop.f32.mrb[10].mxu0 }
 0x123   : > { %v911_v52 = vpop.f32.mrb[10].mxu1  ;;  %v11154_v53 = vpop.f32.mrb[11].mxu0 }
 0x124   : > { %v13640_v54 = vadd.f32 %v911_v52, %v791_v51  ;;  %v11190_v55 = vpop.f32.mrb[11].mxu1 }
 0x128   : > { %v796_v56 = vpop.f32.mrb[12].mxu0 }
 0x129   : > { %v916_v57 = vpop.f32.mrb[12].mxu1  ;;  %v11157_v58 = vpop.f32.mrb[13].mxu0 }
 0x12a   : > { %v13642_v59 = vadd.f32 %v916_v57, %v796_v56  ;;  %v11193_v60 = vpop.f32.mrb[13].mxu1  ;;  %v799_v61 = vpop.f32.mrb[14].mxu0 }
 0x12b   : > { %v919_v62 = vpop.f32.mrb[14].mxu1  ;;  %v11158_v63 = vpop.f32.mrb[15].mxu0 }
 0x12c   : > { %v13644_v0 = vadd.f32 %v919_v62, %v799_v61  ;;  %v11194_v2 = vpop.f32.mrb[15].mxu1 }
 0x130   : > { %v804_v3 = vpop.f32.mrb[16].mxu0 }
 0x131   : > { %v924_v4 = vpop.f32.mrb[16].mxu1  ;;  %v11161_v5 = vpop.f32.mrb[17].mxu0 }
 0x132   : > { %v13646_v6 = vadd.f32 %v924_v4, %v804_v3  ;;  %v11197_v7 = vpop.f32.mrb[17].mxu1  ;;  %v807_v8 = vpop.f32.mrb[18].mxu0 }
 0x133   : > { %v927_v9 = vpop.f32.mrb[18].mxu1  ;;  %v11162_v10 = vpop.f32.mrb[19].mxu0 }
 0x134   : > { %v11198_v11 = vpop.f32.mrb[19].mxu1 }
 0x138   : > { %v1043_v12 = vpop.f32.mrb[20].mxu0 }
 0x139   : > { %v1081_v14 = vadd.f32 %v1043_v12, %v893_v29  ;;  %v1203_v15 = vpop.f32.mrb[20].mxu1  ;;  %v11217_v16 = vpop.f32.mrb[21].mxu0 }
 0x13a   : > { %v11253_v17 = vpop.f32.mrb[21].mxu1  ;;  %v1046_v18 = vpop.f32.mrb[22].mxu0 }
 0x13b   : > { %v1241_v19 = vadd.f32 %v1203_v15, %v1081_v14  ;;  %v1082_v20 = vadd.f32 %v1046_v18, %v896_v34  ;;  %v1206_v21 = vpop.f32.mrb[22].mxu1  ;;  %v11218_v22 = vpop.f32.mrb[23].mxu0 }
 0x13c   : > { %v11254_v23 = vpop.f32.mrb[23].mxu1 }
 0x13d   : > { %v1257_v24 = vadd.f32 %v13651_v13, %v1241_v19  ;;  %v1242_v25 = vadd.f32 %v1206_v21, %v1082_v20 }
 0x13f   : > { %v1275_v26 = vmul.f32 0.70710677, %v1257_v24  ;;  %v1258_v27 = vadd.f32 %v13651_v13, %v1242_v25  ;;  %v1266_v47 = vmul.f32 0.5, %v1257_v24 }
 0x140   : > { %v1051_v28 = vpop.f32.mrb[24].mxu0 }
 0x141   : > { %13101 = verf.f32 %v1275_v26  ;;  %v1276_v30 = vmul.f32 0.70710677, %v1258_v27  ;;  %v1083_v31 = vadd.f32 %v1051_v28, %v901_v39  ;;  %v1211_v29 = vpop.f32.mrb[24].mxu1  ;;  %v11221_v32 = vpop.f32.mrb[25].mxu0  ;;  %v1267_v3 = vmul.f32 0.5, %v1258_v27 }
 0x142   : > { %v11257_v33 = vpop.f32.mrb[25].mxu1  ;;  %v1054_v35 = vpop.f32.mrb[26].mxu0 }
 0x143   : > { %13103 = verf.f32 %v1276_v30  ;;  %v1243_v36 = vadd.f32 %v1211_v29, %v1083_v31  ;;  %v1084_v34 = vadd.f32 %v1054_v35, %v904_v44  ;;  %v1214_v37 = vpop.f32.mrb[26].mxu1  ;;  %v11222_v38 = vpop.f32.mrb[27].mxu0 }
 0x144   : > { %v11258_v40 = vpop.f32.mrb[27].mxu1 }
 0x145   : > { %v1259_v41 = vadd.f32 %v13651_v13, %v1243_v36  ;;  %v1244_v42 = vadd.f32 %v1214_v37, %v1084_v34 }
 0x147   : > { %v1277_v43 = vmul.f32 0.70710677, %v1259_v41  ;;  %v1260_v45 = vadd.f32 %v13651_v13, %v1244_v42  ;;  %v1268_v10 = vmul.f32 0.5, %v1259_v41 }
 0x148   : > { %v1059_v46 = vpop.f32.mrb[28].mxu0 }
 0x149   : > { %13105 = verf.f32 %v1277_v43  ;;  %v1278_v39 = vmul.f32 0.70710677, %v1260_v45  ;;  %v1085_v48 = vadd.f32 %v1059_v46, %v13638_v49  ;;  %v1219_v50 = vpop.f32.mrb[28].mxu1  ;;  %v11225_v51 = vpop.f32.mrb[29].mxu0  ;;  %v1269_v27 = vmul.f32 0.5, %v1260_v45 }
 0x14a   : > { %v11261_v52 = vpop.f32.mrb[29].mxu1  ;;  %v1062_v53 = vpop.f32.mrb[30].mxu0 }
 0x14b   : > { %v13102_v44 = vpop.eup %13101  ;;  %13107 = verf.f32 %v1278_v39  ;;  %v1245_v55 = vadd.f32 %v1219_v50, %v1085_v48  ;;  %v1086_v56 = vadd.f32 %v1062_v53, %v13640_v54  ;;  %v1222_v57 = vpop.f32.mrb[30].mxu1 }
 0x14c   : > { %v11226_v58 = vpop.f32.mrb[31].mxu0  ;;  %v1293_v60 = vadd.f32 1.0, %v13102_v44  ;;  %v11262_v61 = vpop.f32.mrb[31].mxu1 }
 0x14d   : > { %v13104_v62 = vpop.eup %13103  ;;  %v1261_v63 = vadd.f32 %v13651_v13, %v1245_v55  ;;  %v1246_v2 = vadd.f32 %v1222_v57, %v1086_v56 }
 0x14e   : > { %v1294_v4 = vadd.f32 1.0, %v13104_v62  ;;  %v1302_v7 = vmul.f32 %v1293_v60, %v1266_v47 }
 0x14f   : > { %v1279_v49 = vmul.f32 0.70710677, %v1261_v63  ;;  %v1262_v5 = vadd.f32 %v13651_v13, %v1246_v2  ;;  %v1270_v33 = vmul.f32 0.5, %v1261_v63 }
 0x150   : > { %v1303_v8 = vmul.f32 %v1294_v4, %v1267_v3  ;;  %v1067_v9 = vpop.f32.mrb[32].mxu0 }
 0x151   : > { %13109 = verf.f32 %v1279_v49  ;;  %v1280_v11 = vmul.f32 0.70710677, %v1262_v5  ;;  %v1087_v54 = vadd.f32 %v1067_v9, %v13642_v59  ;;  %v1227_v12 = vpop.f32.mrb[32].mxu1  ;;  %v11229_v14 = vpop.f32.mrb[33].mxu0  ;;  %v1313_v9 = vld [vmem:[%s15667_s27 + $0x10] sm:$0xff] }
 0x152   : > { %v13662_v15 = vpack.c.bf16 %v1303_v8, %v1302_v7  ;;  %v11265_v16 = vpop.f32.mrb[33].mxu1  ;;  %v1070_v17 = vpop.f32.mrb[34].mxu0  ;;  %v1312_v7 = vld [vmem:[%s15667_s27 + $0x8] sm:$0xff]  ;;  %v12684_v14 = vld [vmem:[%s15668_s0 + $0x20] sm:$0xff]  }
 0x153   : > { %v13106_v18 = vpop.eup %13105  ;;  %13111 = verf.f32 %v1280_v11  ;;  %v1247_v19 = vadd.f32 %v1227_v12, %v1087_v54  ;;  %v1088_v20 = vadd.f32 %v1070_v17, %v13644_v0  ;;  %v1230_v21 = vpop.f32.mrb[34].mxu1  ;;  %v1314_v11 = vld [vmem:[%s15667_s27 + $0x18] sm:$0x1]  ;;  %v12680_v54 = vld [vmem:[%s15668_s0 + $0x10] sm:$0xff]   ;;  %v12686_v16 = vld [vmem:[%s15668_s0 + $0x28] sm:$0xff]  }
 0x154   : > { %v11230_v22 = vpop.f32.mrb[35].mxu0  ;;  %v1295_v23 = vadd.f32 1.0, %v13106_v18  ;;  %v11266_v24 = vpop.f32.mrb[35].mxu1  ;;  %12521 = vmatprep.subr.bf16.mxu0 %v13662_v15  ;;  %v12682_v12 = vld [vmem:[%s15668_s0 + $0x18] sm:$0xff]   ;;  %v12688_v17 = vld [vmem:[%s15668_s0 + $0x30] sm:$0xff]  }
 0x155   : > { %v13108_v25 = vpop.eup %13107  ;;  %v1263_v59 = vadd.f32 %v13651_v13, %v1247_v19  ;;  %v1248_v26 = vadd.f32 %v1230_v21, %v1088_v20  ;;  %12523 = vmatpush3.bf16.msra.mxu0 %v13662_v15  ;;  %v12690_v18 = vld [vmem:[%s15668_s0 + $0x38] sm:$0xff]   ;;  %v12691_v19 = vld [vmem:[%s15668_s0 + $0x70] sm:$0xff]   ;;  %v12692_v20 = vld [vmem:[%s15668_s0 + $0xc0] sm:$0xff]  }
 0x156   : > { %v1296_v28 = vadd.f32 1.0, %v13108_v25  ;;  %v1304_v29 = vmul.f32 %v1295_v23, %v1268_v10  ;;  %v12678_v10 = vld [vmem:[%s15668_s0 + $0x8] sm:$0xff]   ;;  %11307 = vmatprep.subr.bf16.mxu1 %v12691_v19  ;;  %v12693_v21 = vld [vmem:[%s15668_s0 + $0x78] sm:$0xff]   ;;  %v12695_v22 = vld [vmem:[%s15668_s0 + $0x80] sm:$0xff]  }
 0x157   : > { %v1281_v30 = vmul.f32 0.70710677, %v1263_v59  ;;  %v1264_v31 = vadd.f32 %v13651_v13, %v1248_v26  ;;  %v1272_v57 = vmul.f32 0.5, %v1263_v59  ;;  %11308 = vmatpush3.bf16.msra.mxu1 %v12691_v19  ;;  %v12719_v19 = vld [vmem:[%s15668_s0 + $0x160] sm:$0xff]  }
 0x158   : > { %v1305_v32 = vmul.f32 %v1296_v28, %v1269_v27  ;;  %v1075_v0 = vpop.f32.mrb[36].mxu0  ;;  %11309 = vmatprep.subr.bf16.mxu1 %v12693_v21 }
 0x159   : > { %13113 = verf.f32 %v1281_v30  ;;  %v1282_v35 = vmul.f32 0.70710677, %v1264_v31  ;;  %v1089_v36 = vadd.f32 %v1075_v0, %v13646_v6  ;;  %v11233_v34 = vpop.f32.mrb[37].mxu0  ;;  %v1235_v37 = vpop.f32.mrb[36].mxu1  ;;  %v1271_v6 = vmul.f32 0.5, %v1262_v5  ;;  %v12677_v5 = vld [vmem:[%s15668_s0] sm:$0xff]  }
 0x15a   : > { %v13670_v38 = vpack.c.bf16 %v1305_v32, %v1304_v29  ;;  %v1078_v40 = vpop.f32.mrb[38].mxu0  ;;  %v11269_v41 = vpop.f32.mrb[37].mxu1  ;;  %v12694_v29 = vld [vmem:[%s15668_s0 + $0xc8] sm:$0xff]  }
 0x15b   : > { %v13110_v42 = vpop.eup %13109  ;;  %13115 = verf.f32 %v1282_v35  ;;  %v1249_v43 = vadd.f32 %v1235_v37, %v1089_v36  ;;  %v11234_v45 = vpop.f32.mrb[39].mxu0  ;;  %11310 = vmatpush3.bf16.msra.mxu1 %v12693_v21  ;;  %v12721_v21 = vld [vmem:[%s15668_s0 + $0x168] sm:$0xff]  }
 0x15c   : > { %v1238_v46 = vpop.f32.mrb[38].mxu1  ;;  %v1297_v47 = vadd.f32 1.0, %v13110_v42  ;;  %12525 = vmatprep.subr.bf16.mxu0 %v13670_v38  ;;  %11335 = vmatprep.subr.bf16.mxu1 %v12695_v22 }
 0x15d   : > { %v11270_v39 = vpop.f32.mrb[39].mxu1  ;;  %v13112_v48 = vpop.eup %13111  ;;  %v1265_v50 = vadd.f32 %v13651_v13, %v1249_v43  ;;  %12527 = vmatpush3.bf16.msra.mxu0 %v13670_v38  ;;  %v1273_v13 = vmul.f32 0.5, %v1264_v31  ;;  %v12696_v43 = vld [vmem:[%s15668_s0 + $0xd0] sm:$0xff]  }
 0x15e   : > { %v1298_v51 = vadd.f32 1.0, %v13112_v48  ;;  %v1306_v53 = vmul.f32 %v1297_v47, %v1270_v33  ;;  %v12697_v48 = vld [vmem:[%s15668_s0 + $0x88] sm:$0xff]  }
 0x15f   : > { %v1283_v52 = vmul.f32 0.70710677, %v1265_v50  ;;  %v1274_v4 = vmul.f32 0.5, %v1265_v50 }
 0x160   : > { %v1307_v44 = vmul.f32 %v1298_v51, %v1271_v6 }
 0x161   : > { %13117 = verf.f32 %v1283_v52  ;;  %v12698_v52 = vld [vmem:[%s15668_s0 + $0xd8] sm:$0xff]  }
 0x162   : > { %v13675_v55 = vpack.c.bf16 %v1307_v44, %v1306_v53  ;;  %v12699_v53 = vld [vmem:[%s15668_s0 + $0x90] sm:$0xff]   ;;  %v12700_v44 = vld [vmem:[%s15668_s0 + $0xe0] sm:$0xff]  }
 0x163   : > { %v13114_v56 = vpop.eup %13113 }
 0x164   : > { %v1299_v58 = vadd.f32 1.0, %v13114_v56  ;;  %12529 = vmatprep.subr.bf16.mxu0 %v13675_v55  ;;  %v12701_v56 = vld [vmem:[%s15668_s0 + $0x98] sm:$0xff]  }
 0x165   : > { %v13116_v60 = vpop.eup %13115  ;;  %12531 = vmatpush3.bf16.msra.mxu0 %v13675_v55 }
 0x166   : > { %v1300_v61 = vadd.f32 1.0, %v13116_v60  ;;  %v1308_v62 = vmul.f32 %v1299_v58, %v1272_v57  ;;  %v12702_v57 = vld [vmem:[%s15668_s0 + $0xe8] sm:$0xff]   ;;  %v12703_v58 = vld [vmem:[%s15668_s0 + $0xa0] sm:$0xff]   ;;  %v12704_v60 = vld [vmem:[%s15668_s0 + $0xf0] sm:$0xff]  }
 0x168   : > { %v1309_v63 = vmul.f32 %v1300_v61, %v1273_v13  ;;  %v12705_v13 = vld [vmem:[%s15668_s0 + $0xa8] sm:$0xff]   ;;  %v12706_v61 = vld [vmem:[%s15668_s0 + $0xf8] sm:$0xff]  }
 0x16a   : > { %v13679_v2 = vpack.c.bf16 %v1309_v63, %v1308_v62  ;;  %v12707_v62 = vld [vmem:[%s15668_s0 + $0xb0] sm:$0xff]   ;;  %v12708_v63 = vld [vmem:[%s15668_s0 + $0xb8] sm:$0xff]  }
 0x16b   : > { %v13118_v3 = vpop.eup %13117 }
 0x16c   : > { %v1301_v49 = vadd.f32 1.0, %v13118_v3  ;;  %12533 = vmatprep.subr.bf16.mxu0 %v13679_v2  ;;  %v9295_v3 = vld [vmem:[%s15667_s27 + $0x20] sm:$0xff] }
 0x16d   : > { %12535 = vmatpush3.bf16.msra.mxu0 %v13679_v2 }
 0x16e   : > { %v13689_v8 = vmul.f32 %v1301_v49, %v1274_v4  ;;  %v9296_v4 = vld [vmem:[%s15667_s27 + $0x28] sm:$0xff]  ;;  %v9297_v49 = vld [vmem:[%s15667_s27 + $0x30] sm:$0xff] }
 0x170   : > { %11287 = vmatprep.subr.msk.mxu0 %vm1328_vm2, %v13689_v8 }
 0x171   : > { %11288 = vmatpush3.msk.msra.mxu0 %vm1328_vm2, %v13689_v8 }
 0x172   : > { %11290 = vmatmul.mubr.msk.f32.vlgmr.msra.gmra.mrb[40].mxu0 %vm1315_vm1, %v1312_v7  ;;  %11315 = vmatprep.subr.bf16.mxu0 %v12677_v5  ;;  %v12709_v7 = vld [vmem:[%s15668_s0 + $0x100] sm:$0xff]  }
 0x173   : > { %11292 = vmatprep.mubr.msk.f32.mxu0 %vm1315_vm1, %v1313_v9  ;;  %11316 = vmatpush3.bf16.msra.mxu0 %v12677_v5  ;;  %v9298_v5 = vld [vmem:[%s15667_s27 + $0x38] sm:$0x1]  ;;  %v12710_v9 = vld [vmem:[%s15668_s0 + $0x108] sm:$0xff]  }
 0x174   : > { %11317 = vmatprep.subr.bf16.mxu0 %v12678_v10 }
 0x176   : > { %11293 = vmatmul.mubr.msk.f32.gmra.mrb[42].mxu0 %vm1315_vm1, %v1314_v11  ;;  %v12712_v11 = vld [vmem:[%s15668_s0 + $0x110] sm:$0xff]  }
 0x177   : > { %11318 = vmatpush3.bf16.msra.mxu0 %v12678_v10  ;;  %v12711_v10 = vld [vmem:[%s15668_s0 + $0x140] sm:$0xff]  }
 0x178   : > { %11319 = vmatprep.subr.bf16.mxu0 %v12680_v54 }
 0x17b   : > { %11320 = vmatpush3.bf16.msra.mxu0 %v12680_v54  ;;  %v12713_v54 = vld [vmem:[%s15668_s0 + $0x148] sm:$0xff]  }
 0x17c   : > { %11321 = vmatprep.subr.bf16.mxu0 %v12682_v12 }
 0x17f   : > { %11322 = vmatpush3.bf16.msra.mxu0 %v12682_v12  ;;  %v12714_v12 = vld [vmem:[%s15668_s0 + $0x118] sm:$0xff]  }
 0x180   : > { %11323 = vmatprep.subr.bf16.mxu0 %v12684_v14 }
 0x183   : > { %11324 = vmatpush3.bf16.msra.mxu0 %v12684_v14  ;;  %v12715_v14 = vld [vmem:[%s15668_s0 + $0x150] sm:$0xff]  }
 0x184   : > { %11325 = vmatprep.subr.bf16.mxu0 %v12686_v16 }
 0x187   : > { %11326 = vmatpush3.bf16.msra.mxu0 %v12686_v16  ;;  %v12716_v16 = vld [vmem:[%s15668_s0 + $0x120] sm:$0xff]  }
 0x188   : > { %11327 = vmatprep.subr.bf16.mxu0 %v12688_v17 }
 0x18b   : > { %11328 = vmatpush3.bf16.msra.mxu0 %v12688_v17  ;;  %v12717_v17 = vld [vmem:[%s15668_s0 + $0x158] sm:$0xff]  }
 0x18c   : > { %11329 = vmatprep.subr.bf16.mxu0 %v12690_v18 }
 0x18f   : > { %11330 = vmatpush3.bf16.msra.mxu0 %v12690_v18  ;;  %v12718_v18 = vld [vmem:[%s15668_s0 + $0x128] sm:$0xff]  }
 0x190   : > { %11355 = vmatprep.subr.bf16.mxu0 %v12692_v20 }
 0x245   : > { %v11291_v23 = vpop.f32.mrb[40].mxu0 }
 0x246   : > { %v1398_v24 = vpop.f32.mrb[41].mxu0 }
 0x247   : > { %v1417_v25 = vpack.c.bf16 %v11291_v23, %v1398_v24  ;;  %v12723_v23 = vld [vmem:[%s15668_s0 + $0x170] sm:$0xff]   ;;  %v12724_v24 = vld [vmem:[%s15668_s0 + $0x180] sm:$0xff]  }
 0x249   : > { %v1456_v59 = vshll.u32 %v1417_v25, 16  ;;  %v11294_v26 = vpop.f32.mrb[42].mxu0  ;;  %11331 = vmatprep.mubr.bf16.mxu0 %v1417_v25  ;;  %v1454_v27 = vshrl.u32 %v1417_v25, 16  ;;  %v1809_v0 = vrot.slane %v1417_v25, 3  ;;  %v12725_v25 = vld [vmem:[%s15668_s0 + $0x178] sm:$0xff]  }
 0x24a   : > { %v1408_v28 = vpop.f32.mrb[43].mxu0 }
 0x24b   : > { %v1418_v30 = vpack.c.bf16 %v1408_v28, %v1408_v28  ;;  %v1788_v31 = vpack.c.bf16 %v11294_v26, %v1408_v28  ;;  %v1458_v32 = vrot.slane %v1456_v59, 1  ;;  %v1680_v33 = vrot.slane %v1454_v27, 2 }
 0x24c   : > { %v1681_v37 = vrot.slane %v1456_v59, 3  ;;  %v13864_v59 = vld [vmem:[%s15668_s0 + $0x1c0] sm:$0xff]  }
 0x24d   : > { %v1461_v35 = vshll.u32 %v1418_v30, 16  ;;  %v1465_v36 = vshrl.u32 %v1418_v30, 16  ;;  %v1810_v34 = vrot.slane %v1788_v31, 3  ;;  %11332 = vmatmul.mubr.bf16.vlgmr.msra.gmra.mrb[44].mxu0 %v1418_v30  ;;  %v1459_v40 = vor.u32 %v1458_v32, %v1454_v27 }
 0x24e   : > { %11356 = vmatpush3.bf16.msra.mxu0 %v12692_v20  ;;  %v1682_v50 = vor.u32 %v1681_v37, %v1680_v33  ;;  %v12720_v20 = vld [vmem:[%s15668_s0 + $0x130] sm:$0xff]  }
 0x24f   : > { %11357 = vmatprep.subr.bf16.mxu0 %v12694_v29  ;;  %v1463_v41 = vrot.slane %v1461_v35, 1  ;;  %v1811_v42 = vsel %vm1808_vm3, %v1809_v0, %v1810_v34  ;;  %v1683_v45 = vrot.slane %v1465_v36, 2  ;;  %v1684_v46 = vrot.slane %v1461_v35, 3 }
 0x250   : > { %11371 = vmatprep.mubr.bf16.mxu0 %v1811_v42 }
 0x251   : > { %v1464_v47 = vsel %vm1452_vm4, %v1459_v40, %v1463_v41  ;;  %v1467_v39 = vor.u32 %v1465_v36, %v1463_v41  ;;  %v1685_v6 = vor.u32 %v1684_v46, %v1683_v45 }
 0x252   : > { %11358 = vmatpush3.bf16.msra.mxu0 %v12694_v29  ;;  %11311 = vmatprep.mubr.bf16.mxu1 %v1464_v47 }
 0x253   : > { %11312 = vmatmul.mubr.bf16.vlgmr.msra.gmra.mrb[40].mxu1 %v1467_v39  ;;  %11359 = vmatprep.subr.bf16.mxu0 %v12696_v43  ;;  %v1686_v51 = vsel %vm1679_vm5, %v1682_v50, %v1685_v6 }
 0x254   : > { %11336 = vmatpush3.bf16.msra.mxu1 %v12695_v22  ;;  %11351 = vmatprep.mubr.bf16.mxu1 %v1686_v51  ;;  %v12722_v22 = vld [vmem:[%s15668_s0 + $0x138] sm:$0xff]  }
 0x255   : > { %11337 = vmatprep.subr.bf16.mxu1 %v12697_v48 }
 0x256   : > { %11360 = vmatpush3.bf16.msra.mxu0 %v12696_v43 }
 0x257   : > { %11361 = vmatprep.subr.bf16.mxu0 %v12698_v52 }
 0x258   : > { %11338 = vmatpush3.bf16.msra.mxu1 %v12697_v48 }
 0x259   : > { %11339 = vmatprep.subr.bf16.mxu1 %v12699_v53 }
 0x25a   : > { %11362 = vmatpush3.bf16.msra.mxu0 %v12698_v52 }
 0x25b   : > { %11363 = vmatprep.subr.bf16.mxu0 %v12700_v44 }
 0x25c   : > { %11340 = vmatpush3.bf16.msra.mxu1 %v12699_v53 }
 0x25d   : > { %11341 = vmatprep.subr.bf16.mxu1 %v12701_v56 }
 0x25e   : > { %11364 = vmatpush3.bf16.msra.mxu0 %v12700_v44 }
 0x25f   : > { %11365 = vmatprep.subr.bf16.mxu0 %v12702_v57 }
 0x260   : > { %11342 = vmatpush3.bf16.msra.mxu1 %v12701_v56 }
 0x261   : > { %11343 = vmatprep.subr.bf16.mxu1 %v12703_v58 }
 0x262   : > { %11366 = vmatpush3.bf16.msra.mxu0 %v12702_v57 }
 0x263   : > { %11367 = vmatprep.subr.bf16.mxu0 %v12704_v60 }
 0x264   : > { %11344 = vmatpush3.bf16.msra.mxu1 %v12703_v58 }
 0x265   : > { %11345 = vmatprep.subr.bf16.mxu1 %v12705_v13 }
 0x266   : > { %11368 = vmatpush3.bf16.msra.mxu0 %v12704_v60 }
 0x267   : > { %11369 = vmatprep.subr.bf16.mxu0 %v12706_v61 }
 0x268   : > { %11346 = vmatpush3.bf16.msra.mxu1 %v12705_v13 }
 0x269   : > { %11347 = vmatprep.subr.bf16.mxu1 %v12707_v62 }
 0x26a   : > { %11370 = vmatpush3.bf16.msra.mxu0 %v12706_v61 }
 0x26b   : > { %11419 = vmatprep.subr.bf16.mxu0 %v12711_v10 }
 0x26c   : > { %11348 = vmatpush3.bf16.msra.mxu1 %v12707_v62  ;;  %v12726_v62 = vld [vmem:[%s15668_s0 + $0x188] sm:$0xff]  }
 0x26d   : > { %11372 = vmatmul.mubr.bf16.vlgmr.msra.gmra.mrb[48].mxu0 %v1810_v34  ;;  %11349 = vmatprep.subr.bf16.mxu1 %v12708_v63 }
 0x26e   : > { %11420 = vmatpush3.bf16.msra.mxu0 %v12711_v10 }
 0x26f   : > { %11421 = vmatprep.subr.bf16.mxu0 %v12713_v54 }
 0x270   : > { %11350 = vmatpush3.bf16.msra.mxu1 %v12708_v63 }
 0x271   : > { %12537 = vmatprep.subr.bf16.mxu1 %v13662_v15 }
 0x272   : > { %11422 = vmatpush3.bf16.msra.mxu0 %v12713_v54  ;;  %v12728_v54 = vld [vmem:[%s15668_s0 + $0x190] sm:$0xff]  }
 0x273   : > { %11352 = vmatmul.mubr.bf16.vlgmr.msra.gmra.mrb[44].mxu1 %v1685_v6  ;;  %11423 = vmatprep.subr.bf16.mxu0 %v12715_v14 }
 0x274   : > { %12539 = vmatpush3.bf16.msra.mxu1 %v13662_v15  ;;  %11393 = vmatprep.mubr.msk.f32.mxu1 %vm1315_vm1, %v9295_v3 }
 0x275   : > { %12541 = vmatprep.subr.bf16.mxu1 %v13670_v38 }
 0x276   : > { %11424 = vmatpush3.bf16.msra.mxu0 %v12715_v14 }
 0x277   : > { %11425 = vmatprep.subr.bf16.mxu0 %v12717_v17 }
 0x278   : > { %12543 = vmatpush3.bf16.msra.mxu1 %v13670_v38 }
 0x279   : > { %12545 = vmatprep.subr.bf16.mxu1 %v13675_v55 }
 0x27a   : > { %11426 = vmatpush3.bf16.msra.mxu0 %v12717_v17 }
 0x27b   : > { %11427 = vmatprep.subr.bf16.mxu0 %v12719_v19 }
 0x27c   : > { %12547 = vmatpush3.bf16.msra.mxu1 %v13675_v55 }
 0x27d   : > { %12549 = vmatprep.subr.bf16.mxu1 %v13679_v2 }
 0x27e   : > { %11428 = vmatpush3.bf16.msra.mxu0 %v12719_v19  ;;  %v12729_v19 = vld [vmem:[%s15668_s0 + $0x1c8] sm:$0xff]  }
 0x27f   : > { %11429 = vmatprep.subr.bf16.mxu0 %v12721_v21 }
 0x280   : > { %12551 = vmatpush3.bf16.msra.mxu1 %v13679_v2 }
 0x281   : > { %11391 = vmatprep.subr.msk.mxu1 %vm1328_vm2, %v13689_v8 }
 0x282   : > { %11430 = vmatpush3.bf16.msra.mxu0 %v12721_v21 }
 0x283   : > { %11431 = vmatprep.subr.bf16.mxu0 %v12723_v23 }
 0x284   : > { %11392 = vmatpush3.msk.msra.mxu1 %vm1328_vm2, %v13689_v8 }
 0x285   : > { %11394 = vmatmul.mubr.msk.f32.vlgmr.msra.gmra.mrb[48].mxu1 %vm1315_vm1, %v9296_v4  ;;  %11399 = vmatprep.subr.bf16.mxu1 %v12709_v7 }
 0x286   : > { %11396 = vmatprep.mubr.msk.f32.mxu1 %vm1315_vm1, %v9297_v49  ;;  %11400 = vmatpush3.bf16.msra.mxu1 %v12709_v7 }
 0x287   : > { %11401 = vmatprep.subr.bf16.mxu1 %v12710_v9  ;;  %11432 = vmatpush3.bf16.msra.mxu0 %v12723_v23  ;;  %v12730_v23 = vld [vmem:[%s15668_s0 + $0x198] sm:$0xff]  }
 0x288   : > { %11433 = vmatprep.subr.bf16.mxu0 %v12725_v25 }
 0x289   : > { %11397 = vmatmul.mubr.msk.f32.gmra.mrb[50].mxu1 %vm1315_vm1, %v9298_v5 }
 0x28a   : > { %11402 = vmatpush3.bf16.msra.mxu1 %v12710_v9 }
 0x28b   : > { %11403 = vmatprep.subr.bf16.mxu1 %v12712_v11  ;;  %11434 = vmatpush3.bf16.msra.mxu0 %v12725_v25  ;;  %v12732_v25 = vld [vmem:[%s15668_s0 + $0x1a0] sm:$0xff]  }
 0x28c   : > { %11459 = vmatprep.subr.bf16.mxu0 %v13864_v59 }
 0x28e   : > { %11404 = vmatpush3.bf16.msra.mxu1 %v12712_v11 }
 0x28f   : > { %11405 = vmatprep.subr.bf16.mxu1 %v12714_v12 }
 0x292   : > { %11406 = vmatpush3.bf16.msra.mxu1 %v12714_v12 }
 0x293   : > { %11407 = vmatprep.subr.bf16.mxu1 %v12716_v16 }
 0x296   : > { %11408 = vmatpush3.bf16.msra.mxu1 %v12716_v16 }
 0x297   : > { %11409 = vmatprep.subr.bf16.mxu1 %v12718_v18 }
 0x29a   : > { %11410 = vmatpush3.bf16.msra.mxu1 %v12718_v18 }
 0x29b   : > { %11411 = vmatprep.subr.bf16.mxu1 %v12720_v20 }
 0x29e   : > { %11412 = vmatpush3.bf16.msra.mxu1 %v12720_v20 }
 0x29f   : > { %11413 = vmatprep.subr.bf16.mxu1 %v12722_v22 }
 0x2a2   : > { %11414 = vmatpush3.bf16.msra.mxu1 %v12722_v22 }
 0x2a3   : > { %11439 = vmatprep.subr.bf16.mxu1 %v12724_v24 }
 0x320   : > { %v11333_v26 = vpop.f32.mrb[44].mxu0 }
 0x321   : > { %v1648_v27 = vpop.f32.mrb[45].mxu0 }
 0x322   : > { %v11334_v28 = vpop.f32.mrb[46].mxu0 }
 0x323   : > { %v1651_v30 = vpop.f32.mrb[47].mxu0  ;;  %v12736_v28 = vld [vmem:[%s15668_s0 + $0x1b0] sm:$0xff]  }
 0x326   : > { %v11313_v31 = vpop.f32.mrb[40].mxu1 }
 0x327   : > { %v1657_v29 = vadd.f32 %v11333_v26, %v11313_v31  ;;  %v1552_v32 = vpop.f32.mrb[41].mxu1  ;;  %v12733_v26 = vld [vmem:[%s15668_s0 + $0x1d8] sm:$0xff]  }
 0x328   : > { %v1649_v0 = vadd.f32 %v1648_v27, %v1552_v32  ;;  %v11314_v33 = vpop.f32.mrb[42].mxu1  ;;  %v12735_v27 = vld [vmem:[%s15668_s0 + $0x1e0] sm:$0xff]   ;;  %v12738_v31 = vld [vmem:[%s15668_s0 + $0x1b8] sm:$0xff]  }
 0x329   : > { %v1555_v35 = vpop.f32.mrb[43].mxu1  ;;  %v12740_v32 = vld [vmem:[%s15668_s0 + $0x1f8] sm:$0xff]   ;;  %v9401_v33 = vld [vmem:[%s15667_s27 + $0x48] sm:$0xff] }
 0x32a   : > { %v1652_v36 = vadd.f32 %v1651_v30, %v1555_v35  ;;  %v12737_v30 = vld [vmem:[%s15668_s0 + $0x1e8] sm:$0xff]   ;;  %v9402_v35 = vld [vmem:[%s15667_s27 + $0x50] sm:$0xff] }
 0x340   : > { %v11373_v34 = vpop.f32.mrb[48].mxu0 }
 0x341   : > { %v1896_v37 = vpop.f32.mrb[49].mxu0 }
 0x342   : > { %v11374_v40 = vpop.f32.mrb[50].mxu0 }
 0x343   : > { %v1899_v41 = vpop.f32.mrb[51].mxu0  ;;  %v12743_v40 = vld [vmem:[%s15668_s0 + $0x240] sm:$0xff]  }
 0x346   : > { %v11353_v42 = vpop.f32.mrb[44].mxu1 }
 0x347   : > { %v1787_v43 = vadd.f32 %v11353_v42, %v1657_v29  ;;  %v1771_v45 = vpop.f32.mrb[45].mxu1  ;;  %v12739_v29 = vld [vmem:[%s15668_s0 + $0x1f0] sm:$0xff]   ;;  %v12745_v42 = vld [vmem:[%s15668_s0 + $0x248] sm:$0xff]  }
 0x348   : > { %v1785_v46 = vadd.f32 %v1771_v45, %v1649_v0  ;;  %v11354_v47 = vpop.f32.mrb[46].mxu1  ;;  %v9400_v0 = vld [vmem:[%s15667_s27 + $0x40] sm:$0xff]  ;;  %v12747_v45 = vld [vmem:[%s15668_s0 + $0x250] sm:$0xff]  }
 0x349   : > { %v1774_v39 = vpop.f32.mrb[47].mxu1  ;;  %v13867_v48 = vadd.f32 %v11373_v34, %v1787_v43  ;;  %v12741_v34 = vld [vmem:[%s15668_s0 + $0x200] sm:$0xff]   ;;  %v12746_v43 = vld [vmem:[%s15668_s0 + $0x218] sm:$0xff]  }
 0x34a   : > { %v1786_v50 = vadd.f32 %v1774_v39, %v1652_v36  ;;  %v13869_v6 = vadd.f32 %v1896_v37, %v1785_v46  ;;  %v9403_v36 = vld [vmem:[%s15667_s27 + $0x58] sm:$0x1]  ;;  %v12742_v37 = vld [vmem:[%s15668_s0 + $0x208] sm:$0xff]   ;;  %v12748_v46 = vld [vmem:[%s15668_s0 + $0x220] sm:$0xff]  }
 0x34b   : > { %v12749_v47 = vld [vmem:[%s15668_s0 + $0x258] sm:$0xff]   ;;  %v12750_v39 = vld [vmem:[%s15668_s0 + $0x228] sm:$0xff]  }
 0x34c   : > { %v13871_v51 = vadd.f32 %v1899_v41, %v1786_v50  ;;  %v12744_v41 = vld [vmem:[%s15668_s0 + $0x210] sm:$0xff]   ;;  %v12751_v50 = vld [vmem:[%s15668_s0 + $0x260] sm:$0xff]  }
 0x358   : > { %v11395_v52 = vpop.f32.mrb[48].mxu1 }
 0x359   : > { %v1996_v53 = vpop.f32.mrb[49].mxu1 }
 0x35a   : > { %v2015_v44 = vpack.c.bf16 %v11395_v52, %v1996_v53  ;;  %v12752_v52 = vld [vmem:[%s15668_s0 + $0x230] sm:$0xff]   ;;  %v12753_v53 = vld [vmem:[%s15668_s0 + $0x268] sm:$0xff]  }
 0x35c   : > { %v2153_v56 = vshll.u32 %v2015_v44, 16  ;;  %v11398_v57 = vpop.f32.mrb[50].mxu1  ;;  %11415 = vmatprep.mubr.bf16.mxu1 %v2015_v44  ;;  %v2151_v58 = vshrl.u32 %v2015_v44, 16  ;;  %v2411_v3 = vrot.slane %v2015_v44, 3  ;;  %v12754_v44 = vld [vmem:[%s15668_s0 + $0x238] sm:$0xff]  }
 0x35d   : > { %v2006_v60 = vpop.f32.mrb[51].mxu1 }
 0x35e   : > { %v2016_v13 = vpack.c.bf16 %v2006_v60, %v2006_v60  ;;  %v2391_v61 = vpack.c.bf16 %v11398_v57, %v2006_v60  ;;  %v2155_v63 = vrot.slane %v2153_v56, 1  ;;  %v2283_v4 = vrot.slane %v2151_v58, 2  ;;  %v12756_v57 = vld [vmem:[%s15668_s0 + $0x280] sm:$0xff]  }
 0x35f   : > { %v2284_v9 = vrot.slane %v2153_v56, 3  ;;  %v12755_v56 = vld [vmem:[%s15668_s0 + $0x270] sm:$0xff]   ;;  %v14005_v60 = vld [vmem:[%s15668_s0 + $0x2c0] sm:$0xff]  }
 0x360   : > { %v2158_v49 = vshll.u32 %v2016_v13, 16  ;;  %v2162_v5 = vshrl.u32 %v2016_v13, 16  ;;  %v13876_v7 = vrot.slane %v2391_v61, 3  ;;  %11416 = vmatmul.mubr.bf16.vlgmr.msra.gmra.mrb[52].mxu1 %v2016_v13  ;;  %v2156_v10 = vor.u32 %v2155_v63, %v2151_v58  ;;  %v12757_v58 = vld [vmem:[%s15668_s0 + $0x278] sm:$0xff]  }
 0x361   : > { %11440 = vmatpush3.bf16.msra.mxu1 %v12724_v24  ;;  %v2285_v20 = vor.u32 %v2284_v9, %v2283_v4  ;;  %v12731_v24 = vld [vmem:[%s15668_s0 + $0x1d0] sm:$0xff]  }
 0x362   : > { %11441 = vmatprep.subr.bf16.mxu1 %v12726_v62  ;;  %v2160_v11 = vrot.slane %v2158_v49, 1  ;;  %v2413_v12 = vsel %vm1808_vm3, %v2411_v3, %v13876_v7  ;;  %v2286_v14 = vrot.slane %v2162_v5, 2  ;;  %v2287_v16 = vrot.slane %v2158_v49, 3 }
 0x364   : > { %v2161_v17 = vsel %vm1452_vm4, %v2156_v10, %v2160_v11  ;;  %v2164_v18 = vor.u32 %v2162_v5, %v2160_v11  ;;  %v2288_v21 = vor.u32 %v2287_v16, %v2286_v14 }
 0x365   : > { %11442 = vmatpush3.bf16.msra.mxu1 %v12726_v62  ;;  %11435 = vmatprep.mubr.bf16.mxu0 %v2161_v17 }
 0x366   : > { %11436 = vmatmul.mubr.bf16.vlgmr.msra.gmra.mrb[52].mxu0 %v2164_v18  ;;  %11443 = vmatprep.subr.bf16.mxu1 %v12728_v54  ;;  %v2289_v22 = vsel %vm1679_vm5, %v2285_v20, %v2288_v21 }
 0x367   : > { %11460 = vmatpush3.bf16.msra.mxu0 %v13864_v59  ;;  %11475 = vmatprep.mubr.bf16.mxu0 %v2413_v12  ;;  %v12734_v59 = vld [vmem:[%s15668_s0 + $0x1a8] sm:$0xff]  }
 0x368   : > { %11461 = vmatprep.subr.bf16.mxu0 %v12729_v19  ;;  %11455 = vmatprep.mubr.bf16.mxu1 %v2289_v22 }
 0x369   : > { %11444 = vmatpush3.bf16.msra.mxu1 %v12728_v54 }
 0x36a   : > { %11445 = vmatprep.subr.bf16.mxu1 %v12730_v23 }
 0x36b   : > { %11462 = vmatpush3.bf16.msra.mxu0 %v12729_v19 }
 0x36c   : > { %11463 = vmatprep.subr.bf16.mxu0 %v12731_v24 }
 0x36d   : > { %11446 = vmatpush3.bf16.msra.mxu1 %v12730_v23 }
 0x36e   : > { %11447 = vmatprep.subr.bf16.mxu1 %v12732_v25 }
 0x36f   : > { %11464 = vmatpush3.bf16.msra.mxu0 %v12731_v24 }
 0x370   : > { %11465 = vmatprep.subr.bf16.mxu0 %v12733_v26 }
 0x371   : > { %11448 = vmatpush3.bf16.msra.mxu1 %v12732_v25 }
 0x372   : > { %11449 = vmatprep.subr.bf16.mxu1 %v12734_v59 }
 0x373   : > { %11466 = vmatpush3.bf16.msra.mxu0 %v12733_v26 }
 0x374   : > { %11467 = vmatprep.subr.bf16.mxu0 %v12735_v27 }
 0x375   : > { %11450 = vmatpush3.bf16.msra.mxu1 %v12734_v59 }
 0x376   : > { %11451 = vmatprep.subr.bf16.mxu1 %v12736_v28 }
 0x377   : > { %11468 = vmatpush3.bf16.msra.mxu0 %v12735_v27 }
 0x378   : > { %11469 = vmatprep.subr.bf16.mxu0 %v12737_v30 }
 0x379   : > { %11452 = vmatpush3.bf16.msra.mxu1 %v12736_v28 }
 0x37a   : > { %11453 = vmatprep.subr.bf16.mxu1 %v12738_v31 }
 0x37b   : > { %11470 = vmatpush3.bf16.msra.mxu0 %v12737_v30 }
 0x37c   : > { %11471 = vmatprep.subr.bf16.mxu0 %v12739_v29 }
 0x37d   : > { %11454 = vmatpush3.bf16.msra.mxu1 %v12738_v31 }
 0x37e   : > { %12553 = vmatprep.subr.bf16.mxu1 %v13662_v15 }
 0x37f   : > { %11472 = vmatpush3.bf16.msra.mxu0 %v12739_v29 }
 0x380   : > { %11456 = vmatmul.mubr.bf16.vlgmr.msra.gmra.mrb[56].mxu1 %v2288_v21  ;;  %11473 = vmatprep.subr.bf16.mxu0 %v12740_v32 }
 0x381   : > { %12555 = vmatpush3.bf16.msra.mxu1 %v13662_v15  ;;  %11497 = vmatprep.mubr.msk.f32.mxu1 %vm1315_vm1, %v9400_v0 }
 0x382   : > { %12557 = vmatprep.subr.bf16.mxu1 %v13670_v38 }
 0x383   : > { %11474 = vmatpush3.bf16.msra.mxu0 %v12740_v32 }
 0x384   : > { %11503 = vmatprep.subr.bf16.mxu0 %v12741_v34 }
 0x385   : > { %12559 = vmatpush3.bf16.msra.mxu1 %v13670_v38 }
 0x386   : > { %11476 = vmatmul.mubr.bf16.vlgmr.msra.gmra.mrb[56].mxu0 %v13876_v7  ;;  %12561 = vmatprep.subr.bf16.mxu1 %v13675_v55 }
 0x387   : > { %11504 = vmatpush3.bf16.msra.mxu0 %v12741_v34 }
 0x388   : > { %11505 = vmatprep.subr.bf16.mxu0 %v12742_v37 }
 0x389   : > { %12563 = vmatpush3.bf16.msra.mxu1 %v13675_v55 }
 0x38a   : > { %12565 = vmatprep.subr.bf16.mxu1 %v13679_v2 }
 0x38b   : > { %11506 = vmatpush3.bf16.msra.mxu0 %v12742_v37 }
 0x38c   : > { %11507 = vmatprep.subr.bf16.mxu0 %v12744_v41 }
 0x38d   : > { %12567 = vmatpush3.bf16.msra.mxu1 %v13679_v2 }
 0x38e   : > { %11495 = vmatprep.subr.msk.mxu1 %vm1328_vm2, %v13689_v8 }
 0x38f   : > { %11508 = vmatpush3.bf16.msra.mxu0 %v12744_v41 }
 0x390   : > { %11509 = vmatprep.subr.bf16.mxu0 %v12746_v43 }
 0x391   : > { %11496 = vmatpush3.msk.msra.mxu1 %vm1328_vm2, %v13689_v8 }
 0x392   : > { %11498 = vmatmul.mubr.msk.f32.vlgmr.msra.gmra.mrb[60].mxu1 %vm1315_vm1, %v9401_v33  ;;  %11523 = vmatprep.subr.bf16.mxu1 %v12743_v40  ;;  %v12758_v33 = vld [vmem:[%s15668_s0 + $0x288] sm:$0xff]  }
 0x393   : > { %11500 = vmatprep.mubr.msk.f32.mxu1 %vm1315_vm1, %v9402_v35  ;;  %11524 = vmatpush3.bf16.msra.mxu1 %v12743_v40 }
 0x394   : > { %11525 = vmatprep.subr.bf16.mxu1 %v12745_v42  ;;  %11510 = vmatpush3.bf16.msra.mxu0 %v12746_v43 }
 0x395   : > { %11511 = vmatprep.subr.bf16.mxu0 %v12748_v46 }
 0x396   : > { %11501 = vmatmul.mubr.msk.f32.gmra.mrb[62].mxu1 %vm1315_vm1, %v9403_v36 }
 0x397   : > { %11526 = vmatpush3.bf16.msra.mxu1 %v12745_v42 }
 0x398   : > { %11527 = vmatprep.subr.bf16.mxu1 %v12747_v45  ;;  %11512 = vmatpush3.bf16.msra.mxu0 %v12748_v46  ;;  %v12760_v46 = vld [vmem:[%s15668_s0 + $0x290] sm:$0xff]  }
 0x399   : > { %11513 = vmatprep.subr.bf16.mxu0 %v12750_v39 }
 0x39b   : > { %11528 = vmatpush3.bf16.msra.mxu1 %v12747_v45 }
 0x39c   : > { %11529 = vmatprep.subr.bf16.mxu1 %v12749_v47  ;;  %11514 = vmatpush3.bf16.msra.mxu0 %v12750_v39 }
 0x39d   : > { %11515 = vmatprep.subr.bf16.mxu0 %v12752_v52 }
 0x39f   : > { %11530 = vmatpush3.bf16.msra.mxu1 %v12749_v47 }
 0x3a0   : > { %11531 = vmatprep.subr.bf16.mxu1 %v12751_v50  ;;  %11516 = vmatpush3.bf16.msra.mxu0 %v12752_v52 }
 0x3a1   : > { %11517 = vmatprep.subr.bf16.mxu0 %v12754_v44 }
 0x3a3   : > { %11532 = vmatpush3.bf16.msra.mxu1 %v12751_v50 }
 0x3a4   : > { %11533 = vmatprep.subr.bf16.mxu1 %v12753_v53  ;;  %11518 = vmatpush3.bf16.msra.mxu0 %v12754_v44  ;;  %v12761_v44 = vld [vmem:[%s15668_s0 + $0x2c8] sm:$0xff]  }
 0x3a5   : > { %11543 = vmatprep.subr.bf16.mxu0 %v12756_v57 }
 0x3a7   : > { %11534 = vmatpush3.bf16.msra.mxu1 %v12753_v53 }
 0x3a8   : > { %11535 = vmatprep.subr.bf16.mxu1 %v12755_v56 }
 0x3ab   : > { %11536 = vmatpush3.bf16.msra.mxu1 %v12755_v56 }
 0x3ac   : > { %11537 = vmatprep.subr.bf16.mxu1 %v12757_v58 }
 0x3af   : > { %11538 = vmatpush3.bf16.msra.mxu1 %v12757_v58 }
 0x3b0   : > { %11563 = vmatprep.subr.bf16.mxu1 %v14005_v60 }
 0x433   : > { %v11417_v13 = vpop.f32.mrb[52].mxu1 }
 0x434   : > { %v2132_v61 = vadd.f32 %v11417_v13, %v13867_v48  ;;  %v2116_v62 = vpop.f32.mrb[53].mxu1  ;;  %v12762_v13 = vld [vmem:[%s15668_s0 + $0x298] sm:$0xff]  }
 0x435   : > { %v2130_v63 = vadd.f32 %v2116_v62, %v13869_v6  ;;  %v11418_v3 = vpop.f32.mrb[54].mxu1  ;;  %v12764_v62 = vld [vmem:[%s15668_s0 + $0x2a0] sm:$0xff]  }
 0x436   : > { %v2119_v4 = vpop.f32.mrb[55].mxu1  ;;  %v12767_v3 = vld [vmem:[%s15668_s0 + $0x2e0] sm:$0xff]  }
 0x437   : > { %v2131_v49 = vadd.f32 %v2119_v4, %v13871_v51  ;;  %v12768_v4 = vld [vmem:[%s15668_s0 + $0x2b0] sm:$0xff]  }
 0x439   : > { %v11437_v5 = vpop.f32.mrb[52].mxu0 }
 0x43a   : > { %v2265_v7 = vadd.f32 %v11437_v5, %v2132_v61  ;;  %v2249_v9 = vpop.f32.mrb[53].mxu0  ;;  %v12763_v61 = vld [vmem:[%s15668_s0 + $0x2d0] sm:$0xff]   ;;  %v12770_v5 = vld [vmem:[%s15668_s0 + $0x2b8] sm:$0xff]  }
 0x43b   : > { %v2263_v10 = vadd.f32 %v2249_v9, %v2130_v63  ;;  %v11438_v11 = vpop.f32.mrb[54].mxu0  ;;  %v12765_v63 = vld [vmem:[%s15668_s0 + $0x2d8] sm:$0xff]  }
 0x43c   : > { %v2252_v54 = vpop.f32.mrb[55].mxu0  ;;  %v12772_v9 = vld [vmem:[%s15668_s0 + $0x2f8] sm:$0xff]   ;;  %v12774_v11 = vld [vmem:[%s15668_s0 + $0x308] sm:$0xff]  }
 0x43d   : > { %v2264_v12 = vadd.f32 %v2252_v54, %v2131_v49  ;;  %v12769_v49 = vld [vmem:[%s15668_s0 + $0x2e8] sm:$0xff]   ;;  %v12776_v54 = vld [vmem:[%s15668_s0 + $0x310] sm:$0xff]  }
 0x453   : > { %v11457_v14 = vpop.f32.mrb[56].mxu1 }
 0x454   : > { %v2390_v16 = vadd.f32 %v11457_v14, %v2265_v7  ;;  %v2374_v17 = vpop.f32.mrb[57].mxu1  ;;  %v12771_v7 = vld [vmem:[%s15668_s0 + $0x2f0] sm:$0xff]   ;;  %v12778_v14 = vld [vmem:[%s15668_s0 + $0x318] sm:$0xff]  }
 0x455   : > { %v2388_v18 = vadd.f32 %v2374_v17, %v2263_v10  ;;  %v11458_v19 = vpop.f32.mrb[58].mxu1  ;;  %v9505_v10 = vld [vmem:[%s15667_s27 + $0x60] sm:$0xff] }
 0x456   : > { %v2377_v48 = vpop.f32.mrb[59].mxu1  ;;  %v12780_v17 = vld [vmem:[%s15668_s0 + $0x320] sm:$0xff]   ;;  %v12782_v19 = vld [vmem:[%s15668_s0 + $0x328] sm:$0xff]  }
 0x457   : > { %v2389_v20 = vadd.f32 %v2377_v48, %v2264_v12  ;;  %v12777_v12 = vld [vmem:[%s15668_s0 + $0x348] sm:$0xff]   ;;  %v12783_v48 = vld [vmem:[%s15668_s0 + $0x360] sm:$0xff]  }
 0x459   : > { %v11477_v21 = vpop.f32.mrb[56].mxu0 }
 0x45a   : > { %v14011_v6 = vadd.f32 %v11477_v21, %v2390_v16  ;;  %v2498_v22 = vpop.f32.mrb[57].mxu0  ;;  %v12779_v16 = vld [vmem:[%s15668_s0 + $0x350] sm:$0xff]   ;;  %v12785_v21 = vld [vmem:[%s15668_s0 + $0x368] sm:$0xff]  }
 0x45b   : > { %v14013_v23 = vadd.f32 %v2498_v22, %v2388_v18  ;;  %v11478_v51 = vpop.f32.mrb[58].mxu0  ;;  %v12781_v18 = vld [vmem:[%s15668_s0 + $0x358] sm:$0xff]  }
 0x45c   : > { %v2501_v24 = vpop.f32.mrb[59].mxu0  ;;  %v12786_v22 = vld [vmem:[%s15668_s0 + $0x338] sm:$0xff]   ;;  %v12787_v51 = vld [vmem:[%s15668_s0 + $0x370] sm:$0xff]  }
 0x45d   : > { %v14015_v25 = vadd.f32 %v2501_v24, %v2389_v20  ;;  %v12784_v20 = vld [vmem:[%s15668_s0 + $0x330] sm:$0xff]   ;;  %v12788_v24 = vld [vmem:[%s15668_s0 + $0x380] sm:$0xff]  }
 0x465   : > { %v11499_v26 = vpop.f32.mrb[60].mxu1 }
 0x466   : > { %v2598_v59 = vpop.f32.mrb[61].mxu1 }
 0x467   : > { %v2617_v27 = vpack.c.bf16 %v11499_v26, %v2598_v59  ;;  %v12789_v26 = vld [vmem:[%s15668_s0 + $0x378] sm:$0xff]   ;;  %v14149_v59 = vld [vmem:[%s15668_s0 + $0x3c0] sm:$0xff]  }
 0x469   : > { %v2755_v28 = vshll.u32 %v2617_v27, 16  ;;  %v11502_v30 = vpop.f32.mrb[62].mxu1  ;;  %11519 = vmatprep.mubr.bf16.mxu0 %v2617_v27  ;;  %v2753_v31 = vshrl.u32 %v2617_v27, 16  ;;  %v3013_v36 = vrot.slane %v2617_v27, 3 }
 0x46a   : > { %v2608_v29 = vpop.f32.mrb[63].mxu1 }
 0x46b   : > { %v2618_v32 = vpack.c.bf16 %v2608_v29, %v2608_v29  ;;  %v2993_v0 = vpack.c.bf16 %v11502_v30, %v2608_v29  ;;  %v2757_v35 = vrot.slane %v2755_v28, 1  ;;  %v2885_v34 = vrot.slane %v2753_v31, 2 }
 0x46c   : > { %v2886_v42 = vrot.slane %v2755_v28, 3 }
 0x46d   : > { %v2760_v37 = vshll.u32 %v2618_v32, 16  ;;  %v2764_v40 = vshrl.u32 %v2618_v32, 16  ;;  %v14020_v41 = vrot.slane %v2993_v0, 3  ;;  %11520 = vmatmul.mubr.bf16.vlgmr.msra.gmra.mrb[60].mxu0 %v2618_v32  ;;  %v2758_v43 = vor.u32 %v2757_v35, %v2753_v31 }
 0x46e   : > { %11544 = vmatpush3.bf16.msra.mxu0 %v12756_v57  ;;  %v2887_v56 = vor.u32 %v2886_v42, %v2885_v34 }
 0x46f   : > { %11545 = vmatprep.subr.bf16.mxu0 %v12758_v33  ;;  %v2762_v45 = vrot.slane %v2760_v37, 1  ;;  %v3015_v47 = vsel %vm1808_vm3, %v3013_v36, %v14020_v41  ;;  %v2888_v39 = vrot.slane %v2764_v40, 2  ;;  %v2889_v50 = vrot.slane %v2760_v37, 3 }
 0x471   : > { %v2763_v52 = vsel %vm1452_vm4, %v2758_v43, %v2762_v45  ;;  %v2766_v53 = vor.u32 %v2764_v40, %v2762_v45  ;;  %v2890_v57 = vor.u32 %v2889_v50, %v2888_v39 }
 0x472   : > { %11546 = vmatpush3.bf16.msra.mxu0 %v12758_v33  ;;  %11539 = vmatprep.mubr.bf16.mxu1 %v2763_v52 }
 0x473   : > { %11540 = vmatmul.mubr.bf16.vlgmr.msra.gmra.mrb[64].mxu1 %v2766_v53  ;;  %11547 = vmatprep.subr.bf16.mxu0 %v12760_v46  ;;  %v2891_v58 = vsel %vm1679_vm5, %v2887_v56, %v2890_v57 }
 0x474   : > { %11564 = vmatpush3.bf16.msra.mxu1 %v14005_v60  ;;  %11579 = vmatprep.mubr.bf16.mxu1 %v3015_v47  ;;  %v12766_v60 = vld [vmem:[%s15668_s0 + $0x2a8] sm:$0xff]  }
 0x475   : > { %11565 = vmatprep.subr.bf16.mxu1 %v12761_v44  ;;  %11559 = vmatprep.mubr.bf16.mxu0 %v2891_v58 }
 0x476   : > { %11548 = vmatpush3.bf16.msra.mxu0 %v12760_v46 }
 0x477   : > { %11549 = vmatprep.subr.bf16.mxu0 %v12762_v13 }
 0x478   : > { %11566 = vmatpush3.bf16.msra.mxu1 %v12761_v44 }
 0x479   : > { %11567 = vmatprep.subr.bf16.mxu1 %v12763_v61 }
 0x47a   : > { %11550 = vmatpush3.bf16.msra.mxu0 %v12762_v13 }
 0x47b   : > { %11551 = vmatprep.subr.bf16.mxu0 %v12764_v62 }
 0x47c   : > { %11568 = vmatpush3.bf16.msra.mxu1 %v12763_v61 }
 0x47d   : > { %11569 = vmatprep.subr.bf16.mxu1 %v12765_v63 }
 0x47e   : > { %11552 = vmatpush3.bf16.msra.mxu0 %v12764_v62 }
 0x47f   : > { %11553 = vmatprep.subr.bf16.mxu0 %v12766_v60 }
 0x480   : > { %11570 = vmatpush3.bf16.msra.mxu1 %v12765_v63 }
 0x481   : > { %11571 = vmatprep.subr.bf16.mxu1 %v12767_v3 }
 0x482   : > { %11554 = vmatpush3.bf16.msra.mxu0 %v12766_v60 }
 0x483   : > { %11555 = vmatprep.subr.bf16.mxu0 %v12768_v4 }
 0x484   : > { %11572 = vmatpush3.bf16.msra.mxu1 %v12767_v3 }
 0x485   : > { %11573 = vmatprep.subr.bf16.mxu1 %v12769_v49 }
 0x486   : > { %11556 = vmatpush3.bf16.msra.mxu0 %v12768_v4 }
 0x487   : > { %11557 = vmatprep.subr.bf16.mxu0 %v12770_v5 }
 0x488   : > { %11574 = vmatpush3.bf16.msra.mxu1 %v12769_v49  ;;  %v12790_v49 = vld [vmem:[%s15668_s0 + $0x388] sm:$0xff]  }
 0x489   : > { %11575 = vmatprep.subr.bf16.mxu1 %v12771_v7 }
 0x48a   : > { %11558 = vmatpush3.bf16.msra.mxu0 %v12770_v5 }
 0x48b   : > { %12569 = vmatprep.subr.bf16.mxu0 %v13662_v15 }
 0x48c   : > { %11576 = vmatpush3.bf16.msra.mxu1 %v12771_v7 }
 0x48d   : > { %11560 = vmatmul.mubr.bf16.vlgmr.msra.gmra.mrb[64].mxu0 %v2890_v57  ;;  %11577 = vmatprep.subr.bf16.mxu1 %v12772_v9 }
 0x48e   : > { %12571 = vmatpush3.bf16.msra.mxu0 %v13662_v15  ;;  %11601 = vmatprep.mubr.msk.f32.mxu0 %vm1315_vm1, %v9505_v10  ;;  %v9506_v15 = vld [vmem:[%s15667_s27 + $0x68] sm:$0xff] }
 0x48f   : > { %12573 = vmatprep.subr.bf16.mxu0 %v13670_v38 }
 0x490   : > { %11578 = vmatpush3.bf16.msra.mxu1 %v12772_v9 }
 0x492   : > { %12575 = vmatpush3.bf16.msra.mxu0 %v13670_v38  ;;  %v9507_v38 = vld [vmem:[%s15667_s27 + $0x70] sm:$0xff] }
 0x493   : > { %11580 = vmatmul.mubr.bf16.vlgmr.msra.gmra.mrb[68].mxu1 %v14020_v41  ;;  %12577 = vmatprep.subr.bf16.mxu0 %v13675_v55 }
 0x496   : > { %12579 = vmatpush3.bf16.msra.mxu0 %v13675_v55  ;;  %v9508_v55 = vld [vmem:[%s15667_s27 + $0x78] sm:$0x1] }
 0x497   : > { %12581 = vmatprep.subr.bf16.mxu0 %v13679_v2 }
 0x49a   : > { %12583 = vmatpush3.bf16.msra.mxu0 %v13679_v2  ;;  %v12773_v2 = vld [vmem:[%s15668_s0 + $0x300] sm:$0xff]  }
 0x49b   : > { %11599 = vmatprep.subr.msk.mxu0 %vm1328_vm2, %v13689_v8  ;;  %11607 = vmatprep.subr.bf16.mxu1 %v12773_v2 }
 0x49c   : > { %11608 = vmatpush3.bf16.msra.mxu1 %v12773_v2 }
 0x49d   : > { %11609 = vmatprep.subr.bf16.mxu1 %v12774_v11 }
 0x49e   : > { %11600 = vmatpush3.msk.msra.mxu0 %vm1328_vm2, %v13689_v8  ;;  %v12775_v8 = vld [vmem:[%s15668_s0 + $0x340] sm:$0xff]  }
 0x49f   : > { %11602 = vmatmul.mubr.msk.f32.vlgmr.msra.gmra.mrb[68].mxu0 %vm1315_vm1, %v9506_v15  ;;  %11627 = vmatprep.subr.bf16.mxu0 %v12775_v8 }
 0x4a0   : > { %11604 = vmatprep.mubr.msk.f32.mxu0 %vm1315_vm1, %v9507_v38  ;;  %11628 = vmatpush3.bf16.msra.mxu0 %v12775_v8  ;;  %v12792_v8 = vld [vmem:[%s15668_s0 + $0x390] sm:$0xff]  }
 0x4a1   : > { %11610 = vmatpush3.bf16.msra.mxu1 %v12774_v11  ;;  %11629 = vmatprep.subr.bf16.mxu0 %v12777_v12 }
 0x4a2   : > { %11611 = vmatprep.subr.bf16.mxu1 %v12776_v54 }
 0x4a3   : > { %11605 = vmatmul.mubr.msk.f32.gmra.mrb[70].mxu0 %vm1315_vm1, %v9508_v55 }
 0x4a4   : > { %11630 = vmatpush3.bf16.msra.mxu0 %v12777_v12 }
 0x4a5   : > { %11612 = vmatpush3.bf16.msra.mxu1 %v12776_v54  ;;  %11631 = vmatprep.subr.bf16.mxu0 %v12779_v16 }
 0x4a6   : > { %11613 = vmatprep.subr.bf16.mxu1 %v12778_v14 }
 0x4a8   : > { %11632 = vmatpush3.bf16.msra.mxu0 %v12779_v16 }
 0x4a9   : > { %11614 = vmatpush3.bf16.msra.mxu1 %v12778_v14  ;;  %11633 = vmatprep.subr.bf16.mxu0 %v12781_v18 }
 0x4aa   : > { %11615 = vmatprep.subr.bf16.mxu1 %v12780_v17 }
 0x4ac   : > { %11634 = vmatpush3.bf16.msra.mxu0 %v12781_v18  ;;  %v12793_v18 = vld [vmem:[%s15668_s0 + $0x3c8] sm:$0xff]  }
 0x4ad   : > { %11616 = vmatpush3.bf16.msra.mxu1 %v12780_v17  ;;  %11635 = vmatprep.subr.bf16.mxu0 %v12783_v48 }
 0x4ae   : > { %11617 = vmatprep.subr.bf16.mxu1 %v12782_v19 }
 0x4b0   : > { %11636 = vmatpush3.bf16.msra.mxu0 %v12783_v48 }
 0x4b1   : > { %11618 = vmatpush3.bf16.msra.mxu1 %v12782_v19  ;;  %11637 = vmatprep.subr.bf16.mxu0 %v12785_v21 }
 0x4b2   : > { %11619 = vmatprep.subr.bf16.mxu1 %v12784_v20 }
 0x4b4   : > { %11638 = vmatpush3.bf16.msra.mxu0 %v12785_v21  ;;  %v12794_v21 = vld [vmem:[%s15668_s0 + $0x398] sm:$0xff]  }
 0x4b5   : > { %11620 = vmatpush3.bf16.msra.mxu1 %v12784_v20  ;;  %11639 = vmatprep.subr.bf16.mxu0 %v12787_v51 }
 0x4b6   : > { %11621 = vmatprep.subr.bf16.mxu1 %v12786_v22 }
 0x4b8   : > { %11640 = vmatpush3.bf16.msra.mxu0 %v12787_v51  ;;  %v12796_v51 = vld [vmem:[%s15668_s0 + $0x3a0] sm:$0xff]  }
 0x4b9   : > { %11622 = vmatpush3.bf16.msra.mxu1 %v12786_v22  ;;  %11641 = vmatprep.subr.bf16.mxu0 %v12789_v26  ;;  %v12795_v22 = vld [vmem:[%s15668_s0 + $0x3d0] sm:$0xff]  }
 0x4ba   : > { %11647 = vmatprep.subr.bf16.mxu1 %v12788_v24 }
 0x4bc   : > { %11642 = vmatpush3.bf16.msra.mxu0 %v12789_v26  ;;  %v12798_v26 = vld [vmem:[%s15668_s0 + $0x3a8] sm:$0xff]  }
 0x4bd   : > { %11667 = vmatprep.subr.bf16.mxu0 %v14149_v59 }
 0x540   : > { %v11521_v27 = vpop.f32.mrb[60].mxu0 }
 0x541   : > { %v2734_v28 = vadd.f32 %v11521_v27, %v14011_v6  ;;  %v2718_v30 = vpop.f32.mrb[61].mxu0  ;;  %v12800_v27 = vld [vmem:[%s15668_s0 + $0x3b0] sm:$0xff]  }
 0x542   : > { %v2732_v31 = vadd.f32 %v2718_v30, %v14013_v23  ;;  %v11522_v29 = vpop.f32.mrb[62].mxu0  ;;  %v12802_v30 = vld [vmem:[%s15668_s0 + $0x3b8] sm:$0xff]  }
 0x543   : > { %v2721_v32 = vpop.f32.mrb[63].mxu0  ;;  %v12804_v29 = vld [vmem:[%s15668_s0 + $0x3f8] sm:$0xff]  }
 0x544   : > { %v2733_v0 = vadd.f32 %v2721_v32, %v14015_v25  ;;  %v13227_v32 = vmov 0.0|0.0  }
 0x546   : > { %v11541_v33 = vpop.f32.mrb[64].mxu1 }
 0x547   : > { %v2867_v35 = vadd.f32 %v11541_v33, %v2734_v28  ;;  %v2851_v36 = vpop.f32.mrb[65].mxu1  ;;  %v12801_v28 = vld [vmem:[%s15668_s0 + $0x3e8] sm:$0xff]  }
 0x548   : > { %v2865_v34 = vadd.f32 %v2851_v36, %v2732_v31  ;;  %v11542_v37 = vpop.f32.mrb[66].mxu1  ;;  %v12803_v31 = vld [vmem:[%s15668_s0 + $0x3f0] sm:$0xff]  }
 0x549   : > { %v2854_v40 = vpop.f32.mrb[67].mxu1 }
 0x54a   : > { %v2866_v41 = vadd.f32 %v2854_v40, %v2733_v0 }
 0x560   : > { %v11561_v42 = vpop.f32.mrb[64].mxu0 }
 0x561   : > { %v2992_v43 = vadd.f32 %v11561_v42, %v2867_v35  ;;  %v2976_v45 = vpop.f32.mrb[65].mxu0 }
 0x562   : > { %v2990_v46 = vadd.f32 %v2976_v45, %v2865_v34  ;;  %v11562_v47 = vpop.f32.mrb[66].mxu0 }
 0x563   : > { %v2979_v6 = vpop.f32.mrb[67].mxu0 }
 0x564   : > { %v2991_v39 = vadd.f32 %v2979_v6, %v2866_v41 }
 0x566   : > { %v11581_v50 = vpop.f32.mrb[68].mxu1 }
 0x567   : > { %v14155_v23 = vadd.f32 %v11581_v50, %v2992_v43  ;;  %v3100_v52 = vpop.f32.mrb[69].mxu1 }
 0x568   : > { %v14157_v53 = vadd.f32 %v3100_v52, %v2990_v46  ;;  %v11582_v25 = vpop.f32.mrb[70].mxu1 }
 0x569   : > { %v3103_v44 = vpop.f32.mrb[71].mxu1 }
 0x56a   : > { %v14159_v56 = vadd.f32 %v3103_v44, %v2991_v39 }
 0x572   : > { %v11603_v57 = vpop.f32.mrb[68].mxu0 }
 0x573   : > { %v3200_v58 = vpop.f32.mrb[69].mxu0 }
 0x574   : > { %v3219_v13 = vpack.c.bf16 %v11603_v57, %v3200_v58 }
 0x576   : > { %v3357_v61 = vshll.u32 %v3219_v13, 16  ;;  %v11606_v62 = vpop.f32.mrb[70].mxu0  ;;  %11623 = vmatprep.mubr.bf16.mxu1 %v3219_v13  ;;  %v3355_v63 = vshrl.u32 %v3219_v13, 16  ;;  %v3615_v7 = vrot.slane %v3219_v13, 3 }
 0x577   : > { %v3210_v60 = vpop.f32.mrb[71].mxu0 }
 0x578   : > { %v3220_v3 = vpack.c.bf16 %v3210_v60, %v3210_v60  ;;  %v3595_v4 = vpack.c.bf16 %v11606_v62, %v3210_v60  ;;  %v3359_v5 = vrot.slane %v3357_v61, 1  ;;  %v3487_v9 = vrot.slane %v3355_v63, 2 }
 0x579   : > { %v3488_v55 = vrot.slane %v3357_v61, 3 }
 0x57a   : > { %v3362_v10 = vshll.u32 %v3220_v3, 16  ;;  %v3366_v15 = vshrl.u32 %v3220_v3, 16  ;;  %v3616_v38 = vrot.slane %v3595_v4, 3  ;;  %11624 = vmatmul.mubr.bf16.vlgmr.msra.gmra.mrb[72].mxu1 %v3220_v3  ;;  %v3360_v2 = vor.u32 %v3359_v5, %v3355_v63 }
 0x57b   : > { %11648 = vmatpush3.bf16.msra.mxu1 %v12788_v24  ;;  %v3489_v19 = vor.u32 %v3488_v55, %v3487_v9  ;;  %v12797_v24 = vld [vmem:[%s15668_s0 + $0x3d8] sm:$0xff]  }
 0x57c   : > { %11649 = vmatprep.subr.bf16.mxu1 %v12790_v49  ;;  %v3364_v11 = vrot.slane %v3362_v10, 1  ;;  %v3617_v54 = vsel %vm1808_vm3, %v3615_v7, %v3616_v38  ;;  %v3490_v12 = vrot.slane %v3366_v15, 2  ;;  %v3491_v14 = vrot.slane %v3362_v10, 3 }
 0x57e   : > { %v3365_v16 = vsel %vm1452_vm4, %v3360_v2, %v3364_v11  ;;  %v3368_v17 = vor.u32 %v3366_v15, %v3364_v11  ;;  %v3492_v48 = vor.u32 %v3491_v14, %v3490_v12 }
 0x57f   : > { %11650 = vmatpush3.bf16.msra.mxu1 %v12790_v49  ;;  %11643 = vmatprep.mubr.bf16.mxu0 %v3365_v16 }
 0x580   : > { %11644 = vmatmul.mubr.bf16.vlgmr.msra.gmra.mrb[72].mxu0 %v3368_v17  ;;  %11651 = vmatprep.subr.bf16.mxu1 %v12792_v8  ;;  %v3493_v20 = vsel %vm1679_vm5, %v3489_v19, %v3492_v48 }
 0x581   : > { %11668 = vmatpush3.bf16.msra.mxu0 %v14149_v59  ;;  %11683 = vmatprep.mubr.bf16.mxu0 %v3617_v54  ;;  %v12799_v59 = vld [vmem:[%s15668_s0 + $0x3e0] sm:$0xff]  }
 0x582   : > { %11669 = vmatprep.subr.bf16.mxu0 %v12793_v18  ;;  %11663 = vmatprep.mubr.bf16.mxu1 %v3493_v20  ;;  %v12806_v20 = vld [vmem:[%s15627_s7 + $0x8] sm:$0xff]  }
 0x583   : > { %11652 = vmatpush3.bf16.msra.mxu1 %v12792_v8 }
 0x584   : > { %11653 = vmatprep.subr.bf16.mxu1 %v12794_v21 }
 0x585   : > { %11670 = vmatpush3.bf16.msra.mxu0 %v12793_v18  ;;  %v12805_v18 = vld [vmem:[%s15627_s7] sm:$0xff]  }
 0x586   : > { %11671 = vmatprep.subr.bf16.mxu0 %v12795_v22 }
 0x587   : > { %11654 = vmatpush3.bf16.msra.mxu1 %v12794_v21  ;;  %v3745_v21 = vld [vmem:[%s15626_s6 + $0x8] sm:$0xff] }
 0x588   : > { %11655 = vmatprep.subr.bf16.mxu1 %v12796_v51 }
 0x589   : > { %11672 = vmatpush3.bf16.msra.mxu0 %v12795_v22  ;;  %v3746_v22 = vld [vmem:[%s15626_s6 + $0x10] sm:$0xff] }
 0x58a   : > { %11673 = vmatprep.subr.bf16.mxu0 %v12797_v24 }
 0x58b   : > { %11656 = vmatpush3.bf16.msra.mxu1 %v12796_v51  ;;  %v3747_v51 = vld [vmem:[%s15626_s6 + $0x18] sm:$0xff] }
 0x58c   : > { %11657 = vmatprep.subr.bf16.mxu1 %v12798_v26 }
 0x58d   : > { %11674 = vmatpush3.bf16.msra.mxu0 %v12797_v24  ;;  %v3748_v24 = vld [vmem:[%s15626_s6 + $0x20] sm:$0xf] }
 0x58e   : > { %11675 = vmatprep.subr.bf16.mxu0 %v12799_v59 }
 0x58f   : > { %11658 = vmatpush3.bf16.msra.mxu1 %v12798_v26  ;;  %v12807_v26 = vld [vmem:[%s15627_s7 + $0x40] sm:$0xff]  }
 0x590   : > { %11659 = vmatprep.subr.bf16.mxu1 %v12800_v27 }
 0x591   : > { %11676 = vmatpush3.bf16.msra.mxu0 %v12799_v59  ;;  %v12808_v59 = vld [vmem:[%s15627_s7 + $0x10] sm:$0xff]  }
 0x592   : > { %11677 = vmatprep.subr.bf16.mxu0 %v12801_v28 }
 0x593   : > { %11660 = vmatpush3.bf16.msra.mxu1 %v12800_v27  ;;  %v12809_v27 = vld [vmem:[%s15627_s7 + $0x48] sm:$0xff]  }
 0x594   : > { %11661 = vmatprep.subr.bf16.mxu1 %v12802_v30 }
 0x595   : > { %11678 = vmatpush3.bf16.msra.mxu0 %v12801_v28  ;;  %v12810_v28 = vld [vmem:[%s15627_s7 + $0x18] sm:$0xff]  }
 0x596   : > { %11679 = vmatprep.subr.bf16.mxu0 %v12803_v31 }
 0x597   : > { %11662 = vmatpush3.bf16.msra.mxu1 %v12802_v30  ;;  %v12811_v30 = vld [vmem:[%s15627_s7 + $0x50] sm:$0xff]  }
 0x598   : > { %11708 = vmatprep.subr.bf16.mxu1 %v12807_v26 }
 0x599   : > { %11680 = vmatpush3.bf16.msra.mxu0 %v12803_v31  ;;  %v12812_v31 = vld [vmem:[%s15627_s7 + $0x20] sm:$0xff]  }
 0x59a   : > { %11664 = vmatmul.mubr.bf16.vlgmr.msra.gmra.mrb[76].mxu1 %v3492_v48  ;;  %11681 = vmatprep.subr.bf16.mxu0 %v12804_v29  ;;  %v3744_v48 = vld [vmem:[%s15626_s6] sm:$0xff] }
 0x59b   : > { %11709 = vmatpush3.bf16.msra.mxu1 %v12807_v26 }
 0x59c   : > { %11710 = vmatprep.subr.bf16.mxu1 %v12809_v27 }
 0x59d   : > { %11682 = vmatpush3.bf16.msra.mxu0 %v12804_v29  ;;  %v12813_v29 = vld [vmem:[%s15627_s7 + $0x58] sm:$0xff]  }
 0x59e   : > { %12584 = vmatprep.subr.bf16.mxu0 %v13227_v32 }
 0x59f   : > { %11711 = vmatpush3.bf16.msra.mxu1 %v12809_v27 }
 0x5a0   : > { %11684 = vmatmul.mubr.bf16.vlgmr.msra.gmra.mrb[76].mxu0 %v3616_v38  ;;  %11712 = vmatprep.subr.bf16.mxu1 %v12811_v30 }
 0x5a1   : > { %11693 = vmatprep.mubr.msk.f32.mxu0 %vm13226_vm0, %v13225_v1 }
 0x5a3   : > { %11713 = vmatpush3.bf16.msra.mxu1 %v12811_v30 }
 0x5a4   : > { %11714 = vmatprep.subr.bf16.mxu1 %v12813_v29 }
 0x5a7   : > { %11715 = vmatpush3.bf16.msra.mxu1 %v12813_v29 }
 0x64d   : > { %v11625_v0 = vpop.f32.mrb[72].mxu1 }
 0x64e   : > { %v3336_v33 = vadd.f32 %v11625_v0, %v14155_v23  ;;  %v3320_v35 = vpop.f32.mrb[73].mxu1  ;;  %v12814_v0 = vld [vmem:[%s15627_s7 + $0x28] sm:$0xff]  }
 0x64f   : > { %v3334_v36 = vadd.f32 %v3320_v35, %v14157_v53  ;;  %v11626_v34 = vpop.f32.mrb[74].mxu1  ;;  %v12816_v35 = vld [vmem:[%s15627_s7 + $0x30] sm:$0xff]  }
 0x650   : > { %v3323_v37 = vpop.f32.mrb[75].mxu1  ;;  %v12818_v34 = vld [vmem:[%s15627_s7 + $0x38] sm:$0xff]  }
 0x651   : > { %v3335_v40 = vadd.f32 %v3323_v37, %v14159_v56  ;;  %v9610_v56 = vld [vmem:[%s15625_s5] ss:$0 sm:$0xff]  ;;  %v12819_v37 = vld [vmem:[%s15627_s7 + $0x70] sm:$0xff]  }
 0x653   : > { %v11645_v41 = vpop.f32.mrb[72].mxu0 }
 0x654   : > { %v3469_v42 = vadd.f32 %v11645_v41, %v3336_v33  ;;  %v3453_v43 = vpop.f32.mrb[73].mxu0  ;;  %v12815_v33 = vld [vmem:[%s15627_s7 + $0x60] sm:$0xff]   ;;  %v12821_v41 = vld [vmem:[%s15627_s7 + $0x78] sm:$0xff]  }
 0x655   : > { %v3467_v45 = vadd.f32 %v3453_v43, %v3334_v36  ;;  %v11646_v46 = vpop.f32.mrb[74].mxu0  ;;  %11716 = vmatprep.subr.bf16.mxu1 %v12815_v33  ;;  %v12817_v36 = vld [vmem:[%s15627_s7 + $0x68] sm:$0xff]  }
 0x656   : > { %v3456_v47 = vpop.f32.mrb[75].mxu0  ;;  %11717 = vmatpush3.bf16.msra.mxu1 %v12815_v33 }
 0x657   : > { %v3468_v6 = vadd.f32 %v3456_v47, %v3335_v40  ;;  %11718 = vmatprep.subr.bf16.mxu1 %v12817_v36  ;;  %v14293_v40 = vld [vmem:[%s15627_s7 + $0xc0] sm:$0xff]  }
 0x65a   : > { %11719 = vmatpush3.bf16.msra.mxu1 %v12817_v36  ;;  %v12824_v36 = vld [vmem:[%s15627_s7 + $0xd0] sm:$0xff]  }
 0x65b   : > { %11720 = vmatprep.subr.bf16.mxu1 %v12819_v37 }
 0x65e   : > { %11721 = vmatpush3.bf16.msra.mxu1 %v12819_v37 }
 0x65f   : > { %11722 = vmatprep.subr.bf16.mxu1 %v12821_v41 }
 0x662   : > { %11723 = vmatpush3.bf16.msra.mxu1 %v12821_v41 }
 0x66d   : > { %v11665_v39 = vpop.f32.mrb[76].mxu1 }
 0x66e   : > { %v3594_v50 = vadd.f32 %v11665_v39, %v3469_v42  ;;  %v3578_v52 = vpop.f32.mrb[77].mxu1  ;;  %v14302_v42 = vld [vmem:[%s15627_s7 + $0x80] sm:$0xff]  }
 0x66f   : > { %v3592_v25 = vadd.f32 %v3578_v52, %v3467_v45  ;;  %v11666_v44 = vpop.f32.mrb[78].mxu1  ;;  %11748 = vmatprep.subr.bf16.mxu1 %v14302_v42 }
 0x670   : > { %v3581_v23 = vpop.f32.mrb[79].mxu1 }
 0x671   : > { %v3593_v57 = vadd.f32 %v3581_v23, %v3468_v6 }
 0x673   : > { %v11685_v58 = vpop.f32.mrb[76].mxu0 }
 0x674   : > { %v3718_v53 = vadd.f32 %v11685_v58, %v3594_v50  ;;  %v3702_v13 = vpop.f32.mrb[77].mxu0 }
 0x675   : > { %v3716_v61 = vadd.f32 %v3702_v13, %v3592_v25  ;;  %v11686_v62 = vpop.f32.mrb[78].mxu0 }
 0x676   : > { %v3705_v63 = vpop.f32.mrb[79].mxu0  ;;  %v3728_v60 = vadd.f32 %v9610_v56, %v3718_v53 }
 0x677   : > { %v3726_v3 = vadd.f32 %v9610_v56, %v3716_v61  ;;  %v3717_v4 = vadd.f32 %v3705_v63, %v3593_v57 }
 0x678   : > { %v3734_v7 = vmul.f32 0.70710677, %v3728_v60  ;;  %v3731_v17 = vmul.f32 0.5, %v3728_v60 }
 0x679   : > { %v3732_v49 = vmul.f32 0.70710677, %v3726_v3  ;;  %v3727_v5 = vadd.f32 %v9610_v56, %v3717_v4  ;;  %v3729_v55 = vmul.f32 0.5, %v3726_v3 }
 0x67b   : > { %13119 = verf.f32 %v3732_v49  ;;  %v3733_v9 = vmul.f32 0.70710677, %v3727_v5  ;;  %v3730_v2 = vmul.f32 0.5, %v3727_v5 }
 0x67d   : > { %13121 = verf.f32 %v3733_v9 }
 0x67e   : > { %13123 = verf.f32 %v3734_v7 }
 0x685   : > { %v13120_v10 = vpop.eup %13119 }
 0x686   : > { %v3738_v15 = vadd.f32 1.0, %v13120_v10 }
 0x687   : > { %v13122_v38 = vpop.eup %13121 }
 0x688   : > { %v3739_v11 = vadd.f32 1.0, %v13122_v38  ;;  %v13124_v8 = vpop.eup %13123  ;;  %v3741_v54 = vmul.f32 %v3738_v15, %v3729_v55 }
 0x689   : > { %v3740_v14 = vadd.f32 1.0, %v13124_v8 }
 0x68a   : > { %v3742_v12 = vmul.f32 %v3739_v11, %v3730_v2 }
 0x68b   : > { %v3743_v19 = vmul.f32 %v3740_v14, %v3731_v17 }
 0x68c   : > { %v12585_v16 = vpack.c.bf16 %v3742_v12, %v3741_v54 }
 0x68e   : > { %12586 = vmatpush3.bf16.msra.mxu0 %v12585_v16 }
 0x68f   : > { %11691 = vmatprep.subr.mxu0 %v13225_v1 }
 0x692   : > { %11692 = vmatpush3.msk.msra.mxu0 %vm3765_vm6, %v3743_v19 }
 0x693   : > { %11694 = vmatmul.mubr.msk.f32.vlgmr.msra.gmra.mrb[80].mxu0 %vm3749_vm7, %v3744_v48  ;;  %11728 = vmatprep.subr.bf16.mxu0 %v12805_v18 }
 0x694   : > { %11696 = vmatprep.mubr.msk.f32.mxu0 %vm13226_vm0, %v13225_v1  ;;  %11729 = vmatpush3.bf16.msra.mxu0 %v12805_v18 }
 0x695   : > { %11730 = vmatprep.subr.bf16.mxu0 %v12806_v20 }
 0x697   : > { %11697 = vmatmul.mubr.msk.f32.gmra.mrb[82].mxu0 %vm3749_vm7, %v3745_v21 }
 0x698   : > { %11699 = vmatprep.mubr.msk.f32.mxu0 %vm13226_vm0, %v13225_v1  ;;  %11731 = vmatpush3.bf16.msra.mxu0 %v12806_v20  ;;  %v12822_v20 = vld [vmem:[%s15627_s7 + $0xc8] sm:$0xff]  }
 0x699   : > { %11732 = vmatprep.subr.bf16.mxu0 %v12808_v59 }
 0x69b   : > { %11700 = vmatmul.mubr.msk.f32.gmra.mrb[84].mxu0 %vm3749_vm7, %v3746_v22 }
 0x69c   : > { %11702 = vmatprep.mubr.msk.f32.mxu0 %vm13226_vm0, %v13225_v1  ;;  %11733 = vmatpush3.bf16.msra.mxu0 %v12808_v59 }
 0x69d   : > { %11734 = vmatprep.subr.bf16.mxu0 %v12810_v28 }
 0x69f   : > { %11703 = vmatmul.mubr.msk.f32.gmra.mrb[86].mxu0 %vm3749_vm7, %v3747_v51 }
 0x6a0   : > { %11705 = vmatprep.mubr.msk.f32.mxu0 %vm13226_vm0, %v13225_v1  ;;  %11735 = vmatpush3.bf16.msra.mxu0 %v12810_v28 }
 0x6a1   : > { %11736 = vmatprep.subr.bf16.mxu0 %v12812_v31 }
 0x6a3   : > { %11706 = vmatmul.mubr.msk.f32.gmra.mrb[88].mxu0 %vm3749_vm7, %v3748_v24 }
 0x6a4   : > { %11737 = vmatpush3.bf16.msra.mxu0 %v12812_v31 }
 0x6a5   : > { %11738 = vmatprep.subr.bf16.mxu0 %v12814_v0 }
 0x6a8   : > { %11739 = vmatpush3.bf16.msra.mxu0 %v12814_v0 }
 0x6a9   : > { %11740 = vmatprep.subr.bf16.mxu0 %v12816_v35 }
 0x6ac   : > { %11741 = vmatpush3.bf16.msra.mxu0 %v12816_v35 }
 0x6ad   : > { %11742 = vmatprep.subr.bf16.mxu0 %v12818_v34 }
 0x6b0   : > { %11743 = vmatpush3.bf16.msra.mxu0 %v12818_v34 }
 0x6b1   : > { %11768 = vmatprep.subr.bf16.mxu0 %v14293_v40 }
 0x766   : > { %v3835_v43 = vpop.f32.mrb[80].mxu0 }
 0x767   : > { %v3864_v45 = vmul.f32 0.70710677, %v3835_v43  ;;  %v11695_v46 = vpop.f32.mrb[81].mxu0  ;;  %v6268_v6 = vrot.slane %v3835_v43, 7  ;;  %v3859_v9 = vmul.f32 0.5, %v3835_v43 }
 0x769   : > { %13125 = verf.f32 %v3864_v45 }
 0x76a   : > { %v3840_v47 = vpop.f32.mrb[82].mxu0 }
 0x76b   : > { %v3865_v39 = vmul.f32 0.70710677, %v3840_v47  ;;  %v6269_v50 = vrot.slane %v3840_v47, 7  ;;  %v11698_v52 = vpop.f32.mrb[83].mxu0  ;;  %v3860_v10 = vmul.f32 0.5, %v3840_v47  ;;  %v12825_v47 = vld [vmem:[%s15627_s7 + $0x88] sm:$0xff]  }
 0x76d   : > { %13127 = verf.f32 %v3865_v39  ;;  %v14306_v25 = vsel %vm6267_vm8, %v6268_v6, %v6269_v50 }
 0x76e   : > { %v3845_v44 = vpop.f32.mrb[84].mxu0 }
 0x76f   : > { %v3866_v23 = vmul.f32 0.70710677, %v3845_v44  ;;  %v6271_v57 = vrot.slane %v3845_v44, 7  ;;  %v11701_v58 = vpop.f32.mrb[85].mxu0  ;;  %v3861_v8 = vmul.f32 0.5, %v3845_v44 }
 0x771   : > { %13129 = verf.f32 %v3866_v23  ;;  %v14309_v53 = vsel %vm6267_vm8, %v6269_v50, %v6271_v57 }
 0x772   : > { %v3850_v56 = vpop.f32.mrb[86].mxu0 }
 0x773   : > { %v13126_v13 = vpop.eup %13125  ;;  %v3867_v61 = vmul.f32 0.70710677, %v3850_v56  ;;  %v6273_v62 = vrot.slane %v3850_v56, 7  ;;  %v11704_v63 = vpop.f32.mrb[87].mxu0  ;;  %v3862_v14 = vmul.f32 0.5, %v3850_v56 }
 0x774   : > { %v3874_v3 = vadd.f32 1.0, %v13126_v13 }
 0x775   : > { %13131 = verf.f32 %v3867_v61  ;;  %v14312_v60 = vsel %vm6267_vm8, %v6271_v57, %v6273_v62  ;;  %v12826_v57 = vld [vmem:[%s15627_s7 + $0xd8] sm:$0xff]  }
 0x776   : > { %v3855_v4 = vpop.f32.mrb[88].mxu0  ;;  %v3879_v38 = vmul.f32 %v3874_v3, %v3859_v9  ;;  %v12827_v3 = vld [vmem:[%s15627_s7 + $0x90] sm:$0xff]  }
 0x777   : > { %v13128_v49 = vpop.eup %13127  ;;  %v3868_v5 = vmul.f32 0.70710677, %v3855_v4  ;;  %v11707_v7 = vpop.f32.mrb[89].mxu0  ;;  %v3863_v24 = vmul.f32 0.5, %v3855_v4 }
 0x778   : > { %v3875_v15 = vadd.f32 1.0, %v13128_v49 }
 0x779   : > { %13133 = verf.f32 %v3868_v5 }
 0x77a   : > { %v3880_v55 = vmul.f32 %v3875_v15, %v3860_v10  ;;  %v12828_v10 = vld [vmem:[%s15627_s7 + $0xe0] sm:$0xff]  }
 0x77b   : > { %v13130_v2 = vpop.eup %13129 }
 0x77c   : > { %v3884_v11 = vpack.c.bf16 %v3880_v55, %v3879_v38  ;;  %v3876_v54 = vadd.f32 1.0, %v13130_v2 }
 0x77e   : > { %v3881_v12 = vmul.f32 %v3876_v54, %v3861_v8  ;;  %11744 = vmatprep.mubr.bf16.mxu0 %v3884_v11  ;;  %v3922_v16 = vshll.u32 %v3884_v11, 16  ;;  %v3920_v22 = vshrl.u32 %v3884_v11, 16  ;;  %v4148_v59 = vrot.slane %v3884_v11, 1  ;;  %v12829_v8 = vld [vmem:[%s15627_s7 + $0x98] sm:$0xff]  }
 0x77f   : > { %v13132_v17 = vpop.eup %13131 }
 0x780   : > { %v14314_v18 = vpack.c.bf16 %v3881_v12, %v3881_v12  ;;  %v14316_v19 = vpack.c.bf16 %v3881_v12, %v3880_v55  ;;  %v3877_v48 = vadd.f32 1.0, %v13132_v17  ;;  %v3924_v21 = vrot.slane %v3922_v16, 1  ;;  %v12831_v17 = vld [vmem:[%s15627_s7 + $0xa0] sm:$0xff]  }
 0x781   : > { %v4393_v6 = vrot.slane %v3920_v22, 3  ;;  %v4394_v39 = vrot.slane %v3922_v16, 4 }
 0x782   : > { %v14321_v51 = vmul.f32 %v3877_v48, %v3862_v14  ;;  %11745 = vmatmul.mubr.bf16.vlgmr.msra.gmra.mrb[92].mxu0 %v14314_v18  ;;  %v3927_v26 = vshll.u32 %v14314_v18, 16  ;;  %v3925_v28 = vor.u32 %v3924_v21, %v3920_v22  ;;  %v3931_v30 = vshrl.u32 %v14314_v18, 16  ;;  %v12830_v14 = vld [vmem:[%s15627_s7 + $0xe8] sm:$0xff]   ;;  %v12832_v48 = vld [vmem:[%s15627_s7 + $0xf0] sm:$0xff]   ;;  %v12834_v21 = vld [vmem:[%s15627_s7 + $0xf8] sm:$0xff]  }
 0x783   : > { %v13134_v27 = vpop.eup %13133  ;;  %11769 = vmatpush3.bf16.msra.mxu0 %v14293_v40  ;;  %v4149_v31 = vrot.slane %v14314_v18, 1  ;;  %v4767_v29 = vshrl.u32 %v14316_v19, 16  ;;  %v4770_v34 = vshll.u32 %v14316_v19, 16  ;;  %v4271_v40 = vrot.slane %v3884_v11, 3  ;;  %v12835_v22 = vld [vmem:[%s15627_s7 + $0xb0] sm:$0xff]   ;;  %v12845_v18 = vld [vmem:[%s15627_s7 + $0x118] sm:$0xff]  }
 0x784   : > { %v14330_v0 = vpack.c.bf16 %v14321_v51, %v3881_v12  ;;  %v3878_v33 = vadd.f32 1.0, %v13134_v27  ;;  %11770 = vmatprep.subr.bf16.mxu0 %v12822_v20  ;;  %v3929_v35 = vrot.slane %v3927_v26, 1  ;;  %v4645_v62 = vrot.slane %v14316_v19, 2  ;;  %v12837_v26 = vld [vmem:[%s15627_s7 + $0xb8] sm:$0xff]   ;;  %v12839_v27 = vld [vmem:[%s15627_s7 + $0x100] sm:$0xff]  }
 0x785   : > { %v4150_v37 = vsel %vm1328_vm2, %v4148_v59, %v4149_v31  ;;  %v4769_v58 = vrot.slane %v4767_v29, 2  ;;  %v4772_v56 = vrot.slane %v4770_v34, 3  ;;  %v4901_v63 = vrot.slane %v14316_v19, 3  ;;  %v12838_v59 = vld [vmem:[%s15627_s7 + $0x148] sm:$0xff]   ;;  %v12843_v29 = vld [vmem:[%s15627_s7 + $0x110] sm:$0xff]   ;;  %v12850_v34 = vld [vmem:[%s15627_s7 + $0x178] sm:$0xff]  }
 0x786   : > { %v3883_v41 = vmul.f32 %v3878_v33, %v3863_v24  ;;  %v3930_v43 = vsel %vm1452_vm4, %v3925_v28, %v3929_v35  ;;  %v3933_v45 = vor.u32 %v3931_v30, %v3929_v35  ;;  %v4272_v46 = vrot.slane %v14330_v0, 3  ;;  %v12836_v24 = vld [vmem:[%s15627_s7 + $0x140] sm:$0xff]   ;;  %v12840_v28 = vld [vmem:[%s15627_s7 + $0x150] sm:$0xff]   ;;  %v12841_v30 = vld [vmem:[%s15627_s7 + $0x108] sm:$0xff]  }
 0x787   : > { %11771 = vmatpush3.bf16.msra.mxu0 %v12822_v20  ;;  %11724 = vmatprep.mubr.bf16.mxu1 %v3930_v43  ;;  %v4397_v50 = vshrl.u32 %v14330_v0, 16  ;;  %v4400_v52 = vshll.u32 %v14330_v0, 16  ;;  %v4395_v7 = vor.u32 %v4394_v39, %v4393_v6  ;;  %v4773_v54 = vor.u32 %v4772_v56, %v4769_v58  ;;  %v12833_v20 = vld [vmem:[%s15627_s7 + $0xa8] sm:$0xff]   ;;  %v12844_v0 = vld [vmem:[%s15627_s7 + $0x160] sm:$0xff]   ;;  %v12848_v35 = vld [vmem:[%s15627_s7 + $0x170] sm:$0xff]  }
 0x788   : > { %v14347_v44 = vpack.c.bf16 %v3883_v41, %v14321_v51  ;;  %11725 = vmatmul.mubr.bf16.vlgmr.msra.gmra.mrb[80].mxu1 %v3933_v45  ;;  %11772 = vmatprep.subr.bf16.mxu0 %v12824_v36  ;;  %v4273_v23 = vsel %vm1808_vm3, %v4271_v40, %v4272_v46  ;;  %v12847_v33 = vld [vmem:[%s15627_s7 + $0x120] sm:$0xff]   ;;  %v12853_v41 = vld [vmem:[%s15627_s7 + $0x138] sm:$0xff]   ;;  %v4507_v43 = vpack.c.bf16 %v14321_v51, %v14321_v51  ;;  %v12854_v45 = vld [vmem:[%s15627_s7 + $0x1c8] sm:$0xff]  }
 0x789   : > { %11749 = vmatpush3.bf16.msra.mxu1 %v14302_v42  ;;  %11764 = vmatprep.mubr.bf16.mxu1 %v4150_v37  ;;  %v4399_v13 = vrot.slane %v4397_v50, 3  ;;  %v4402_v61 = vrot.slane %v4400_v52, 4  ;;  %v12851_v37 = vld [vmem:[%s15627_s7 + $0x130] sm:$0xff]   ;;  %v12852_v40 = vld [vmem:[%s15627_s7 + $0x1c0] sm:$0xff]   ;;  %v12858_v6 = vld [vmem:[%s15627_s7 + $0x1d8] sm:$0xff]  }
 0x78a   : > { %11784 = vmatprep.mubr.bf16.mxu0 %v4273_v23  ;;  %11750 = vmatprep.subr.bf16.mxu1 %v12825_v47  ;;  %v4775_v4 = vshrl.u32 %v14347_v44, 16  ;;  %v4778_v49 = vshll.u32 %v14347_v44, 16  ;;  %v4646_v5 = vrot.slane %v14347_v44, 2  ;;  %v4902_v42 = vrot.slane %v14347_v44, 3  ;;  %v12856_v51 = vld [vmem:[%s15627_s7 + $0x1d0] sm:$0xff]   ;;  %v12860_v50 = vld [vmem:[%s15627_s7 + $0x1e0] sm:$0xff]  }
 0x78b   : > { %11773 = vmatpush3.bf16.msra.mxu0 %v12824_v36  ;;  %v14365_v9 = vor.u32 %v4402_v61, %v4399_v13  ;;  %v12849_v36 = vld [vmem:[%s15627_s7 + $0x128] sm:$0xff]   ;;  %v12859_v39 = vld [vmem:[%s15627_s7 + $0x190] sm:$0xff]   ;;  %v12861_v52 = vld [vmem:[%s15627_s7 + $0x198] sm:$0xff]  }
 0x78c   : > { %11774 = vmatprep.subr.bf16.mxu0 %v12826_v57  ;;  %v4777_v15 = vrot.slane %v4775_v4, 2  ;;  %v4780_v38 = vrot.slane %v4778_v49, 3  ;;  %v14373_v55 = vsel %vm4644_vm10, %v4645_v62, %v4646_v5  ;;  %v14378_v2 = vsel %vm1808_vm3, %v4901_v63, %v4902_v42  ;;  %v12862_v23 = vld [vmem:[%s15627_s7 + $0x1e8] sm:$0xff]   ;;  %v12864_v58 = vld [vmem:[%s15627_s7 + $0x1f0] sm:$0xff]   ;;  %v12866_v13 = vld [vmem:[%s15627_s7 + $0x1f8] sm:$0xff]  }
 0x78d   : > { %11751 = vmatpush3.bf16.msra.mxu1 %v12825_v47  ;;  %v4404_v11 = vsel %vm4392_vm9, %v4395_v7, %v14365_v9  ;;  %v12857_v47 = vld [vmem:[%s15627_s7 + $0x188] sm:$0xff]   ;;  %v12867_v61 = vld [vmem:[%s15627_s7 + $0x1b0] sm:$0xff]   ;;  %v12868_v62 = vld [vmem:[%s15627_s7 + $0x1b8] sm:$0xff]  }
 0x78e   : > { %11752 = vmatprep.subr.bf16.mxu1 %v12827_v3  ;;  %v14385_v12 = vor.u32 %v4780_v38, %v4777_v15  ;;  %v12865_v56 = vld [vmem:[%s15627_s7 + $0x1a8] sm:$0xff]   ;;  %v12869_v63 = vld [vmem:[%s15627_s7 + $0x200] sm:$0xff]   ;;  %v12871_v4 = vld [vmem:[%s15627_s7 + $0x210] sm:$0xff]  }
 0x78f   : > { %11775 = vmatpush3.bf16.msra.mxu0 %v12826_v57  ;;  %v12863_v57 = vld [vmem:[%s15627_s7 + $0x1a0] sm:$0xff]   ;;  %v12872_v49 = vld [vmem:[%s15627_s7 + $0x218] sm:$0xff]   ;;  %v12874_v7 = vld [vmem:[%s15627_s7 + $0x228] sm:$0xff]  }
 0x790   : > { %11776 = vmatprep.subr.bf16.mxu0 %v12828_v10  ;;  %v14392_v16 = vsel %vm1679_vm5, %v4773_v54, %v14385_v12 }
 0x791   : > { %11753 = vmatpush3.bf16.msra.mxu1 %v12827_v3  ;;  %v12870_v3 = vld [vmem:[%s15627_s7 + $0x208] sm:$0xff]  }
 0x792   : > { %11754 = vmatprep.subr.bf16.mxu1 %v12829_v8 }
 0x793   : > { %11777 = vmatpush3.bf16.msra.mxu0 %v12828_v10  ;;  %v12876_v10 = vld [vmem:[%s15627_s7 + $0x238] sm:$0xff]  }
 0x794   : > { %11778 = vmatprep.subr.bf16.mxu0 %v12830_v14 }
 0x795   : > { %11755 = vmatpush3.bf16.msra.mxu1 %v12829_v8 }
 0x796   : > { %11756 = vmatprep.subr.bf16.mxu1 %v12831_v17 }
 0x797   : > { %11779 = vmatpush3.bf16.msra.mxu0 %v12830_v14 }
 0x798   : > { %11780 = vmatprep.subr.bf16.mxu0 %v12832_v48 }
 0x799   : > { %11757 = vmatpush3.bf16.msra.mxu1 %v12831_v17 }
 0x79a   : > { %11758 = vmatprep.subr.bf16.mxu1 %v12833_v20 }
 0x79b   : > { %11781 = vmatpush3.bf16.msra.mxu0 %v12832_v48 }
 0x79c   : > { %11782 = vmatprep.subr.bf16.mxu0 %v12834_v21 }
 0x79d   : > { %11759 = vmatpush3.bf16.msra.mxu1 %v12833_v20 }
 0x79e   : > { %11760 = vmatprep.subr.bf16.mxu1 %v12835_v22 }
 0x79f   : > { %11783 = vmatpush3.bf16.msra.mxu0 %v12834_v21 }
 0x7a0   : > { %11808 = vmatprep.subr.bf16.mxu0 %v12836_v24 }
 0x7a1   : > { %11761 = vmatpush3.bf16.msra.mxu1 %v12835_v22 }
 0x7a2   : > { %11785 = vmatmul.mubr.bf16.vlgmr.msra.gmra.mrb[96].mxu0 %v4272_v46  ;;  %11762 = vmatprep.subr.bf16.mxu1 %v12837_v26  ;;  %v12855_v46 = vld [vmem:[%s15627_s7 + $0x180] sm:$0xff]  }
 0x7a3   : > { %11809 = vmatpush3.bf16.msra.mxu0 %v12836_v24  ;;  %11824 = vmatprep.mubr.bf16.mxu0 %v14316_v19  ;;  %v12842_v19 = vld [vmem:[%s15627_s7 + $0x158] sm:$0xff]  }
 0x7a4   : > { %11810 = vmatprep.subr.bf16.mxu0 %v12838_v59 }
 0x7a5   : > { %11763 = vmatpush3.bf16.msra.mxu1 %v12837_v26 }
 0x7a6   : > { %11788 = vmatprep.subr.bf16.mxu1 %v12839_v27 }
 0x7a7   : > { %11811 = vmatpush3.bf16.msra.mxu0 %v12838_v59 }
 0x7a8   : > { %11765 = vmatmul.mubr.bf16.vlgmr.msra.gmra.mrb[84].mxu1 %v4149_v31  ;;  %11812 = vmatprep.subr.bf16.mxu0 %v12840_v28  ;;  %v12846_v31 = vld [vmem:[%s15627_s7 + $0x168] sm:$0xff]  }
 0x7a9   : > { %11789 = vmatpush3.bf16.msra.mxu1 %v12839_v27  ;;  %11804 = vmatprep.mubr.bf16.mxu1 %v4404_v11 }
 0x7aa   : > { %11790 = vmatprep.subr.bf16.mxu1 %v12841_v30 }
 0x7ab   : > { %11813 = vmatpush3.bf16.msra.mxu0 %v12840_v28 }
 0x7ac   : > { %11814 = vmatprep.subr.bf16.mxu0 %v12842_v19 }
 0x7ad   : > { %11791 = vmatpush3.bf16.msra.mxu1 %v12841_v30 }
 0x7ae   : > { %11792 = vmatprep.subr.bf16.mxu1 %v12843_v29 }
 0x7af   : > { %11815 = vmatpush3.bf16.msra.mxu0 %v12842_v19 }
 0x7b0   : > { %11816 = vmatprep.subr.bf16.mxu0 %v12844_v0 }
 0x7b1   : > { %11793 = vmatpush3.bf16.msra.mxu1 %v12843_v29 }
 0x7b2   : > { %11794 = vmatprep.subr.bf16.mxu1 %v12845_v18 }
 0x7b3   : > { %11817 = vmatpush3.bf16.msra.mxu0 %v12844_v0  ;;  %v12877_v0 = vld [vmem:[%s15630_s10] sm:$0xff]  }
 0x7b4   : > { %11818 = vmatprep.subr.bf16.mxu0 %v12846_v31 }
 0x7b5   : > { %11795 = vmatpush3.bf16.msra.mxu1 %v12845_v18  ;;  %v12878_v18 = vld [vmem:[%s15630_s10 + $0x8] sm:$0xff]  }
 0x7b6   : > { %11796 = vmatprep.subr.bf16.mxu1 %v12847_v33 }
 0x7b7   : > { %11819 = vmatpush3.bf16.msra.mxu0 %v12846_v31  ;;  %v12880_v31 = vld [vmem:[%s15630_s10 + $0x10] sm:$0xff]  }
 0x7b8   : > { %11820 = vmatprep.subr.bf16.mxu0 %v12848_v35 }
 0x7b9   : > { %11797 = vmatpush3.bf16.msra.mxu1 %v12847_v33  ;;  %v12882_v33 = vld [vmem:[%s15630_s10 + $0x18] sm:$0xff]  }
 0x7ba   : > { %11798 = vmatprep.subr.bf16.mxu1 %v12849_v36 }
 0x7bb   : > { %11821 = vmatpush3.bf16.msra.mxu0 %v12848_v35 }
 0x7bc   : > { %11822 = vmatprep.subr.bf16.mxu0 %v12850_v34 }
 0x7bd   : > { %11799 = vmatpush3.bf16.msra.mxu1 %v12849_v36 }
 0x7be   : > { %11800 = vmatprep.subr.bf16.mxu1 %v12851_v37 }
 0x7bf   : > { %11823 = vmatpush3.bf16.msra.mxu0 %v12850_v34 }
 0x7c0   : > { %11848 = vmatprep.subr.bf16.mxu0 %v12852_v40 }
 0x7c1   : > { %11801 = vmatpush3.bf16.msra.mxu1 %v12851_v37  ;;  %v12884_v37 = vld [vmem:[%s15630_s10 + $0x20] sm:$0xff]  }
 0x7c2   : > { %11825 = vmatmul.mubr.bf16.vlgmr.msra.gmra.mrb[100].mxu0 %v4507_v43  ;;  %11802 = vmatprep.subr.bf16.mxu1 %v12853_v41  ;;  %v12886_v43 = vld [vmem:[%s15630_s10 + $0x28] sm:$0xff]  }
 0x7c3   : > { %11849 = vmatpush3.bf16.msra.mxu0 %v12852_v40  ;;  %11864 = vmatprep.mubr.bf16.mxu0 %v14392_v16 }
 0x7c4   : > { %11850 = vmatprep.subr.bf16.mxu0 %v12854_v45 }
 0x7c5   : > { %11803 = vmatpush3.bf16.msra.mxu1 %v12853_v41 }
 0x7c6   : > { %11828 = vmatprep.subr.bf16.mxu1 %v12855_v46 }
 0x7c7   : > { %11851 = vmatpush3.bf16.msra.mxu0 %v12854_v45 }
 0x7c8   : > { %11805 = vmatmul.mubr.bf16.vlgmr.msra.gmra.mrb[88].mxu1 %v14365_v9  ;;  %11852 = vmatprep.subr.bf16.mxu0 %v12856_v51  ;;  %v12875_v9 = vld [vmem:[%s15627_s7 + $0x230] sm:$0xff]  }
 0x7c9   : > { %11829 = vmatpush3.bf16.msra.mxu1 %v12855_v46  ;;  %11844 = vmatprep.mubr.bf16.mxu1 %v14373_v55 }
 0x7ca   : > { %11830 = vmatprep.subr.bf16.mxu1 %v12857_v47 }
 0x7cb   : > { %11853 = vmatpush3.bf16.msra.mxu0 %v12856_v51 }
 0x7cc   : > { %11854 = vmatprep.subr.bf16.mxu0 %v12858_v6 }
 0x7cd   : > { %11831 = vmatpush3.bf16.msra.mxu1 %v12857_v47 }
 0x7ce   : > { %11832 = vmatprep.subr.bf16.mxu1 %v12859_v39 }
 0x7cf   : > { %11855 = vmatpush3.bf16.msra.mxu0 %v12858_v6 }
 0x7d0   : > { %11856 = vmatprep.subr.bf16.mxu0 %v12860_v50 }
 0x7d1   : > { %11833 = vmatpush3.bf16.msra.mxu1 %v12859_v39 }
 0x7d2   : > { %11834 = vmatprep.subr.bf16.mxu1 %v12861_v52 }
 0x7d3   : > { %11857 = vmatpush3.bf16.msra.mxu0 %v12860_v50 }
 0x7d4   : > { %11858 = vmatprep.subr.bf16.mxu0 %v12862_v23 }
 0x7d5   : > { %11835 = vmatpush3.bf16.msra.mxu1 %v12861_v52 }
 0x7d6   : > { %11836 = vmatprep.subr.bf16.mxu1 %v12863_v57 }
 0x7d7   : > { %11859 = vmatpush3.bf16.msra.mxu0 %v12862_v23  ;;  %v12888_v23 = vld [vmem:[%s15630_s10 + $0x30] sm:$0xff]  }
 0x7d8   : > { %11860 = vmatprep.subr.bf16.mxu0 %v12864_v58 }
 0x7d9   : > { %11837 = vmatpush3.bf16.msra.mxu1 %v12863_v57 }
 0x7da   : > { %11838 = vmatprep.subr.bf16.mxu1 %v12865_v56 }
 0x7db   : > { %11861 = vmatpush3.bf16.msra.mxu0 %v12864_v58 }
 0x7dc   : > { %11862 = vmatprep.subr.bf16.mxu0 %v12866_v13 }
 0x7dd   : > { %11839 = vmatpush3.bf16.msra.mxu1 %v12865_v56 }
 0x7de   : > { %11840 = vmatprep.subr.bf16.mxu1 %v12867_v61 }
 0x7df   : > { %11863 = vmatpush3.bf16.msra.mxu0 %v12866_v13 }
 0x7e0   : > { %12587 = vmatprep.subr.bf16.mxu0 %v13227_v32 }
 0x7e1   : > { %11841 = vmatpush3.bf16.msra.mxu1 %v12867_v61 }
 0x7e2   : > { %11865 = vmatmul.mubr.bf16.vlgmr.msra.gmra.mrb[104].mxu0 %v14385_v12  ;;  %11842 = vmatprep.subr.bf16.mxu1 %v12868_v62 }
 0x7e3   : > { %11894 = vmatprep.mubr.msk.f32.mxu0 %vm13226_vm0, %v13225_v1 }
 0x7e5   : > { %11843 = vmatpush3.bf16.msra.mxu1 %v12868_v62 }
 0x7e6   : > { %11868 = vmatprep.subr.bf16.mxu1 %v12869_v63 }
 0x7e8   : > { %11845 = vmatmul.mubr.bf16.vlgmr.msra.gmra.mrb[92].mxu1 %v4646_v5  ;;  %v12873_v5 = vld [vmem:[%s15627_s7 + $0x220] sm:$0xff]  }
 0x7e9   : > { %11869 = vmatpush3.bf16.msra.mxu1 %v12869_v63  ;;  %11884 = vmatprep.mubr.bf16.mxu1 %v14378_v2 }
 0x7ea   : > { %11870 = vmatprep.subr.bf16.mxu1 %v12870_v3 }
 0x7ed   : > { %11871 = vmatpush3.bf16.msra.mxu1 %v12870_v3 }
 0x7ee   : > { %11872 = vmatprep.subr.bf16.mxu1 %v12871_v4 }
 0x7f1   : > { %11873 = vmatpush3.bf16.msra.mxu1 %v12871_v4 }
 0x7f2   : > { %11874 = vmatprep.subr.bf16.mxu1 %v12872_v49 }
 0x7f5   : > { %11875 = vmatpush3.bf16.msra.mxu1 %v12872_v49 }
 0x7f6   : > { %11876 = vmatprep.subr.bf16.mxu1 %v12873_v5 }
 0x7f9   : > { %11877 = vmatpush3.bf16.msra.mxu1 %v12873_v5 }
 0x7fa   : > { %11878 = vmatprep.subr.bf16.mxu1 %v12874_v7 }
 0x7fd   : > { %11879 = vmatpush3.bf16.msra.mxu1 %v12874_v7 }
 0x7fe   : > { %11880 = vmatprep.subr.bf16.mxu1 %v12875_v9 }
 0x801   : > { %11881 = vmatpush3.bf16.msra.mxu1 %v12875_v9 }
 0x802   : > { %11882 = vmatprep.subr.bf16.mxu1 %v12876_v10 }
 0x805   : > { %11883 = vmatpush3.bf16.msra.mxu1 %v12876_v10 }
 0x806   : > { %11929 = vmatprep.subr.bf16.mxu1 %v12877_v0 }
 0x808   : > { %11885 = vmatmul.mubr.bf16.vlgmr.msra.gmra.mrb[96].mxu1 %v4902_v42 }
 0x809   : > { %11930 = vmatpush3.bf16.msra.mxu1 %v12877_v0 }
 0x80a   : > { %11931 = vmatprep.subr.bf16.mxu1 %v12878_v18 }
 0x80d   : > { %11932 = vmatpush3.bf16.msra.mxu1 %v12878_v18 }
 0x80e   : > { %11933 = vmatprep.subr.bf16.mxu1 %v12880_v31 }
 0x811   : > { %11934 = vmatpush3.bf16.msra.mxu1 %v12880_v31  ;;  %v12879_v31 = vld [vmem:[%s15630_s10 + $0x40] sm:$0xff]  }
 0x812   : > { %11935 = vmatprep.subr.bf16.mxu1 %v12882_v33 }
 0x815   : > { %11936 = vmatpush3.bf16.msra.mxu1 %v12882_v33 }
 0x816   : > { %11937 = vmatprep.subr.bf16.mxu1 %v12884_v37 }
 0x819   : > { %11938 = vmatpush3.bf16.msra.mxu1 %v12884_v37  ;;  %v12883_v37 = vld [vmem:[%s15630_s10 + $0x50] sm:$0xff]  }
 0x81a   : > { %11939 = vmatprep.subr.bf16.mxu1 %v12886_v43 }
 0x81d   : > { %11940 = vmatpush3.bf16.msra.mxu1 %v12886_v43  ;;  %v5008_v43 = vld [vmem:[%s15629_s9 + $0x18] sm:$0xff] }
 0x81e   : > { %11941 = vmatprep.subr.bf16.mxu1 %v12888_v23 }
 0x821   : > { %11942 = vmatpush3.bf16.msra.mxu1 %v12888_v23 }
 0x855   : > { %v11746_v15 = vpop.f32.mrb[92].mxu0 }
 0x856   : > { %v4114_v38 = vpop.f32.mrb[93].mxu0 }
 0x857   : > { %v11747_v55 = vpop.f32.mrb[94].mxu0 }
 0x858   : > { %v4117_v2 = vpop.f32.mrb[95].mxu0 }
 0x85b   : > { %v11726_v11 = vpop.f32.mrb[80].mxu1 }
 0x85c   : > { %v4123_v8 = vadd.f32 %v11746_v15, %v11726_v11  ;;  %v4018_v54 = vpop.f32.mrb[81].mxu1 }
 0x85d   : > { %v4115_v12 = vadd.f32 %v4114_v38, %v4018_v54  ;;  %v11727_v14 = vpop.f32.mrb[82].mxu1 }
 0x85e   : > { %v4021_v16 = vpop.f32.mrb[83].mxu1 }
 0x85f   : > { %v4118_v17 = vadd.f32 %v4117_v2, %v4021_v16  ;;  %v9817_v2 = vld [vmem:[%s15628_s8] ss:$0 sm:$0xff] }
 0x875   : > { %v11786_v48 = vpop.f32.mrb[96].mxu0 }
 0x876   : > { %v4358_v20 = vpop.f32.mrb[97].mxu0 }
 0x877   : > { %v11787_v21 = vpop.f32.mrb[98].mxu0 }
 0x878   : > { %v4361_v22 = vpop.f32.mrb[99].mxu0 }
 0x87b   : > { %v11766_v24 = vpop.f32.mrb[84].mxu1 }
 0x87c   : > { %v4251_v26 = vadd.f32 %v11766_v24, %v4123_v8  ;;  %v4235_v59 = vpop.f32.mrb[85].mxu1 }
 0x87d   : > { %v4249_v44 = vadd.f32 %v4235_v59, %v4115_v12  ;;  %v11767_v42 = vpop.f32.mrb[86].mxu1 }
 0x87e   : > { %v4238_v27 = vpop.f32.mrb[87].mxu1  ;;  %v4374_v28 = vadd.f32 %v11786_v48, %v4251_v26 }
 0x87f   : > { %v4250_v30 = vadd.f32 %v4238_v27, %v4118_v17  ;;  %v4372_v19 = vadd.f32 %v4358_v20, %v4249_v44 }
 0x881   : > { %v4373_v29 = vadd.f32 %v4361_v22, %v4250_v30 }
 0x895   : > { %v11826_v35 = vpop.f32.mrb[100].mxu0 }
 0x896   : > { %v4607_v36 = vpop.f32.mrb[101].mxu0 }
 0x897   : > { %v11827_v34 = vpop.f32.mrb[102].mxu0 }
 0x898   : > { %v4610_v40 = vpop.f32.mrb[103].mxu0  ;;  %v5006_v34 = vld [vmem:[%s15629_s9 + $0x8] sm:$0xff] }
 0x89b   : > { %v11806_v41 = vpop.f32.mrb[88].mxu1 }
 0x89c   : > { %v4505_v45 = vadd.f32 %v11806_v41, %v4374_v28  ;;  %v4489_v46 = vpop.f32.mrb[89].mxu1  ;;  %v12885_v41 = vld [vmem:[%s15630_s10 + $0x58] sm:$0xff]  }
 0x89d   : > { %v4503_v51 = vadd.f32 %v4489_v46, %v4372_v19  ;;  %v11807_v47 = vpop.f32.mrb[90].mxu1  ;;  %v5009_v46 = vld [vmem:[%s15629_s9 + $0x20] sm:$0xf] }
 0x89e   : > { %v4492_v6 = vpop.f32.mrb[91].mxu1  ;;  %v4623_v39 = vadd.f32 %v11826_v35, %v4505_v45  ;;  %v5005_v35 = vld [vmem:[%s15629_s9] sm:$0xff]  ;;  %v12890_v47 = vld [vmem:[%s15630_s10 + $0x38] sm:$0xff]  }
 0x89f   : > { %v4504_v50 = vadd.f32 %v4492_v6, %v4373_v29  ;;  %v4621_v52 = vadd.f32 %v4607_v36, %v4503_v51  ;;  %v12881_v36 = vld [vmem:[%s15630_s10 + $0x48] sm:$0xff]   ;;  %v12887_v45 = vld [vmem:[%s15630_s10 + $0x60] sm:$0xff]   ;;  %11943 = vmatprep.subr.bf16.mxu1 %v12890_v47  ;;  %v12891_v6 = vld [vmem:[%s15630_s10 + $0x70] sm:$0xff]  }
 0x8a0   : > { %v12889_v51 = vld [vmem:[%s15630_s10 + $0x68] sm:$0xff]   ;;  %11944 = vmatpush3.bf16.msra.mxu1 %v12890_v47 }
 0x8a1   : > { %v4622_v57 = vadd.f32 %v4610_v40, %v4504_v50  ;;  %v5007_v40 = vld [vmem:[%s15629_s9 + $0x10] sm:$0xff]  ;;  %v12893_v50 = vld [vmem:[%s15630_s10 + $0x78] sm:$0xff]  }
 0x8b5   : > { %v11866_v58 = vpop.f32.mrb[104].mxu0 }
 0x8b6   : > { %v4867_v56 = vpop.f32.mrb[105].mxu0 }
 0x8b7   : > { %v11867_v13 = vpop.f32.mrb[106].mxu0 }
 0x8b8   : > { %v4870_v61 = vpop.f32.mrb[107].mxu0 }
 0x8bb   : > { %v11846_v62 = vpop.f32.mrb[92].mxu1 }
 0x8bc   : > { %v4748_v63 = vadd.f32 %v11846_v62, %v4623_v39  ;;  %v4732_v3 = vpop.f32.mrb[93].mxu1  ;;  %v12892_v39 = vld [vmem:[%s15630_s10 + $0xc0] sm:$0xff]  }
 0x8bd   : > { %v4746_v4 = vadd.f32 %v4732_v3, %v4621_v52  ;;  %v11847_v49 = vpop.f32.mrb[94].mxu1  ;;  %11969 = vmatprep.subr.bf16.mxu1 %v12892_v39  ;;  %v12895_v52 = vld [vmem:[%s15630_s10 + $0x80] sm:$0xff]  }
 0x8be   : > { %v4735_v5 = vpop.f32.mrb[95].mxu1  ;;  %v4883_v7 = vadd.f32 %v11866_v58, %v4748_v63 }
 0x8bf   : > { %v4747_v9 = vadd.f32 %v4735_v5, %v4622_v57  ;;  %v4881_v10 = vadd.f32 %v4867_v56, %v4746_v4  ;;  %v12894_v5 = vld [vmem:[%s15630_s10 + $0xc8] sm:$0xff]  }
 0x8c1   : > { %v4882_v15 = vadd.f32 %v4870_v61, %v4747_v9 }
 0x8db   : > { %v11886_v38 = vpop.f32.mrb[96].mxu1 }
 0x8dc   : > { %v5004_v55 = vadd.f32 %v11886_v38, %v4883_v7  ;;  %v4988_v11 = vpop.f32.mrb[97].mxu1 }
 0x8dd   : > { %v5002_v8 = vadd.f32 %v4988_v11, %v4881_v10  ;;  %v11887_v54 = vpop.f32.mrb[98].mxu1 }
 0x8de   : > { %v4991_v12 = vpop.f32.mrb[99].mxu1  ;;  %v5019_v14 = vadd.f32 %v9817_v2, %v5004_v55 }
 0x8df   : > { %v5017_v16 = vadd.f32 %v9817_v2, %v5002_v8  ;;  %v5003_v17 = vadd.f32 %v4991_v12, %v4882_v15 }
 0x8e0   : > { %v5025_v21 = vmul.f32 0.70710677, %v5019_v14  ;;  %v5022_v18 = vmul.f32 0.5, %v5019_v14 }
 0x8e1   : > { %v5023_v48 = vmul.f32 0.70710677, %v5017_v16  ;;  %v5018_v20 = vadd.f32 %v9817_v2, %v5003_v17  ;;  %v5020_v44 = vmul.f32 0.5, %v5017_v16  ;;  %v12896_v17 = vld [vmem:[%s15630_s10 + $0xd0] sm:$0xff]  }
 0x8e3   : > { %13135 = verf.f32 %v5023_v48  ;;  %v5024_v22 = vmul.f32 0.70710677, %v5018_v20  ;;  %v5021_v42 = vmul.f32 0.5, %v5018_v20 }
 0x8e5   : > { %13137 = verf.f32 %v5024_v22 }
 0x8e6   : > { %13139 = verf.f32 %v5025_v21 }
 0x8ed   : > { %v13136_v24 = vpop.eup %13135 }
 0x8ee   : > { %v5029_v26 = vadd.f32 1.0, %v13136_v24 }
 0x8ef   : > { %v13138_v59 = vpop.eup %13137 }
 0x8f0   : > { %v5030_v27 = vadd.f32 1.0, %v13138_v59  ;;  %v13140_v28 = vpop.eup %13139  ;;  %v5032_v30 = vmul.f32 %v5029_v26, %v5020_v44  ;;  %v12897_v59 = vld [vmem:[%s15630_s10 + $0x88] sm:$0xff]  }
 0x8f1   : > { %v5031_v29 = vadd.f32 1.0, %v13140_v28 }
 0x8f2   : > { %v5033_v19 = vmul.f32 %v5030_v27, %v5021_v42 }
 0x8f3   : > { %v5034_v33 = vmul.f32 %v5031_v29, %v5022_v18 }
 0x8f4   : > { %v12588_v0 = vpack.c.bf16 %v5033_v19, %v5032_v30  ;;  %v12898_v30 = vld [vmem:[%s15630_s10 + $0xd8] sm:$0xff]  }
 0x8f6   : > { %12589 = vmatpush3.bf16.msra.mxu0 %v12588_v0 }
 0x8f7   : > { %11892 = vmatprep.subr.mxu0 %v13225_v1 }
 0x8fa   : > { %11893 = vmatpush3.msk.msra.mxu0 %vm4644_vm10, %v5034_v33 }
 0x8fb   : > { %11895 = vmatmul.mubr.msk.f32.vlgmr.msra.gmra.mrb[90].mxu0 %vm5035_vm11, %v5005_v35  ;;  %11909 = vmatprep.subr.bf16.mxu0 %v12879_v31 }
 0x8fc   : > { %11897 = vmatprep.mubr.msk.f32.mxu0 %vm13226_vm0, %v13225_v1  ;;  %11910 = vmatpush3.bf16.msra.mxu0 %v12879_v31 }
 0x8fd   : > { %11911 = vmatprep.subr.bf16.mxu0 %v12881_v36 }
 0x8ff   : > { %11898 = vmatmul.mubr.msk.f32.gmra.mrb[108].mxu0 %vm5035_vm11, %v5006_v34 }
 0x900   : > { %11900 = vmatprep.mubr.msk.f32.mxu0 %vm13226_vm0, %v13225_v1  ;;  %11912 = vmatpush3.bf16.msra.mxu0 %v12881_v36 }
 0x901   : > { %11913 = vmatprep.subr.bf16.mxu0 %v12883_v37 }
 0x903   : > { %11901 = vmatmul.mubr.msk.f32.gmra.mrb[110].mxu0 %vm5035_vm11, %v5007_v40  ;;  %v12899_v40 = vld [vmem:[%s15630_s10 + $0x90] sm:$0xff]  }
 0x904   : > { %11903 = vmatprep.mubr.msk.f32.mxu0 %vm13226_vm0, %v13225_v1  ;;  %11914 = vmatpush3.bf16.msra.mxu0 %v12883_v37 }
 0x905   : > { %11915 = vmatprep.subr.bf16.mxu0 %v12885_v41 }
 0x907   : > { %11904 = vmatmul.mubr.msk.f32.gmra.mrb[112].mxu0 %vm5035_vm11, %v5008_v43 }
 0x908   : > { %11906 = vmatprep.mubr.msk.f32.mxu0 %vm13226_vm0, %v13225_v1  ;;  %11916 = vmatpush3.bf16.msra.mxu0 %v12885_v41 }
 0x909   : > { %11917 = vmatprep.subr.bf16.mxu0 %v12887_v45 }
 0x90b   : > { %11907 = vmatmul.mubr.msk.f32.gmra.mrb[114].mxu0 %vm5035_vm11, %v5009_v46 }
 0x90c   : > { %11918 = vmatpush3.bf16.msra.mxu0 %v12887_v45 }
 0x90d   : > { %11919 = vmatprep.subr.bf16.mxu0 %v12889_v51 }
 0x910   : > { %11920 = vmatpush3.bf16.msra.mxu0 %v12889_v51  ;;  %v12900_v51 = vld [vmem:[%s15630_s10 + $0xe0] sm:$0xff]  }
 0x911   : > { %11921 = vmatprep.subr.bf16.mxu0 %v12891_v6 }
 0x914   : > { %11922 = vmatpush3.bf16.msra.mxu0 %v12891_v6 }
 0x915   : > { %11923 = vmatprep.subr.bf16.mxu0 %v12893_v50 }
 0x918   : > { %11924 = vmatpush3.bf16.msra.mxu0 %v12893_v50 }
 0x919   : > { %11949 = vmatprep.subr.bf16.mxu0 %v12895_v52 }
 0x9ce   : > { %v5121_v23 = vpop.f32.mrb[90].mxu0 }
 0x9cf   : > { %v11896_v57 = vpop.f32.mrb[91].mxu0 }
 0x9d2   : > { %v5126_v58 = vpop.f32.mrb[108].mxu0 }
 0x9d3   : > { %v5145_v56 = vpack.c.bf16 %v5126_v58, %v5121_v23  ;;  %v11899_v13 = vpop.f32.mrb[109].mxu0  ;;  %v12901_v23 = vld [vmem:[%s15630_s10 + $0x98] sm:$0xff]  }
 0x9d5   : > { %11945 = vmatprep.mubr.bf16.mxu1 %v5145_v56  ;;  %v5183_v61 = vshll.u32 %v5145_v56, 16  ;;  %v5181_v63 = vshrl.u32 %v5145_v56, 16  ;;  %v5408_v10 = vrot.slane %v5145_v56, 1  ;;  %v5531_v42 = vrot.slane %v5145_v56, 3  ;;  %v12902_v56 = vld [vmem:[%s15630_s10 + $0xe8] sm:$0xff]  }
 0x9d6   : > { %v5131_v62 = vpop.f32.mrb[110].mxu0 }
 0x9d7   : > { %v14638_v3 = vpack.c.bf16 %v5131_v62, %v5131_v62  ;;  %v14640_v4 = vpack.c.bf16 %v5131_v62, %v5126_v58  ;;  %v11902_v49 = vpop.f32.mrb[111].mxu0  ;;  %v5185_v7 = vrot.slane %v5183_v61, 1  ;;  %v5652_v2 = vrot.slane %v5181_v63, 3 }
 0x9d8   : > { %v5653_v11 = vrot.slane %v5183_v61, 4  ;;  %v12903_v61 = vld [vmem:[%s15630_s10 + $0xa0] sm:$0xff]   ;;  %v12906_v49 = vld [vmem:[%s15630_s10 + $0xf8] sm:$0xff]  }
 0x9d9   : > { %11946 = vmatmul.mubr.bf16.vlgmr.msra.gmra.mrb[100].mxu1 %v14638_v3  ;;  %v5188_v9 = vshll.u32 %v14638_v3, 16  ;;  %v5409_v15 = vrot.slane %v14638_v3, 1  ;;  %v5186_v55 = vor.u32 %v5185_v7, %v5181_v63  ;;  %v5192_v14 = vshrl.u32 %v14638_v3, 16  ;;  %v12905_v63 = vld [vmem:[%s15630_s10 + $0xa8] sm:$0xff]   ;;  %v12908_v7 = vld [vmem:[%s15630_s10 + $0x140] sm:$0xff]   ;;  %v12917_v3 = vld [vmem:[%s15630_s10 + $0x118] sm:$0xff]  }
 0x9da   : > { %11970 = vmatpush3.bf16.msra.mxu1 %v12892_v39  ;;  %v14648_v38 = vpop.f32.mrb[112].mxu0  ;;  %v6025_v48 = vshrl.u32 %v14640_v4, 16  ;;  %v6028_v20 = vshll.u32 %v14640_v4, 16  ;;  %v5654_v19 = vor.u32 %v5653_v11, %v5652_v2  ;;  %v5903_v36 = vrot.slane %v14640_v4, 2  ;;  %v12912_v2 = vld [vmem:[%s15630_s10 + $0x150] sm:$0xff]   ;;  %v12913_v11 = vld [vmem:[%s15630_s10 + $0x108] sm:$0xff]  }
 0x9db   : > { %v14651_v8 = vpack.c.bf16 %v14648_v38, %v5131_v62  ;;  %11971 = vmatprep.subr.bf16.mxu1 %v12894_v5  ;;  %v11905_v54 = vpop.f32.mrb[113].mxu0  ;;  %v5190_v12 = vrot.slane %v5188_v9, 1  ;;  %v5410_v16 = vsel %vm1328_vm2, %v5408_v10, %v5409_v15  ;;  %v6159_v45 = vrot.slane %v14640_v4, 3  ;;  %v12904_v62 = vld [vmem:[%s15630_s10 + $0xf0] sm:$0xff]   ;;  %v12909_v9 = vld [vmem:[%s15630_s10 + $0xb8] sm:$0xff]   ;;  %v12910_v10 = vld [vmem:[%s15630_s10 + $0x148] sm:$0xff]  }
 0x9dc   : > { %v6027_v33 = vrot.slane %v6025_v48, 2  ;;  %v6030_v35 = vrot.slane %v6028_v20, 3  ;;  %v12916_v54 = vld [vmem:[%s15630_s10 + $0x160] sm:$0xff]   ;;  %v12923_v48 = vld [vmem:[%s15630_s10 + $0x130] sm:$0xff]  }
 0x9dd   : > { %v5656_v21 = vshrl.u32 %v14651_v8, 16  ;;  %v5659_v22 = vshll.u32 %v14651_v8, 16  ;;  %v5191_v24 = vsel %vm1452_vm4, %v5186_v55, %v5190_v12  ;;  %v5194_v26 = vor.u32 %v5192_v14, %v5190_v12  ;;  %v12911_v55 = vld [vmem:[%s15630_s10 + $0x100] sm:$0xff]   ;;  %v12920_v14 = vld [vmem:[%s15630_s10 + $0x170] sm:$0xff]  }
 0x9de   : > { %11972 = vmatpush3.bf16.msra.mxu1 %v12894_v5  ;;  %v5141_v44 = vpop.f32.mrb[114].mxu0  ;;  %11925 = vmatprep.mubr.bf16.mxu0 %v5191_v24  ;;  %v5532_v27 = vrot.slane %v14651_v8, 3  ;;  %v6031_v57 = vor.u32 %v6030_v35, %v6027_v33  ;;  %v12907_v5 = vld [vmem:[%s15630_s10 + $0xb0] sm:$0xff]   ;;  %v12919_v12 = vld [vmem:[%s15630_s10 + $0x120] sm:$0xff]   ;;  %v12926_v24 = vld [vmem:[%s15630_s10 + $0x1c8] sm:$0xff]  }
 0x9df   : > { %v14670_v28 = vpack.c.bf16 %v5141_v44, %v14648_v38  ;;  %11926 = vmatmul.mubr.bf16.vlgmr.msra.gmra.mrb[116].mxu0 %v5194_v26  ;;  %11973 = vmatprep.subr.bf16.mxu1 %v12896_v17  ;;  %v5658_v29 = vrot.slane %v5656_v21, 3  ;;  %v5661_v0 = vrot.slane %v5659_v22, 4  ;;  %v11908_v18 = vpop.f32.mrb[115].mxu0  ;;  %v12915_v8 = vld [vmem:[%s15630_s10 + $0x110] sm:$0xff]   ;;  %v12924_v20 = vld [vmem:[%s15630_s10 + $0x1c0] sm:$0xff]   ;;  %v5766_v21 = vpack.c.bf16 %v14648_v38, %v14648_v38  ;;  %v12925_v22 = vld [vmem:[%s15630_s10 + $0x138] sm:$0xff]  }
 0x9e0   : > { %11950 = vmatpush3.bf16.msra.mxu0 %v12895_v52  ;;  %11965 = vmatprep.mubr.bf16.mxu0 %v5410_v16  ;;  %v5533_v31 = vsel %vm1808_vm3, %v5531_v42, %v5532_v27  ;;  %v12921_v16 = vld [vmem:[%s15630_s10 + $0x128] sm:$0xff]   ;;  %v12927_v26 = vld [vmem:[%s15630_s10 + $0x180] sm:$0xff]   ;;  %v12928_v38 = vld [vmem:[%s15630_s10 + $0x1d0] sm:$0xff]  }
 0x9e1   : > { %v6033_v34 = vshrl.u32 %v14670_v28, 16  ;;  %v6036_v37 = vshll.u32 %v14670_v28, 16  ;;  %11985 = vmatprep.mubr.bf16.mxu1 %v5533_v31  ;;  %11951 = vmatprep.subr.bf16.mxu0 %v12897_v59  ;;  %v14684_v41 = vor.u32 %v5661_v0, %v5658_v29  ;;  %v5904_v43 = vrot.slane %v14670_v28, 2  ;;  %v12930_v44 = vld [vmem:[%s15630_s10 + $0x1d8] sm:$0xff]   ;;  %v12931_v42 = vld [vmem:[%s15630_s10 + $0x190] sm:$0xff]   ;;  %v12935_v29 = vld [vmem:[%s15630_s10 + $0x1a0] sm:$0xff]  }
 0x9e2   : > { %11974 = vmatpush3.bf16.msra.mxu1 %v12896_v17  ;;  %v6160_v46 = vrot.slane %v14670_v28, 3  ;;  %v12922_v17 = vld [vmem:[%s15630_s10 + $0x178] sm:$0xff]   ;;  %v12936_v0 = vld [vmem:[%s15630_s10 + $0x1f0] sm:$0xff]   ;;  %v12937_v18 = vld [vmem:[%s15630_s10 + $0x1a8] sm:$0xff]  }
 0x9e3   : > { %11975 = vmatprep.subr.bf16.mxu1 %v12898_v30  ;;  %v5663_v47 = vsel %vm4392_vm9, %v5654_v19, %v14684_v41  ;;  %v6035_v6 = vrot.slane %v6033_v34, 2  ;;  %v6038_v39 = vrot.slane %v6036_v37, 3  ;;  %v14697_v50 = vsel %vm4644_vm10, %v5903_v36, %v5904_v43  ;;  %v12934_v19 = vld [vmem:[%s15630_s10 + $0x1e8] sm:$0xff]   ;;  %v12938_v31 = vld [vmem:[%s15630_s10 + $0x1f8] sm:$0xff]   ;;  %v12939_v33 = vld [vmem:[%s15630_s10 + $0x1b0] sm:$0xff]  }
 0x9e4   : > { %11952 = vmatpush3.bf16.msra.mxu0 %v12897_v59  ;;  %v14702_v52 = vsel %vm1808_vm3, %v6159_v45, %v6160_v46  ;;  %v12929_v59 = vld [vmem:[%s15630_s10 + $0x188] sm:$0xff]   ;;  %v12940_v35 = vld [vmem:[%s15630_s10 + $0x1b8] sm:$0xff]   ;;  %v12941_v36 = vld [vmem:[%s15630_s10 + $0x200] sm:$0xff]  }
 0x9e5   : > { %11953 = vmatprep.subr.bf16.mxu0 %v12899_v40  ;;  %v14707_v58 = vor.u32 %v6038_v39, %v6035_v6  ;;  %v12942_v34 = vld [vmem:[%s15630_s10 + $0x208] sm:$0xff]   ;;  %v12943_v37 = vld [vmem:[%s15630_s10 + $0x210] sm:$0xff]   ;;  %v12949_v28 = vld [vmem:[%s15633_s13] sm:$0xff]  }
 0x9e6   : > { %11976 = vmatpush3.bf16.msra.mxu1 %v12898_v30  ;;  %v12933_v30 = vld [vmem:[%s15630_s10 + $0x198] sm:$0xff]   ;;  %v12947_v45 = vld [vmem:[%s15630_s10 + $0x230] sm:$0xff]  }
 0x9e7   : > { %11977 = vmatprep.subr.bf16.mxu1 %v12900_v51  ;;  %v14714_v13 = vsel %vm1679_vm5, %v6031_v57, %v14707_v58 }
 0x9e8   : > { %11954 = vmatpush3.bf16.msra.mxu0 %v12899_v40  ;;  %v12944_v40 = vld [vmem:[%s15630_s10 + $0x218] sm:$0xff]  }
 0x9e9   : > { %11955 = vmatprep.subr.bf16.mxu0 %v12901_v23 }
 0x9ea   : > { %11978 = vmatpush3.bf16.msra.mxu1 %v12900_v51  ;;  %v12948_v51 = vld [vmem:[%s15630_s10 + $0x238] sm:$0xff]  }
 0x9eb   : > { %11979 = vmatprep.subr.bf16.mxu1 %v12902_v56 }
 0x9ec   : > { %11956 = vmatpush3.bf16.msra.mxu0 %v12901_v23 }
 0x9ed   : > { %11957 = vmatprep.subr.bf16.mxu0 %v12903_v61 }
 0x9ee   : > { %11980 = vmatpush3.bf16.msra.mxu1 %v12902_v56 }
 0x9ef   : > { %11981 = vmatprep.subr.bf16.mxu1 %v12904_v62 }
 0x9f0   : > { %11958 = vmatpush3.bf16.msra.mxu0 %v12903_v61 }
 0x9f1   : > { %11959 = vmatprep.subr.bf16.mxu0 %v12905_v63 }
 0x9f2   : > { %11982 = vmatpush3.bf16.msra.mxu1 %v12904_v62 }
 0x9f3   : > { %11983 = vmatprep.subr.bf16.mxu1 %v12906_v49 }
 0x9f4   : > { %11960 = vmatpush3.bf16.msra.mxu0 %v12905_v63 }
 0x9f5   : > { %11961 = vmatprep.subr.bf16.mxu0 %v12907_v5 }
 0x9f6   : > { %11984 = vmatpush3.bf16.msra.mxu1 %v12906_v49 }
 0x9f7   : > { %12009 = vmatprep.subr.bf16.mxu1 %v12908_v7 }
 0x9f8   : > { %11962 = vmatpush3.bf16.msra.mxu0 %v12907_v5 }
 0x9f9   : > { %11986 = vmatmul.mubr.bf16.vlgmr.msra.gmra.mrb[104].mxu1 %v5532_v27  ;;  %11963 = vmatprep.subr.bf16.mxu0 %v12909_v9  ;;  %v12932_v27 = vld [vmem:[%s15630_s10 + $0x1e0] sm:$0xff]  }
 0x9fa   : > { %12010 = vmatpush3.bf16.msra.mxu1 %v12908_v7  ;;  %12025 = vmatprep.mubr.bf16.mxu1 %v14640_v4  ;;  %v12914_v4 = vld [vmem:[%s15630_s10 + $0x158] sm:$0xff]  }
 0x9fb   : > { %12011 = vmatprep.subr.bf16.mxu1 %v12910_v10 }
 0x9fc   : > { %11964 = vmatpush3.bf16.msra.mxu0 %v12909_v9 }
 0x9fd   : > { %11989 = vmatprep.subr.bf16.mxu0 %v12911_v55 }
 0x9fe   : > { %12012 = vmatpush3.bf16.msra.mxu1 %v12910_v10 }
 0x9ff   : > { %11966 = vmatmul.mubr.bf16.vlgmr.msra.gmra.mrb[120].mxu0 %v5409_v15  ;;  %12013 = vmatprep.subr.bf16.mxu1 %v12912_v2  ;;  %v12918_v15 = vld [vmem:[%s15630_s10 + $0x168] sm:$0xff]  }
 0xa00   : > { %11990 = vmatpush3.bf16.msra.mxu0 %v12911_v55  ;;  %12005 = vmatprep.mubr.bf16.mxu0 %v5663_v47 }
 0xa01   : > { %11991 = vmatprep.subr.bf16.mxu0 %v12913_v11 }
 0xa02   : > { %12014 = vmatpush3.bf16.msra.mxu1 %v12912_v2 }
 0xa03   : > { %12015 = vmatprep.subr.bf16.mxu1 %v12914_v4 }
 0xa04   : > { %11992 = vmatpush3.bf16.msra.mxu0 %v12913_v11 }
 0xa05   : > { %11993 = vmatprep.subr.bf16.mxu0 %v12915_v8 }
 0xa06   : > { %12016 = vmatpush3.bf16.msra.mxu1 %v12914_v4 }
 0xa07   : > { %12017 = vmatprep.subr.bf16.mxu1 %v12916_v54 }
 0xa08   : > { %11994 = vmatpush3.bf16.msra.mxu0 %v12915_v8 }
 0xa09   : > { %11995 = vmatprep.subr.bf16.mxu0 %v12917_v3 }
 0xa0a   : > { %12018 = vmatpush3.bf16.msra.mxu1 %v12916_v54 }
 0xa0b   : > { %12019 = vmatprep.subr.bf16.mxu1 %v12918_v15 }
 0xa0c   : > { %11996 = vmatpush3.bf16.msra.mxu0 %v12917_v3 }
 0xa0d   : > { %11997 = vmatprep.subr.bf16.mxu0 %v12919_v12 }
 0xa0e   : > { %12020 = vmatpush3.bf16.msra.mxu1 %v12918_v15 }
 0xa0f   : > { %12021 = vmatprep.subr.bf16.mxu1 %v12920_v14 }
 0xa10   : > { %11998 = vmatpush3.bf16.msra.mxu0 %v12919_v12 }
 0xa11   : > { %11999 = vmatprep.subr.bf16.mxu0 %v12921_v16 }
 0xa12   : > { %12022 = vmatpush3.bf16.msra.mxu1 %v12920_v14 }
 0xa13   : > { %12023 = vmatprep.subr.bf16.mxu1 %v12922_v17 }
 0xa14   : > { %12000 = vmatpush3.bf16.msra.mxu0 %v12921_v16 }
 0xa15   : > { %12001 = vmatprep.subr.bf16.mxu0 %v12923_v48 }
 0xa16   : > { %12024 = vmatpush3.bf16.msra.mxu1 %v12922_v17 }
 0xa17   : > { %12049 = vmatprep.subr.bf16.mxu1 %v12924_v20 }
 0xa18   : > { %12002 = vmatpush3.bf16.msra.mxu0 %v12923_v48 }
 0xa19   : > { %12026 = vmatmul.mubr.bf16.vlgmr.msra.gmra.mrb[108].mxu1 %v5766_v21  ;;  %12003 = vmatprep.subr.bf16.mxu0 %v12925_v22 }
 0xa1a   : > { %12050 = vmatpush3.bf16.msra.mxu1 %v12924_v20  ;;  %12065 = vmatprep.mubr.bf16.mxu1 %v14714_v13 }
 0xa1b   : > { %12051 = vmatprep.subr.bf16.mxu1 %v12926_v24 }
 0xa1c   : > { %12004 = vmatpush3.bf16.msra.mxu0 %v12925_v22 }
 0xa1d   : > { %12029 = vmatprep.subr.bf16.mxu0 %v12927_v26 }
 0xa1e   : > { %12052 = vmatpush3.bf16.msra.mxu1 %v12926_v24 }
 0xa1f   : > { %12006 = vmatmul.mubr.bf16.vlgmr.msra.gmra.mrb[124].mxu0 %v14684_v41  ;;  %12053 = vmatprep.subr.bf16.mxu1 %v12928_v38  ;;  %v12945_v41 = vld [vmem:[%s15630_s10 + $0x220] sm:$0xff]  }
 0xa20   : > { %12030 = vmatpush3.bf16.msra.mxu0 %v12927_v26  ;;  %12045 = vmatprep.mubr.bf16.mxu0 %v14697_v50 }
 0xa21   : > { %12031 = vmatprep.subr.bf16.mxu0 %v12929_v59 }
 0xa22   : > { %12054 = vmatpush3.bf16.msra.mxu1 %v12928_v38 }
 0xa23   : > { %12055 = vmatprep.subr.bf16.mxu1 %v12930_v44 }
 0xa24   : > { %12032 = vmatpush3.bf16.msra.mxu0 %v12929_v59 }
 0xa25   : > { %12033 = vmatprep.subr.bf16.mxu0 %v12931_v42 }
 0xa26   : > { %12056 = vmatpush3.bf16.msra.mxu1 %v12930_v44 }
 0xa27   : > { %12057 = vmatprep.subr.bf16.mxu1 %v12932_v27 }
 0xa28   : > { %12034 = vmatpush3.bf16.msra.mxu0 %v12931_v42 }
 0xa29   : > { %12035 = vmatprep.subr.bf16.mxu0 %v12933_v30 }
 0xa2a   : > { %12058 = vmatpush3.bf16.msra.mxu1 %v12932_v27 }
 0xa2b   : > { %12059 = vmatprep.subr.bf16.mxu1 %v12934_v19 }
 0xa2c   : > { %12036 = vmatpush3.bf16.msra.mxu0 %v12933_v30 }
 0xa2d   : > { %12037 = vmatprep.subr.bf16.mxu0 %v12935_v29 }
 0xa2e   : > { %12060 = vmatpush3.bf16.msra.mxu1 %v12934_v19 }
 0xa2f   : > { %12061 = vmatprep.subr.bf16.mxu1 %v12936_v0 }
 0xa30   : > { %12038 = vmatpush3.bf16.msra.mxu0 %v12935_v29 }
 0xa31   : > { %12039 = vmatprep.subr.bf16.mxu0 %v12937_v18 }
 0xa32   : > { %12062 = vmatpush3.bf16.msra.mxu1 %v12936_v0 }
 0xa33   : > { %12063 = vmatprep.subr.bf16.mxu1 %v12938_v31 }
 0xa34   : > { %12040 = vmatpush3.bf16.msra.mxu0 %v12937_v18 }
 0xa35   : > { %12041 = vmatprep.subr.bf16.mxu0 %v12939_v33 }
 0xa36   : > { %12064 = vmatpush3.bf16.msra.mxu1 %v12938_v31 }
 0xa37   : > { %12590 = vmatprep.subr.bf16.mxu1 %v13227_v32 }
 0xa38   : > { %12042 = vmatpush3.bf16.msra.mxu0 %v12939_v33 }
 0xa39   : > { %12066 = vmatmul.mubr.bf16.vlgmr.msra.gmra.mrb[112].mxu1 %v14707_v58  ;;  %12043 = vmatprep.subr.bf16.mxu0 %v12940_v35 }
 0xa3a   : > { %12095 = vmatprep.mubr.msk.f32.mxu1 %vm13226_vm0, %v13225_v1 }
 0xa3c   : > { %12044 = vmatpush3.bf16.msra.mxu0 %v12940_v35 }
 0xa3d   : > { %12069 = vmatprep.subr.bf16.mxu0 %v12941_v36 }
 0xa3f   : > { %12046 = vmatmul.mubr.bf16.vlgmr.msra.gmra.mrb[128].mxu0 %v5904_v43  ;;  %v12946_v43 = vld [vmem:[%s15630_s10 + $0x228] sm:$0xff]  }
 0xa40   : > { %12070 = vmatpush3.bf16.msra.mxu0 %v12941_v36  ;;  %12085 = vmatprep.mubr.bf16.mxu0 %v14702_v52 }
 0xa41   : > { %12071 = vmatprep.subr.bf16.mxu0 %v12942_v34 }
 0xa44   : > { %12072 = vmatpush3.bf16.msra.mxu0 %v12942_v34 }
 0xa45   : > { %12073 = vmatprep.subr.bf16.mxu0 %v12943_v37 }
 0xa48   : > { %12074 = vmatpush3.bf16.msra.mxu0 %v12943_v37 }
 0xa49   : > { %12075 = vmatprep.subr.bf16.mxu0 %v12944_v40 }
 0xa4c   : > { %12076 = vmatpush3.bf16.msra.mxu0 %v12944_v40 }
 0xa4d   : > { %12077 = vmatprep.subr.bf16.mxu0 %v12945_v41 }
 0xa50   : > { %12078 = vmatpush3.bf16.msra.mxu0 %v12945_v41 }
 0xa51   : > { %12079 = vmatprep.subr.bf16.mxu0 %v12946_v43 }
 0xa54   : > { %12080 = vmatpush3.bf16.msra.mxu0 %v12946_v43 }
 0xa55   : > { %12081 = vmatprep.subr.bf16.mxu0 %v12947_v45 }
 0xa58   : > { %12082 = vmatpush3.bf16.msra.mxu0 %v12947_v45 }
 0xa59   : > { %12083 = vmatprep.subr.bf16.mxu0 %v12948_v51 }
 0xa5c   : > { %12084 = vmatpush3.bf16.msra.mxu0 %v12948_v51 }
 0xa5d   : > { %12130 = vmatprep.subr.bf16.mxu0 %v12949_v28 }
 0xa5f   : > { %12086 = vmatmul.mubr.bf16.vlgmr.msra.gmra.mrb[132].mxu0 %v6160_v46  ;;  %v12950_v46 = vld [vmem:[%s15633_s13 + $0x8] sm:$0xff]  }
 0xa60   : > { %12131 = vmatpush3.bf16.msra.mxu0 %v12949_v28  ;;  %v12956_v28 = vld [vmem:[%s15633_s13 + $0x20] sm:$0xff]  }
 0xa61   : > { %12132 = vmatprep.subr.bf16.mxu0 %v12950_v46 }
 0xa64   : > { %12133 = vmatpush3.bf16.msra.mxu0 %v12950_v46  ;;  %v12957_v46 = vld [vmem:[%s15633_s13 + $0x58] sm:$0xff]  }
 0xaac   : > { %v11947_v47 = vpop.f32.mrb[100].mxu1 }
 0xaad   : > { %v5375_v6 = vpop.f32.mrb[101].mxu1 }
 0xaae   : > { %v11948_v39 = vpop.f32.mrb[102].mxu1 }
 0xaaf   : > { %v5378_v50 = vpop.f32.mrb[103].mxu1 }
 0xab2   : > { %v11927_v52 = vpop.f32.mrb[116].mxu0 }
 0xab3   : > { %v5384_v23 = vadd.f32 %v11947_v47, %v11927_v52  ;;  %v5279_v57 = vpop.f32.mrb[117].mxu0 }
 0xab4   : > { %v5376_v58 = vadd.f32 %v5375_v6, %v5279_v57  ;;  %v11928_v56 = vpop.f32.mrb[118].mxu0 }
 0xab5   : > { %v5282_v13 = vpop.f32.mrb[119].mxu0 }
 0xab6   : > { %v5379_v61 = vadd.f32 %v5378_v50, %v5282_v13 }
 0xacc   : > { %v11987_v62 = vpop.f32.mrb[104].mxu1 }
 0xacd   : > { %v5618_v63 = vpop.f32.mrb[105].mxu1 }
 0xace   : > { %v11988_v49 = vpop.f32.mrb[106].mxu1 }
 0xacf   : > { %v5621_v5 = vpop.f32.mrb[107].mxu1  ;;  %v12951_v49 = vld [vmem:[%s15633_s13 + $0x40] sm:$0xff]  }
 0xad2   : > { %v11967_v7 = vpop.f32.mrb[120].mxu0 }
 0xad3   : > { %v5511_v9 = vadd.f32 %v11967_v7, %v5384_v23  ;;  %v5495_v10 = vpop.f32.mrb[121].mxu0  ;;  %v10024_v23 = vld [vmem:[%s15631_s11] ss:$0 sm:$0xff]  ;;  %v12953_v7 = vld [vmem:[%s15633_s13 + $0x48] sm:$0xff]  }
 0xad4   : > { %v5509_v55 = vadd.f32 %v5495_v10, %v5376_v58  ;;  %v11968_v2 = vpop.f32.mrb[122].mxu0  ;;  %v12955_v10 = vld [vmem:[%s15633_s13 + $0x50] sm:$0xff]  }
 0xad5   : > { %v5498_v11 = vpop.f32.mrb[123].mxu0  ;;  %v5634_v4 = vadd.f32 %v11987_v62, %v5511_v9  ;;  %v6294_v62 = vld [vmem:[%s15632_s12 + $0x18] sm:$0xff]  ;;  %v12959_v2 = vld [vmem:[%s15633_s13 + $0x60] sm:$0xff]  }
 0xad6   : > { %v5510_v8 = vadd.f32 %v5498_v11, %v5379_v61  ;;  %v5632_v54 = vadd.f32 %v5618_v63, %v5509_v55  ;;  %v6295_v63 = vld [vmem:[%s15632_s12 + $0x20] sm:$0xf]  ;;  %v12954_v9 = vld [vmem:[%s15633_s13 + $0x18] sm:$0xff]   ;;  %v12958_v55 = vld [vmem:[%s15633_s13 + $0x28] sm:$0xff]  }
 0xad7   : > { %v12960_v11 = vld [vmem:[%s15633_s13 + $0x30] sm:$0xff]  }
 0xad8   : > { %v5633_v3 = vadd.f32 %v5621_v5, %v5510_v8  ;;  %v12952_v5 = vld [vmem:[%s15633_s13 + $0x10] sm:$0xff]   ;;  %v12962_v8 = vld [vmem:[%s15633_s13 + $0x38] sm:$0xff]  }
 0xad9   : > { %12134 = vmatprep.subr.bf16.mxu0 %v12952_v5 }
 0xada   : > { %12135 = vmatpush3.bf16.msra.mxu0 %v12952_v5  ;;  %v12966_v5 = vld [vmem:[%s15633_s13 + $0xc8] sm:$0xff]  }
 0xadb   : > { %12136 = vmatprep.subr.bf16.mxu0 %v12954_v9 }
 0xade   : > { %12137 = vmatpush3.bf16.msra.mxu0 %v12954_v9 }
 0xadf   : > { %12138 = vmatprep.subr.bf16.mxu0 %v12956_v28 }
 0xae2   : > { %12139 = vmatpush3.bf16.msra.mxu0 %v12956_v28 }
 0xae3   : > { %12140 = vmatprep.subr.bf16.mxu0 %v12958_v55 }
 0xae6   : > { %12141 = vmatpush3.bf16.msra.mxu0 %v12958_v55 }
 0xae7   : > { %12142 = vmatprep.subr.bf16.mxu0 %v12960_v11 }
 0xaea   : > { %12143 = vmatpush3.bf16.msra.mxu0 %v12960_v11 }
 0xaeb   : > { %12144 = vmatprep.subr.bf16.mxu0 %v12962_v8 }
 0xaec   : > { %v12027_v15 = vpop.f32.mrb[108].mxu1 }
 0xaed   : > { %v5866_v12 = vpop.f32.mrb[109].mxu1 }
 0xaee   : > { %v12028_v14 = vpop.f32.mrb[110].mxu1  ;;  %12145 = vmatpush3.bf16.msra.mxu0 %v12962_v8 }
 0xaef   : > { %v5869_v16 = vpop.f32.mrb[111].mxu1 }
 0xaf2   : > { %v12007_v17 = vpop.f32.mrb[124].mxu0 }
 0xaf3   : > { %v5764_v48 = vadd.f32 %v12007_v17, %v5634_v4  ;;  %v5748_v20 = vpop.f32.mrb[125].mxu0  ;;  %v12961_v4 = vld [vmem:[%s15633_s13 + $0x68] sm:$0xff]  }
 0xaf4   : > { %v5762_v21 = vadd.f32 %v5748_v20, %v5632_v54  ;;  %v12008_v22 = vpop.f32.mrb[126].mxu0  ;;  %v12963_v54 = vld [vmem:[%s15633_s13 + $0x70] sm:$0xff]  }
 0xaf5   : > { %v5751_v24 = vpop.f32.mrb[127].mxu0  ;;  %v5882_v26 = vadd.f32 %v12027_v15, %v5764_v48  ;;  %v12965_v15 = vld [vmem:[%s15633_s13 + $0x78] sm:$0xff]  }
 0xaf6   : > { %v5763_v38 = vadd.f32 %v5751_v24, %v5633_v3  ;;  %v5880_v59 = vadd.f32 %v5866_v12, %v5762_v21  ;;  %v14957_v3 = vld [vmem:[%s15633_s13 + $0xc0] sm:$0xff]  }
 0xaf7   : > { %12170 = vmatprep.subr.bf16.mxu0 %v14957_v3  ;;  %v14966_v12 = vld [vmem:[%s15633_s13 + $0x80] sm:$0xff]  }
 0xaf8   : > { %v5881_v44 = vadd.f32 %v5869_v16, %v5763_v38 }
 0xb0c   : > { %v12067_v42 = vpop.f32.mrb[112].mxu1 }
 0xb0d   : > { %v6125_v27 = vpop.f32.mrb[113].mxu1 }
 0xb0e   : > { %v12068_v30 = vpop.f32.mrb[114].mxu1 }
 0xb0f   : > { %v6128_v19 = vpop.f32.mrb[115].mxu1 }
 0xb12   : > { %v12047_v29 = vpop.f32.mrb[128].mxu0 }
 0xb13   : > { %v6006_v0 = vadd.f32 %v12047_v29, %v5882_v26  ;;  %v5990_v18 = vpop.f32.mrb[129].mxu0 }
 0xb14   : > { %v6004_v31 = vadd.f32 %v5990_v18, %v5880_v59  ;;  %v12048_v33 = vpop.f32.mrb[130].mxu0 }
 0xb15   : > { %v5993_v35 = vpop.f32.mrb[131].mxu0  ;;  %v6141_v36 = vadd.f32 %v12067_v42, %v6006_v0 }
 0xb16   : > { %v6005_v34 = vadd.f32 %v5993_v35, %v5881_v44  ;;  %v6139_v37 = vadd.f32 %v6125_v27, %v6004_v31 }
 0xb18   : > { %v6140_v40 = vadd.f32 %v6128_v19, %v6005_v34 }
 0xb32   : > { %v12087_v41 = vpop.f32.mrb[132].mxu0 }
 0xb33   : > { %v6262_v43 = vadd.f32 %v12087_v41, %v6141_v36  ;;  %v6246_v45 = vpop.f32.mrb[133].mxu0 }
 0xb34   : > { %v6260_v51 = vadd.f32 %v6246_v45, %v6139_v37  ;;  %v12088_v47 = vpop.f32.mrb[134].mxu0 }
 0xb35   : > { %v6280_v6 = vadd.f32 %v14312_v60, %v6262_v43  ;;  %v6249_v39 = vpop.f32.mrb[135].mxu0  ;;  %v6291_v60 = vld [vmem:[%s15632_s12] sm:$0xff] }
 0xb36   : > { %v6278_v50 = vadd.f32 %v14306_v25, %v6260_v51  ;;  %v6261_v52 = vadd.f32 %v6249_v39, %v6140_v40  ;;  %v6292_v25 = vld [vmem:[%s15632_s12 + $0x8] sm:$0xff] }
 0xb37   : > { %v6290_v61 = vadd.f32 %v10024_v23, %v6280_v6 }
 0xb38   : > { %v6279_v57 = vadd.f32 %v14309_v53, %v6261_v52  ;;  %v6288_v58 = vadd.f32 %v10024_v23, %v6278_v50  ;;  %v6293_v53 = vld [vmem:[%s15632_s12 + $0x10] sm:$0xff] }
 0xb3a   : > { %v6289_v56 = vadd.f32 %v10024_v23, %v6279_v57 }
 0xb3c   : > { %v12591_v13 = vpack.c.bf16 %v6289_v56, %v6288_v58 }
 0xb3e   : > { %12592 = vmatpush3.bf16.msra.mxu1 %v12591_v13 }
 0xb3f   : > { %12093 = vmatprep.subr.mxu1 %v13225_v1 }
 0xb42   : > { %12094 = vmatpush3.msk.msra.mxu1 %vm4644_vm10, %v6290_v61 }
 0xb43   : > { %12096 = vmatmul.mubr.msk.f32.vlgmr.msra.gmra.mrb[116].mxu1 %vm5035_vm11, %v6291_v60  ;;  %12110 = vmatprep.subr.bf16.mxu1 %v12951_v49 }
 0xb44   : > { %12098 = vmatprep.mubr.msk.f32.mxu1 %vm13226_vm0, %v13225_v1  ;;  %12111 = vmatpush3.bf16.msra.mxu1 %v12951_v49 }
 0xb45   : > { %12112 = vmatprep.subr.bf16.mxu1 %v12953_v7 }
 0xb47   : > { %12099 = vmatmul.mubr.msk.f32.gmra.mrb[118].mxu1 %vm5035_vm11, %v6292_v25 }
 0xb48   : > { %12101 = vmatprep.mubr.msk.f32.mxu1 %vm13226_vm0, %v13225_v1  ;;  %12113 = vmatpush3.bf16.msra.mxu1 %v12953_v7 }
 0xb49   : > { %12114 = vmatprep.subr.bf16.mxu1 %v12955_v10 }
 0xb4b   : > { %12102 = vmatmul.mubr.msk.f32.gmra.mrb[120].mxu1 %vm5035_vm11, %v6293_v53 }
 0xb4c   : > { %12104 = vmatprep.mubr.msk.f32.mxu1 %vm13226_vm0, %v13225_v1  ;;  %12115 = vmatpush3.bf16.msra.mxu1 %v12955_v10 }
 0xb4d   : > { %12116 = vmatprep.subr.bf16.mxu1 %v12957_v46 }
 0xb4f   : > { %12105 = vmatmul.mubr.msk.f32.gmra.mrb[122].mxu1 %vm5035_vm11, %v6294_v62 }
 0xb50   : > { %12107 = vmatprep.mubr.msk.f32.mxu1 %vm13226_vm0, %v13225_v1  ;;  %12117 = vmatpush3.bf16.msra.mxu1 %v12957_v46 }
 0xb51   : > { %12118 = vmatprep.subr.bf16.mxu1 %v12959_v2 }
 0xb53   : > { %12108 = vmatmul.mubr.msk.f32.gmra.mrb[124].mxu1 %vm5035_vm11, %v6295_v63 }
 0xb54   : > { %12119 = vmatpush3.bf16.msra.mxu1 %v12959_v2 }
 0xb55   : > { %12120 = vmatprep.subr.bf16.mxu1 %v12961_v4 }
 0xb58   : > { %12121 = vmatpush3.bf16.msra.mxu1 %v12961_v4 }
 0xb59   : > { %12122 = vmatprep.subr.bf16.mxu1 %v12963_v54 }
 0xb5c   : > { %12123 = vmatpush3.bf16.msra.mxu1 %v12963_v54 }
 0xb5d   : > { %12124 = vmatprep.subr.bf16.mxu1 %v12965_v15 }
 0xb60   : > { %12125 = vmatpush3.bf16.msra.mxu1 %v12965_v15 }
 0xb61   : > { %12150 = vmatprep.subr.bf16.mxu1 %v14966_v12 }
 0xc16   : > { %v6380_v14 = vpop.f32.mrb[116].mxu1 }
 0xc17   : > { %v6409_v16 = vmul.f32 0.70710677, %v6380_v14  ;;  %v12097_v17 = vpop.f32.mrb[117].mxu1  ;;  %v6404_v45 = vmul.f32 0.5, %v6380_v14 }
 0xc18   : > { %v12968_v17 = vld [vmem:[%s15633_s13 + $0xd0] sm:$0xff]  }
 0xc19   : > { %13141 = verf.f32 %v6409_v16 }
 0xc1a   : > { %v6385_v48 = vpop.f32.mrb[118].mxu1 }
 0xc1b   : > { %v6410_v20 = vmul.f32 0.70710677, %v6385_v48  ;;  %v8803_v21 = vpack.c.bf16 %v6385_v48, %v6380_v14  ;;  %v12100_v22 = vpop.f32.mrb[119].mxu1  ;;  %v6405_v51 = vmul.f32 0.5, %v6385_v48 }
 0xc1d   : > { %13143 = verf.f32 %v6410_v20  ;;  %v8822_v59 = vshrl.u32 %v8803_v21, 16  ;;  %v8825_v44 = vshll.u32 %v8803_v21, 16 }
 0xc1e   : > { %v6390_v24 = vpop.f32.mrb[120].mxu1 }
 0xc1f   : > { %v6411_v26 = vmul.f32 0.70710677, %v6390_v24  ;;  %v12103_v38 = vpop.f32.mrb[121].mxu1  ;;  %v8824_v0 = vrot.slane %v8822_v59, 3  ;;  %v8827_v18 = vrot.slane %v8825_v44, 4  ;;  %v6406_v56 = vmul.f32 0.5, %v6390_v24 }
 0xc20   : > { %v12969_v38 = vld [vmem:[%s15633_s13 + $0x88] sm:$0xff]  }
 0xc21   : > { %13145 = verf.f32 %v6411_v26  ;;  %v8828_v6 = vor.u32 %v8827_v18, %v8824_v0 }
 0xc22   : > { %v6395_v42 = vpop.f32.mrb[122].mxu1 }
 0xc23   : > { %v13142_v27 = vpop.eup %13141  ;;  %v6412_v30 = vmul.f32 0.70710677, %v6395_v42  ;;  %v8804_v19 = vpack.c.bf16 %v6395_v42, %v6390_v24  ;;  %v12106_v29 = vpop.f32.mrb[123].mxu1  ;;  %v6407_v60 = vmul.f32 0.5, %v6395_v42 }
 0xc24   : > { %v6419_v35 = vadd.f32 1.0, %v13142_v27  ;;  %v12970_v29 = vld [vmem:[%s15633_s13 + $0xd8] sm:$0xff]  }
 0xc25   : > { %13147 = verf.f32 %v6412_v30  ;;  %v8830_v31 = vshrl.u32 %v8804_v19, 16  ;;  %v8833_v33 = vshll.u32 %v8804_v19, 16 }
 0xc26   : > { %v6400_v36 = vpop.f32.mrb[124].mxu1  ;;  %v6424_v50 = vmul.f32 %v6419_v35, %v6404_v45 }
 0xc27   : > { %v13144_v34 = vpop.eup %13143  ;;  %v8832_v37 = vrot.slane %v8830_v31, 3  ;;  %v8835_v40 = vrot.slane %v8833_v33, 4  ;;  %v6413_v41 = vmul.f32 0.70710677, %v6400_v36  ;;  %v12109_v43 = vpop.f32.mrb[125].mxu1  ;;  %v6408_v28 = vmul.f32 0.5, %v6400_v36 }
 0xc28   : > { %v6420_v47 = vadd.f32 1.0, %v13144_v34  ;;  %v12971_v34 = vld [vmem:[%s15633_s13 + $0x90] sm:$0xff]  }
 0xc29   : > { %13149 = verf.f32 %v6413_v41  ;;  %v14969_v39 = vor.u32 %v8835_v40, %v8832_v37 }
 0xc2a   : > { %v6425_v52 = vmul.f32 %v6420_v47, %v6405_v51  ;;  %v12972_v51 = vld [vmem:[%s15633_s13 + $0xe0] sm:$0xff]  }
 0xc2b   : > { %v13146_v23 = vpop.eup %13145  ;;  %v14973_v57 = vsel %vm4392_vm9, %v8828_v6, %v14969_v39 }
 0xc2c   : > { %v6429_v58 = vpack.c.bf16 %v6425_v52, %v6424_v50  ;;  %v6421_v13 = vadd.f32 1.0, %v13146_v23 }
 0xc2e   : > { %v6426_v61 = vmul.f32 %v6421_v13, %v6406_v56  ;;  %12146 = vmatprep.mubr.bf16.mxu0 %v6429_v58  ;;  %v6467_v25 = vshll.u32 %v6429_v58, 16  ;;  %v6465_v9 = vshrl.u32 %v6429_v58, 16  ;;  %v6692_v55 = vrot.slane %v6429_v58, 1 }
 0xc2f   : > { %v13148_v53 = vpop.eup %13147  ;;  %v6815_v20 = vrot.slane %v6429_v58, 3  ;;  %v12973_v58 = vld [vmem:[%s15633_s13 + $0x98] sm:$0xff]  }
 0xc30   : > { %v14975_v62 = vpack.c.bf16 %v6426_v61, %v6425_v52  ;;  %v6422_v63 = vadd.f32 1.0, %v13148_v53  ;;  %v14977_v49 = vpack.c.bf16 %v6426_v61, %v6426_v61  ;;  %v6469_v7 = vrot.slane %v6467_v25, 1  ;;  %v12976_v53 = vld [vmem:[%s15633_s13 + $0xf0] sm:$0xff]  }
 0xc31   : > { %v6936_v59 = vrot.slane %v6465_v9, 3  ;;  %v6937_v44 = vrot.slane %v6467_v25, 4  ;;  %v12975_v25 = vld [vmem:[%s15633_s13 + $0xa0] sm:$0xff]  }
 0xc32   : > { %v14982_v10 = vmul.f32 %v6422_v63, %v6407_v60  ;;  %12147 = vmatmul.mubr.bf16.vlgmr.msra.gmra.mrb[136].mxu0 %v14977_v49  ;;  %v6472_v46 = vshll.u32 %v14977_v49, 16  ;;  %v6470_v11 = vor.u32 %v6469_v7, %v6465_v9  ;;  %v6476_v4 = vshrl.u32 %v14977_v49, 16  ;;  %v12977_v63 = vld [vmem:[%s15633_s13 + $0xa8] sm:$0xff]   ;;  %v12979_v7 = vld [vmem:[%s15633_s13 + $0xb0] sm:$0xff]   ;;  %v12980_v9 = vld [vmem:[%s15633_s13 + $0x140] sm:$0xff]  }
 0xc33   : > { %v13150_v2 = vpop.eup %13149  ;;  %12171 = vmatpush3.bf16.msra.mxu0 %v14957_v3  ;;  %v6693_v8 = vrot.slane %v14977_v49, 1  ;;  %v7309_v54 = vshrl.u32 %v14975_v62, 16  ;;  %v7312_v48 = vshll.u32 %v14975_v62, 16  ;;  %v7187_v35 = vrot.slane %v14975_v62, 2  ;;  %v12989_v49 = vld [vmem:[%s15633_s13 + $0x118] sm:$0xff]  }
 0xc34   : > { %v14991_v15 = vpack.c.bf16 %v14982_v10, %v6426_v61  ;;  %v6423_v14 = vadd.f32 1.0, %v13150_v2  ;;  %12172 = vmatprep.subr.bf16.mxu0 %v12966_v5  ;;  %v6474_v16 = vrot.slane %v6472_v46, 1  ;;  %v7443_v36 = vrot.slane %v14975_v62, 3  ;;  %v12974_v61 = vld [vmem:[%s15633_s13 + $0xe8] sm:$0xff]   ;;  %v12984_v2 = vld [vmem:[%s15633_s13 + $0x150] sm:$0xff]  }
 0xc35   : > { %v6694_v3 = vsel %vm1328_vm2, %v6692_v55, %v6693_v8  ;;  %v7311_v0 = vrot.slane %v7309_v54, 2  ;;  %v7314_v18 = vrot.slane %v7312_v48, 3  ;;  %v6938_v43 = vor.u32 %v6937_v44, %v6936_v59  ;;  %v12982_v46 = vld [vmem:[%s15633_s13 + $0x148] sm:$0xff]   ;;  %v12983_v55 = vld [vmem:[%s15633_s13 + $0x100] sm:$0xff]   ;;  %v12995_v48 = vld [vmem:[%s15633_s13 + $0x130] sm:$0xff]  }
 0xc36   : > { %v6428_v21 = vmul.f32 %v6423_v14, %v6408_v28  ;;  %v6475_v22 = vsel %vm1452_vm4, %v6470_v11, %v6474_v16  ;;  %v6478_v24 = vor.u32 %v6476_v4, %v6474_v16  ;;  %v6816_v26 = vrot.slane %v14991_v15, 3  ;;  %v12981_v28 = vld [vmem:[%s15633_s13 + $0xb8] sm:$0xff]   ;;  %v12985_v11 = vld [vmem:[%s15633_s13 + $0x108] sm:$0xff]   ;;  %v12987_v4 = vld [vmem:[%s15633_s13 + $0x110] sm:$0xff]  }
 0xc37   : > { %12173 = vmatpush3.bf16.msra.mxu0 %v12966_v5  ;;  %12126 = vmatprep.mubr.bf16.mxu1 %v6475_v22  ;;  %v6940_v42 = vshrl.u32 %v14991_v15, 16  ;;  %v6943_v27 = vshll.u32 %v14991_v15, 16  ;;  %v7315_v56 = vor.u32 %v7314_v18, %v7311_v0  ;;  %v12978_v5 = vld [vmem:[%s15633_s13 + $0xf8] sm:$0xff]   ;;  %v12988_v54 = vld [vmem:[%s15633_s13 + $0x160] sm:$0xff]   ;;  %v12992_v14 = vld [vmem:[%s15633_s13 + $0x170] sm:$0xff]  }
 0xc38   : > { %v15008_v30 = vpack.c.bf16 %v6428_v21, %v14982_v10  ;;  %12127 = vmatmul.mubr.bf16.vlgmr.msra.gmra.mrb[128].mxu1 %v6478_v24  ;;  %12174 = vmatprep.subr.bf16.mxu0 %v12968_v17  ;;  %v6817_v19 = vsel %vm1808_vm3, %v6815_v20, %v6816_v26  ;;  %v12991_v15 = vld [vmem:[%s15633_s13 + $0x120] sm:$0xff]   ;;  %v12993_v16 = vld [vmem:[%s15633_s13 + $0x128] sm:$0xff]   ;;  %v12997_v20 = vld [vmem:[%s15633_s13 + $0x138] sm:$0xff]   ;;  %v7050_v21 = vpack.c.bf16 %v14982_v10, %v14982_v10 }
 0xc39   : > { %12151 = vmatpush3.bf16.msra.mxu1 %v14966_v12  ;;  %12166 = vmatprep.mubr.bf16.mxu1 %v6694_v3  ;;  %v6942_v31 = vrot.slane %v6940_v42, 3  ;;  %v6945_v33 = vrot.slane %v6943_v27, 4  ;;  %v12996_v3 = vld [vmem:[%s15633_s13 + $0x1c0] sm:$0xff]   ;;  %v12998_v22 = vld [vmem:[%s15633_s13 + $0x1c8] sm:$0xff]   ;;  %v13000_v10 = vld [vmem:[%s15633_s13 + $0x1d0] sm:$0xff]  }
 0xc3a   : > { %12186 = vmatprep.mubr.bf16.mxu0 %v6817_v19  ;;  %12152 = vmatprep.subr.bf16.mxu1 %v12969_v38  ;;  %v7317_v37 = vshrl.u32 %v15008_v30, 16  ;;  %v7320_v40 = vshll.u32 %v15008_v30, 16  ;;  %v7188_v41 = vrot.slane %v15008_v30, 2  ;;  %v7444_v12 = vrot.slane %v15008_v30, 3  ;;  %v12999_v24 = vld [vmem:[%s15633_s13 + $0x180] sm:$0xff]   ;;  %v13003_v59 = vld [vmem:[%s15633_s13 + $0x190] sm:$0xff]  }
 0xc3b   : > { %12175 = vmatpush3.bf16.msra.mxu0 %v12968_v17  ;;  %v15026_v45 = vor.u32 %v6945_v33, %v6942_v31  ;;  %v12994_v17 = vld [vmem:[%s15633_s13 + $0x178] sm:$0xff]   ;;  %v13004_v44 = vld [vmem:[%s15633_s13 + $0x1e0] sm:$0xff]   ;;  %v13006_v27 = vld [vmem:[%s15633_s13 + $0x1e8] sm:$0xff]  }
 0xc3c   : > { %12176 = vmatprep.subr.bf16.mxu0 %v12970_v29  ;;  %v7319_v47 = vrot.slane %v7317_v37, 2  ;;  %v7322_v6 = vrot.slane %v7320_v40, 3  ;;  %v15034_v50 = vsel %vm4644_vm10, %v7187_v35, %v7188_v41  ;;  %v15039_v52 = vsel %vm1808_vm3, %v7443_v36, %v7444_v12  ;;  %v13005_v42 = vld [vmem:[%s15633_s13 + $0x198] sm:$0xff]   ;;  %v13007_v19 = vld [vmem:[%s15633_s13 + $0x1a0] sm:$0xff]   ;;  %v13009_v0 = vld [vmem:[%s15633_s13 + $0x1a8] sm:$0xff]  }
 0xc3d   : > { %12153 = vmatpush3.bf16.msra.mxu1 %v12969_v38  ;;  %v6947_v23 = vsel %vm4392_vm9, %v6938_v43, %v15026_v45  ;;  %v13002_v38 = vld [vmem:[%s15633_s13 + $0x1d8] sm:$0xff]   ;;  %v13011_v31 = vld [vmem:[%s15633_s13 + $0x1b0] sm:$0xff]   ;;  %v13013_v35 = vld [vmem:[%s15633_s13 + $0x200] sm:$0xff]  }
 0xc3e   : > { %12154 = vmatprep.subr.bf16.mxu1 %v12971_v34  ;;  %v15046_v13 = vor.u32 %v7322_v6, %v7319_v47  ;;  %v13010_v18 = vld [vmem:[%s15633_s13 + $0x1f8] sm:$0xff]   ;;  %v13014_v36 = vld [vmem:[%s15633_s13 + $0x208] sm:$0xff]   ;;  %v13017_v37 = vld [vmem:[%s15633_s13 + $0x220] sm:$0xff]  }
 0xc3f   : > { %12177 = vmatpush3.bf16.msra.mxu0 %v12970_v29  ;;  %v13008_v29 = vld [vmem:[%s15633_s13 + $0x1f0] sm:$0xff]   ;;  %v13012_v33 = vld [vmem:[%s15633_s13 + $0x1b8] sm:$0xff]   ;;  %v13018_v40 = vld [vmem:[%s15633_s13 + $0x228] sm:$0xff]  }
 0xc40   : > { %12178 = vmatprep.subr.bf16.mxu0 %v12972_v51  ;;  %v15053_v60 = vsel %vm1679_vm5, %v7315_v56, %v15046_v13  ;;  %v13020_v43 = vld [vmem:[%s15633_s13 + $0x238] sm:$0xff]  }
 0xc41   : > { %12155 = vmatpush3.bf16.msra.mxu1 %v12971_v34  ;;  %v13016_v34 = vld [vmem:[%s15633_s13 + $0x218] sm:$0xff]  }
 0xc42   : > { %12156 = vmatprep.subr.bf16.mxu1 %v12973_v58 }
 0xc43   : > { %12179 = vmatpush3.bf16.msra.mxu0 %v12972_v51 }
 0xc44   : > { %12180 = vmatprep.subr.bf16.mxu0 %v12974_v61 }
 0xc45   : > { %12157 = vmatpush3.bf16.msra.mxu1 %v12973_v58 }
 0xc46   : > { %12158 = vmatprep.subr.bf16.mxu1 %v12975_v25 }
 0xc47   : > { %12181 = vmatpush3.bf16.msra.mxu0 %v12974_v61 }
 0xc48   : > { %12182 = vmatprep.subr.bf16.mxu0 %v12976_v53 }
 0xc49   : > { %12159 = vmatpush3.bf16.msra.mxu1 %v12975_v25 }
 0xc4a   : > { %12160 = vmatprep.subr.bf16.mxu1 %v12977_v63 }
 0xc4b   : > { %12183 = vmatpush3.bf16.msra.mxu0 %v12976_v53 }
 0xc4c   : > { %12184 = vmatprep.subr.bf16.mxu0 %v12978_v5 }
 0xc4d   : > { %12161 = vmatpush3.bf16.msra.mxu1 %v12977_v63 }
 0xc4e   : > { %12162 = vmatprep.subr.bf16.mxu1 %v12979_v7 }
 0xc4f   : > { %12185 = vmatpush3.bf16.msra.mxu0 %v12978_v5 }
 0xc50   : > { %12210 = vmatprep.subr.bf16.mxu0 %v12980_v9 }
 0xc51   : > { %12163 = vmatpush3.bf16.msra.mxu1 %v12979_v7 }
 0xc52   : > { %12187 = vmatmul.mubr.bf16.vlgmr.msra.gmra.mrb[140].mxu0 %v6816_v26  ;;  %12164 = vmatprep.subr.bf16.mxu1 %v12981_v28  ;;  %v13001_v26 = vld [vmem:[%s15633_s13 + $0x188] sm:$0xff]  }
 0xc53   : > { %12211 = vmatpush3.bf16.msra.mxu0 %v12980_v9  ;;  %12226 = vmatprep.mubr.bf16.mxu0 %v14975_v62  ;;  %v12986_v62 = vld [vmem:[%s15633_s13 + $0x158] sm:$0xff]  }
 0xc54   : > { %12212 = vmatprep.subr.bf16.mxu0 %v12982_v46 }
 0xc55   : > { %12165 = vmatpush3.bf16.msra.mxu1 %v12981_v28 }
 0xc56   : > { %12190 = vmatprep.subr.bf16.mxu1 %v12983_v55 }
 0xc57   : > { %12213 = vmatpush3.bf16.msra.mxu0 %v12982_v46 }
 0xc58   : > { %12167 = vmatmul.mubr.bf16.vlgmr.msra.gmra.mrb[132].mxu1 %v6693_v8  ;;  %12214 = vmatprep.subr.bf16.mxu0 %v12984_v2  ;;  %v12990_v8 = vld [vmem:[%s15633_s13 + $0x168] sm:$0xff]  }
 0xc59   : > { %12191 = vmatpush3.bf16.msra.mxu1 %v12983_v55  ;;  %12206 = vmatprep.mubr.bf16.mxu1 %v6947_v23 }
 0xc5a   : > { %12192 = vmatprep.subr.bf16.mxu1 %v12985_v11 }
 0xc5b   : > { %12215 = vmatpush3.bf16.msra.mxu0 %v12984_v2 }
 0xc5c   : > { %12216 = vmatprep.subr.bf16.mxu0 %v12986_v62 }
 0xc5d   : > { %12193 = vmatpush3.bf16.msra.mxu1 %v12985_v11 }
 0xc5e   : > { %12194 = vmatprep.subr.bf16.mxu1 %v12987_v4 }
 0xc5f   : > { %12217 = vmatpush3.bf16.msra.mxu0 %v12986_v62  ;;  %v13021_v62 = vld [vmem:[%s15636_s16] sm:$0xff]  }
 0xc60   : > { %12218 = vmatprep.subr.bf16.mxu0 %v12988_v54 }
 0xc61   : > { %12195 = vmatpush3.bf16.msra.mxu1 %v12987_v4  ;;  %v13022_v4 = vld [vmem:[%s15636_s16 + $0x8] sm:$0xff]  }
 0xc62   : > { %12196 = vmatprep.subr.bf16.mxu1 %v12989_v49 }
 0xc63   : > { %12219 = vmatpush3.bf16.msra.mxu0 %v12988_v54  ;;  %v13024_v54 = vld [vmem:[%s15636_s16 + $0x10] sm:$0xff]  }
 0xc64   : > { %12220 = vmatprep.subr.bf16.mxu0 %v12990_v8 }
 0xc65   : > { %12197 = vmatpush3.bf16.msra.mxu1 %v12989_v49  ;;  %v13026_v49 = vld [vmem:[%s15636_s16 + $0x18] sm:$0xff]  }
 0xc66   : > { %12198 = vmatprep.subr.bf16.mxu1 %v12991_v15 }
 0xc67   : > { %12221 = vmatpush3.bf16.msra.mxu0 %v12990_v8 }
 0xc68   : > { %12222 = vmatprep.subr.bf16.mxu0 %v12992_v14 }
 0xc69   : > { %12199 = vmatpush3.bf16.msra.mxu1 %v12991_v15 }
 0xc6a   : > { %12200 = vmatprep.subr.bf16.mxu1 %v12993_v16 }
 0xc6b   : > { %12223 = vmatpush3.bf16.msra.mxu0 %v12992_v14 }
 0xc6c   : > { %12224 = vmatprep.subr.bf16.mxu0 %v12994_v17 }
 0xc6d   : > { %12201 = vmatpush3.bf16.msra.mxu1 %v12993_v16  ;;  %v13028_v16 = vld [vmem:[%s15636_s16 + $0x20] sm:$0xff]  }
 0xc6e   : > { %12202 = vmatprep.subr.bf16.mxu1 %v12995_v48 }
 0xc6f   : > { %12225 = vmatpush3.bf16.msra.mxu0 %v12994_v17 }
 0xc70   : > { %12250 = vmatprep.subr.bf16.mxu0 %v12996_v3 }
 0xc71   : > { %12203 = vmatpush3.bf16.msra.mxu1 %v12995_v48 }
 0xc72   : > { %12227 = vmatmul.mubr.bf16.vlgmr.msra.gmra.mrb[144].mxu0 %v7050_v21  ;;  %12204 = vmatprep.subr.bf16.mxu1 %v12997_v20 }
 0xc73   : > { %12251 = vmatpush3.bf16.msra.mxu0 %v12996_v3  ;;  %12266 = vmatprep.mubr.bf16.mxu0 %v15053_v60  ;;  %v13030_v3 = vld [vmem:[%s15636_s16 + $0x28] sm:$0xff]  }
 0xc74   : > { %12252 = vmatprep.subr.bf16.mxu0 %v12998_v22 }
 0xc75   : > { %12205 = vmatpush3.bf16.msra.mxu1 %v12997_v20 }
 0xc76   : > { %12230 = vmatprep.subr.bf16.mxu1 %v12999_v24 }
 0xc77   : > { %12253 = vmatpush3.bf16.msra.mxu0 %v12998_v22 }
 0xc78   : > { %12207 = vmatmul.mubr.bf16.vlgmr.msra.gmra.mrb[136].mxu1 %v15026_v45  ;;  %12254 = vmatprep.subr.bf16.mxu0 %v13000_v10 }
 0xc79   : > { %12231 = vmatpush3.bf16.msra.mxu1 %v12999_v24  ;;  %12246 = vmatprep.mubr.bf16.mxu1 %v15034_v50 }
 0xc7a   : > { %12232 = vmatprep.subr.bf16.mxu1 %v13001_v26 }
 0xc7b   : > { %12255 = vmatpush3.bf16.msra.mxu0 %v13000_v10 }
 0xc7c   : > { %12256 = vmatprep.subr.bf16.mxu0 %v13002_v38 }
 0xc7d   : > { %12233 = vmatpush3.bf16.msra.mxu1 %v13001_v26 }
 0xc7e   : > { %12234 = vmatprep.subr.bf16.mxu1 %v13003_v59 }
 0xc7f   : > { %12257 = vmatpush3.bf16.msra.mxu0 %v13002_v38 }
 0xc80   : > { %12258 = vmatprep.subr.bf16.mxu0 %v13004_v44 }
 0xc81   : > { %12235 = vmatpush3.bf16.msra.mxu1 %v13003_v59 }
 0xc82   : > { %12236 = vmatprep.subr.bf16.mxu1 %v13005_v42 }
 0xc83   : > { %12259 = vmatpush3.bf16.msra.mxu0 %v13004_v44  ;;  %v13032_v44 = vld [vmem:[%s15636_s16 + $0x30] sm:$0xff]  }
 0xc84   : > { %12260 = vmatprep.subr.bf16.mxu0 %v13006_v27 }
 0xc85   : > { %12237 = vmatpush3.bf16.msra.mxu1 %v13005_v42 }
 0xc86   : > { %12238 = vmatprep.subr.bf16.mxu1 %v13007_v19 }
 0xc87   : > { %12261 = vmatpush3.bf16.msra.mxu0 %v13006_v27 }
 0xc88   : > { %12262 = vmatprep.subr.bf16.mxu0 %v13008_v29 }
 0xc89   : > { %12239 = vmatpush3.bf16.msra.mxu1 %v13007_v19 }
 0xc8a   : > { %12240 = vmatprep.subr.bf16.mxu1 %v13009_v0 }
 0xc8b   : > { %12263 = vmatpush3.bf16.msra.mxu0 %v13008_v29 }
 0xc8c   : > { %12264 = vmatprep.subr.bf16.mxu0 %v13010_v18 }
 0xc8d   : > { %12241 = vmatpush3.bf16.msra.mxu1 %v13009_v0 }
 0xc8e   : > { %12242 = vmatprep.subr.bf16.mxu1 %v13011_v31 }
 0xc8f   : > { %12265 = vmatpush3.bf16.msra.mxu0 %v13010_v18 }
 0xc90   : > { %12593 = vmatprep.subr.bf16.mxu0 %v13227_v32  ;;  %v13015_v32 = vld [vmem:[%s15633_s13 + $0x210] sm:$0xff]  }
 0xc91   : > { %12243 = vmatpush3.bf16.msra.mxu1 %v13011_v31 }
 0xc92   : > { %12267 = vmatmul.mubr.bf16.vlgmr.msra.gmra.mrb[148].mxu0 %v15046_v13  ;;  %12244 = vmatprep.subr.bf16.mxu1 %v13012_v33 }
 0xc93   : > { %12296 = vmatprep.mubr.msk.f32.mxu0 %vm13226_vm0, %v13225_v1 }
 0xc95   : > { %12245 = vmatpush3.bf16.msra.mxu1 %v13012_v33 }
 0xc96   : > { %12270 = vmatprep.subr.bf16.mxu1 %v13013_v35 }
 0xc98   : > { %12247 = vmatmul.mubr.bf16.vlgmr.msra.gmra.mrb[140].mxu1 %v7188_v41  ;;  %v13019_v41 = vld [vmem:[%s15633_s13 + $0x230] sm:$0xff]  }
 0xc99   : > { %12271 = vmatpush3.bf16.msra.mxu1 %v13013_v35  ;;  %12286 = vmatprep.mubr.bf16.mxu1 %v15039_v52 }
 0xc9a   : > { %12272 = vmatprep.subr.bf16.mxu1 %v13014_v36 }
 0xc9d   : > { %12273 = vmatpush3.bf16.msra.mxu1 %v13014_v36 }
 0xc9e   : > { %12274 = vmatprep.subr.bf16.mxu1 %v13015_v32 }
 0xca1   : > { %12275 = vmatpush3.bf16.msra.mxu1 %v13015_v32 }
 0xca2   : > { %12276 = vmatprep.subr.bf16.mxu1 %v13016_v34 }
 0xca5   : > { %12277 = vmatpush3.bf16.msra.mxu1 %v13016_v34 }
 0xca6   : > { %12278 = vmatprep.subr.bf16.mxu1 %v13017_v37 }
 0xca9   : > { %12279 = vmatpush3.bf16.msra.mxu1 %v13017_v37 }
 0xcaa   : > { %12280 = vmatprep.subr.bf16.mxu1 %v13018_v40 }
 0xcad   : > { %12281 = vmatpush3.bf16.msra.mxu1 %v13018_v40 }
 0xcae   : > { %12282 = vmatprep.subr.bf16.mxu1 %v13019_v41 }
 0xcb1   : > { %12283 = vmatpush3.bf16.msra.mxu1 %v13019_v41 }
 0xcb2   : > { %12284 = vmatprep.subr.bf16.mxu1 %v13020_v43 }
 0xcb5   : > { %12285 = vmatpush3.bf16.msra.mxu1 %v13020_v43 }
 0xcb6   : > { %12331 = vmatprep.subr.bf16.mxu1 %v13021_v62 }
 0xcb8   : > { %12287 = vmatmul.mubr.bf16.vlgmr.msra.gmra.mrb[144].mxu1 %v7444_v12 }
 0xcb9   : > { %12332 = vmatpush3.bf16.msra.mxu1 %v13021_v62  ;;  %v13023_v62 = vld [vmem:[%s15636_s16 + $0x40] sm:$0xff]  }
 0xcba   : > { %12333 = vmatprep.subr.bf16.mxu1 %v13022_v4 }
 0xcbd   : > { %12334 = vmatpush3.bf16.msra.mxu1 %v13022_v4 }
 0xcbe   : > { %12335 = vmatprep.subr.bf16.mxu1 %v13024_v54 }
 0xcc1   : > { %12336 = vmatpush3.bf16.msra.mxu1 %v13024_v54  ;;  %v7547_v54 = vld [vmem:[%s15635_s15] sm:$0xff] }
 0xcc2   : > { %12337 = vmatprep.subr.bf16.mxu1 %v13026_v49 }
 0xcc5   : > { %12338 = vmatpush3.bf16.msra.mxu1 %v13026_v49  ;;  %v13025_v49 = vld [vmem:[%s15636_s16 + $0x48] sm:$0xff]  }
 0xcc6   : > { %12339 = vmatprep.subr.bf16.mxu1 %v13028_v16 }
 0xcc9   : > { %12340 = vmatpush3.bf16.msra.mxu1 %v13028_v16  ;;  %v13029_v16 = vld [vmem:[%s15636_s16 + $0x58] sm:$0xff]  }
 0xcca   : > { %12341 = vmatprep.subr.bf16.mxu1 %v13030_v3 }
 0xccd   : > { %12342 = vmatpush3.bf16.msra.mxu1 %v13030_v3  ;;  %v7551_v3 = vld [vmem:[%s15635_s15 + $0x20] sm:$0xf] }
 0xcce   : > { %12343 = vmatprep.subr.bf16.mxu1 %v13032_v44 }
 0xcd1   : > { %12344 = vmatpush3.bf16.msra.mxu1 %v13032_v44 }
 0xd05   : > { %v12148_v45 = vpop.f32.mrb[136].mxu0 }
 0xd06   : > { %v6659_v51 = vpop.f32.mrb[137].mxu0 }
 0xd07   : > { %v12149_v47 = vpop.f32.mrb[138].mxu0 }
 0xd08   : > { %v6662_v6 = vpop.f32.mrb[139].mxu0 }
 0xd0b   : > { %v12128_v50 = vpop.f32.mrb[128].mxu1 }
 0xd0c   : > { %v6668_v52 = vadd.f32 %v12148_v45, %v12128_v50  ;;  %v6563_v23 = vpop.f32.mrb[129].mxu1 }
 0xd0d   : > { %v6660_v58 = vadd.f32 %v6659_v51, %v6563_v23  ;;  %v12129_v56 = vpop.f32.mrb[130].mxu1  ;;  %v10231_v51 = vld [vmem:[%s15634_s14] ss:$0 sm:$0xff] }
 0xd0e   : > { %v6566_v13 = vpop.f32.mrb[131].mxu1 }
 0xd0f   : > { %v6663_v61 = vadd.f32 %v6662_v6, %v6566_v13 }
 0xd25   : > { %v12188_v60 = vpop.f32.mrb[140].mxu0 }
 0xd26   : > { %v6902_v25 = vpop.f32.mrb[141].mxu0 }
 0xd27   : > { %v12189_v53 = vpop.f32.mrb[142].mxu0 }
 0xd28   : > { %v6905_v63 = vpop.f32.mrb[143].mxu0 }
 0xd2b   : > { %v12168_v5 = vpop.f32.mrb[132].mxu1 }
 0xd2c   : > { %v6795_v7 = vadd.f32 %v12168_v5, %v6668_v52  ;;  %v6779_v9 = vpop.f32.mrb[133].mxu1 }
 0xd2d   : > { %v6793_v30 = vadd.f32 %v6779_v9, %v6660_v58  ;;  %v12169_v12 = vpop.f32.mrb[134].mxu1 }
 0xd2e   : > { %v6782_v28 = vpop.f32.mrb[135].mxu1  ;;  %v6918_v46 = vadd.f32 %v12188_v60, %v6795_v7 }
 0xd2f   : > { %v6794_v55 = vadd.f32 %v6782_v28, %v6663_v61  ;;  %v6916_v2 = vadd.f32 %v6902_v25, %v6793_v30 }
 0xd31   : > { %v6917_v11 = vadd.f32 %v6905_v63, %v6794_v55 }
 0xd45   : > { %v12228_v8 = vpop.f32.mrb[144].mxu0 }
 0xd46   : > { %v7150_v15 = vpop.f32.mrb[145].mxu0 }
 0xd47   : > { %v12229_v14 = vpop.f32.mrb[146].mxu0 }
 0xd48   : > { %v7153_v17 = vpop.f32.mrb[147].mxu0  ;;  %v7549_v14 = vld [vmem:[%s15635_s15 + $0x10] sm:$0xff] }
 0xd4b   : > { %v12208_v48 = vpop.f32.mrb[136].mxu1 }
 0xd4c   : > { %v7048_v20 = vadd.f32 %v12208_v48, %v6918_v46  ;;  %v7032_v21 = vpop.f32.mrb[137].mxu1  ;;  %v13031_v48 = vld [vmem:[%s15636_s16 + $0x60] sm:$0xff]  }
 0xd4d   : > { %v7046_v22 = vadd.f32 %v7032_v21, %v6916_v2  ;;  %v12209_v24 = vpop.f32.mrb[138].mxu1  ;;  %v13034_v21 = vld [vmem:[%s15636_s16 + $0x38] sm:$0xff]  }
 0xd4e   : > { %v7035_v10 = vpop.f32.mrb[139].mxu1  ;;  %v7166_v26 = vadd.f32 %v12228_v8, %v7048_v20  ;;  %v7548_v8 = vld [vmem:[%s15635_s15 + $0x8] sm:$0xff]  ;;  %12345 = vmatprep.subr.bf16.mxu1 %v13034_v21  ;;  %v13037_v24 = vld [vmem:[%s15636_s16 + $0x78] sm:$0xff]  }
 0xd4f   : > { %v7047_v38 = vadd.f32 %v7035_v10, %v6917_v11  ;;  %v7164_v59 = vadd.f32 %v7150_v15, %v7046_v22  ;;  %v13027_v15 = vld [vmem:[%s15636_s16 + $0x50] sm:$0xff]   ;;  %v13033_v20 = vld [vmem:[%s15636_s16 + $0x68] sm:$0xff]   ;;  %12346 = vmatpush3.bf16.msra.mxu1 %v13034_v21  ;;  %v13036_v22 = vld [vmem:[%s15636_s16 + $0xc0] sm:$0xff]  }
 0xd50   : > { %12371 = vmatprep.subr.bf16.mxu1 %v13036_v22  ;;  %v13039_v10 = vld [vmem:[%s15636_s16 + $0x80] sm:$0xff]  }
 0xd51   : > { %v7165_v42 = vadd.f32 %v7153_v17, %v7047_v38  ;;  %v7550_v17 = vld [vmem:[%s15635_s15 + $0x18] sm:$0xff] }
 0xd65   : > { %v12268_v27 = vpop.f32.mrb[148].mxu0 }
 0xd66   : > { %v7409_v19 = vpop.f32.mrb[149].mxu0 }
 0xd67   : > { %v12269_v29 = vpop.f32.mrb[150].mxu0 }
 0xd68   : > { %v7412_v0 = vpop.f32.mrb[151].mxu0 }
 0xd6b   : > { %v12248_v18 = vpop.f32.mrb[140].mxu1 }
 0xd6c   : > { %v7290_v31 = vadd.f32 %v12248_v18, %v7166_v26  ;;  %v7274_v33 = vpop.f32.mrb[141].mxu1 }
 0xd6d   : > { %v7288_v35 = vadd.f32 %v7274_v33, %v7164_v59  ;;  %v12249_v36 = vpop.f32.mrb[142].mxu1  ;;  %v13038_v33 = vld [vmem:[%s15636_s16 + $0xc8] sm:$0xff]  }
 0xd6e   : > { %v7277_v32 = vpop.f32.mrb[143].mxu1  ;;  %v7425_v34 = vadd.f32 %v12268_v27, %v7290_v31 }
 0xd6f   : > { %v7289_v37 = vadd.f32 %v7277_v32, %v7165_v42  ;;  %v7423_v40 = vadd.f32 %v7409_v19, %v7288_v35 }
 0xd71   : > { %v7424_v41 = vadd.f32 %v7412_v0, %v7289_v37 }
 0xd8b   : > { %v12288_v43 = vpop.f32.mrb[144].mxu1 }
 0xd8c   : > { %v7546_v45 = vadd.f32 %v12288_v43, %v7425_v34  ;;  %v7530_v47 = vpop.f32.mrb[145].mxu1 }
 0xd8d   : > { %v7544_v6 = vadd.f32 %v7530_v47, %v7423_v40  ;;  %v12289_v50 = vpop.f32.mrb[146].mxu1 }
 0xd8e   : > { %v7533_v52 = vpop.f32.mrb[147].mxu1  ;;  %v7561_v23 = vadd.f32 %v10231_v51, %v7546_v45 }
 0xd8f   : > { %v7559_v58 = vadd.f32 %v10231_v51, %v7544_v6  ;;  %v7545_v56 = vadd.f32 %v7533_v52, %v7424_v41  ;;  %v13040_v52 = vld [vmem:[%s15636_s16 + $0xd0] sm:$0xff]  }
 0xd90   : > { %v7567_v60 = vmul.f32 0.70710677, %v7561_v23  ;;  %v7564_v11 = vmul.f32 0.5, %v7561_v23 }
 0xd91   : > { %v7565_v13 = vmul.f32 0.70710677, %v7559_v58  ;;  %v7560_v61 = vadd.f32 %v10231_v51, %v7545_v56  ;;  %v7562_v7 = vmul.f32 0.5, %v7559_v58 }
 0xd93   : > { %13151 = verf.f32 %v7565_v13  ;;  %v7566_v25 = vmul.f32 0.70710677, %v7560_v61  ;;  %v7563_v9 = vmul.f32 0.5, %v7560_v61 }
 0xd95   : > { %13153 = verf.f32 %v7566_v25  ;;  %v13041_v25 = vld [vmem:[%s15636_s16 + $0x88] sm:$0xff]  }
 0xd96   : > { %13155 = verf.f32 %v7567_v60 }
 0xd9d   : > { %v13152_v53 = vpop.eup %13151 }
 0xd9e   : > { %v7571_v63 = vadd.f32 1.0, %v13152_v53 }
 0xd9f   : > { %v13154_v5 = vpop.eup %13153 }
 0xda0   : > { %v7572_v30 = vadd.f32 1.0, %v13154_v5  ;;  %v13156_v12 = vpop.eup %13155  ;;  %v7574_v28 = vmul.f32 %v7571_v63, %v7562_v7 }
 0xda1   : > { %v7573_v55 = vadd.f32 1.0, %v13156_v12 }
 0xda2   : > { %v7575_v46 = vmul.f32 %v7572_v30, %v7563_v9  ;;  %v13042_v9 = vld [vmem:[%s15636_s16 + $0xd8] sm:$0xff]  }
 0xda3   : > { %v7576_v4 = vmul.f32 %v7573_v55, %v7564_v11 }
 0xda4   : > { %v12594_v2 = vpack.c.bf16 %v7575_v46, %v7574_v28 }
 0xda6   : > { %12595 = vmatpush3.bf16.msra.mxu0 %v12594_v2 }
 0xda7   : > { %12294 = vmatprep.subr.mxu0 %v13225_v1 }
 0xdaa   : > { %12295 = vmatpush3.msk.msra.mxu0 %vm4644_vm10, %v7576_v4 }
 0xdab   : > { %12297 = vmatmul.mubr.msk.f32.vlgmr.msra.gmra.mrb[152].mxu0 %vm5035_vm11, %v7547_v54  ;;  %12311 = vmatprep.subr.bf16.mxu0 %v13023_v62 }
 0xdac   : > { %12299 = vmatprep.mubr.msk.f32.mxu0 %vm13226_vm0, %v13225_v1  ;;  %12312 = vmatpush3.bf16.msra.mxu0 %v13023_v62 }
 0xdad   : > { %12313 = vmatprep.subr.bf16.mxu0 %v13025_v49 }
 0xdaf   : > { %12300 = vmatmul.mubr.msk.f32.gmra.mrb[154].mxu0 %vm5035_vm11, %v7548_v8 }
 0xdb0   : > { %12302 = vmatprep.mubr.msk.f32.mxu0 %vm13226_vm0, %v13225_v1  ;;  %12314 = vmatpush3.bf16.msra.mxu0 %v13025_v49  ;;  %v13043_v49 = vld [vmem:[%s15636_s16 + $0x90] sm:$0xff]  }
 0xdb1   : > { %12315 = vmatprep.subr.bf16.mxu0 %v13027_v15 }
 0xdb3   : > { %12303 = vmatmul.mubr.msk.f32.gmra.mrb[156].mxu0 %vm5035_vm11, %v7549_v14 }
 0xdb4   : > { %12305 = vmatprep.mubr.msk.f32.mxu0 %vm13226_vm0, %v13225_v1  ;;  %12316 = vmatpush3.bf16.msra.mxu0 %v13027_v15 }
 0xdb5   : > { %12317 = vmatprep.subr.bf16.mxu0 %v13029_v16 }
 0xdb7   : > { %12306 = vmatmul.mubr.msk.f32.gmra.mrb[158].mxu0 %vm5035_vm11, %v7550_v17  ;;  %v13044_v17 = vld [vmem:[%s15636_s16 + $0xe0] sm:$0xff]  }
 0xdb8   : > { %12308 = vmatprep.mubr.msk.f32.mxu0 %vm13226_vm0, %v13225_v1  ;;  %12318 = vmatpush3.bf16.msra.mxu0 %v13029_v16  ;;  %v13035_v1 = vld [vmem:[%s15636_s16 + $0x70] sm:$0xff]  }
 0xdb9   : > { %12319 = vmatprep.subr.bf16.mxu0 %v13031_v48 }
 0xdbb   : > { %12309 = vmatmul.mubr.msk.f32.gmra.mrb[160].mxu0 %vm5035_vm11, %v7551_v3 }
 0xdbc   : > { %12320 = vmatpush3.bf16.msra.mxu0 %v13031_v48 }
 0xdbd   : > { %12321 = vmatprep.subr.bf16.mxu0 %v13033_v20 }
 0xdc0   : > { %12322 = vmatpush3.bf16.msra.mxu0 %v13033_v20 }
 0xdc1   : > { %12323 = vmatprep.subr.bf16.mxu0 %v13035_v1 }
 0xdc4   : > { %12324 = vmatpush3.bf16.msra.mxu0 %v13035_v1 }
 0xdc5   : > { %12325 = vmatprep.subr.bf16.mxu0 %v13037_v24 }
 0xdc8   : > { %12326 = vmatpush3.bf16.msra.mxu0 %v13037_v24 }
 0xdc9   : > { %12351 = vmatprep.subr.bf16.mxu0 %v13039_v10 }
 0xe7e   : > { %v7661_v26 = vpop.f32.mrb[152].mxu0 }
 0xe7f   : > { %v12298_v38 = vpop.f32.mrb[153].mxu0 }
 0xe82   : > { %v7666_v59 = vpop.f32.mrb[154].mxu0 }
 0xe83   : > { %v7685_v44 = vpack.c.bf16 %v7666_v59, %v7661_v26  ;;  %v12301_v42 = vpop.f32.mrb[155].mxu0  ;;  %v13046_v26 = vld [vmem:[%s15636_s16 + $0xe8] sm:$0xff]  }
 0xe84   : > { %v13049_v42 = vld [vmem:[%s15636_s16 + $0xa8] sm:$0xff]  }
 0xe85   : > { %12347 = vmatprep.mubr.bf16.mxu1 %v7685_v44  ;;  %v7723_v27 = vshll.u32 %v7685_v44, 16  ;;  %v7721_v29 = vshrl.u32 %v7685_v44, 16  ;;  %v7948_v32 = vrot.slane %v7685_v44, 1  ;;  %v8071_v63 = vrot.slane %v7685_v44, 3  ;;  %v13048_v44 = vld [vmem:[%s15636_s16 + $0xf0] sm:$0xff]  }
 0xe86   : > { %v7671_v19 = vpop.f32.mrb[156].mxu0 }
 0xe87   : > { %v15299_v0 = vpack.c.bf16 %v7671_v19, %v7671_v19  ;;  %v15301_v18 = vpack.c.bf16 %v7671_v19, %v7666_v59  ;;  %v12304_v31 = vpop.f32.mrb[157].mxu0  ;;  %v7725_v35 = vrot.slane %v7723_v27, 1  ;;  %v8192_v41 = vrot.slane %v7721_v29, 3  ;;  %v13047_v59 = vld [vmem:[%s15636_s16 + $0xa0] sm:$0xff]  }
 0xe88   : > { %v8193_v43 = vrot.slane %v7723_v27, 4  ;;  %v13050_v27 = vld [vmem:[%s15636_s16 + $0xf8] sm:$0xff]  }
 0xe89   : > { %12348 = vmatmul.mubr.bf16.vlgmr.msra.gmra.mrb[148].mxu1 %v15299_v0  ;;  %v7728_v36 = vshll.u32 %v15299_v0, 16  ;;  %v7949_v34 = vrot.slane %v15299_v0, 1  ;;  %v7726_v40 = vor.u32 %v7725_v35, %v7721_v29  ;;  %v7732_v6 = vshrl.u32 %v15299_v0, 16  ;;  %v13052_v29 = vld [vmem:[%s15636_s16 + $0x140] sm:$0xff]   ;;  %v13053_v31 = vld [vmem:[%s15636_s16 + $0xb8] sm:$0xff]  }
 0xe8a   : > { %12372 = vmatpush3.bf16.msra.mxu1 %v13036_v22  ;;  %v15309_v37 = vpop.f32.mrb[158].mxu0  ;;  %v8565_v23 = vshrl.u32 %v15301_v18, 16  ;;  %v8568_v58 = vshll.u32 %v15301_v18, 16  ;;  %v8194_v30 = vor.u32 %v8193_v43, %v8192_v41  ;;  %v8443_v62 = vrot.slane %v15301_v18, 2  ;;  %v13045_v22 = vld [vmem:[%s15636_s16 + $0x98] sm:$0xff]   ;;  %v13055_v35 = vld [vmem:[%s15636_s16 + $0x100] sm:$0xff]  }
 0xe8b   : > { %v15312_v45 = vpack.c.bf16 %v15309_v37, %v7671_v19  ;;  %12373 = vmatprep.subr.bf16.mxu1 %v13038_v33  ;;  %v12307_v51 = vpop.f32.mrb[159].mxu0  ;;  %v7730_v47 = vrot.slane %v7728_v36, 1  ;;  %v7950_v50 = vsel %vm1328_vm2, %v7948_v32, %v7949_v34  ;;  %v8699_v14 = vrot.slane %v15301_v18, 3  ;;  %v13051_v19 = vld [vmem:[%s15636_s16 + $0xb0] sm:$0xff]   ;;  %v13057_v32 = vld [vmem:[%s15636_s16 + $0x108] sm:$0xff]   ;;  %v13060_v41 = vld [vmem:[%s15636_s16 + $0x160] sm:$0xff]  }
 0xe8c   : > { %v8567_v2 = vrot.slane %v8565_v23, 2  ;;  %v8570_v11 = vrot.slane %v8568_v58, 3  ;;  %v13056_v36 = vld [vmem:[%s15636_s16 + $0x150] sm:$0xff]   ;;  %v13061_v0 = vld [vmem:[%s15636_s16 + $0x118] sm:$0xff]   ;;  %v13063_v43 = vld [vmem:[%s15636_s16 + $0x120] sm:$0xff]   ;;  %v8306_v23 = vpack.c.bf16 %v15309_v37, %v15309_v37 }
 0xe8d   : > { %v8196_v56 = vshrl.u32 %v15312_v45, 16  ;;  %v8199_v13 = vshll.u32 %v15312_v45, 16  ;;  %v7731_v61 = vsel %vm1452_vm4, %v7726_v40, %v7730_v47  ;;  %v7734_v60 = vor.u32 %v7732_v6, %v7730_v47  ;;  %v13059_v40 = vld [vmem:[%s15636_s16 + $0x110] sm:$0xff]   ;;  %v13065_v51 = vld [vmem:[%s15636_s16 + $0x128] sm:$0xff]   ;;  %v13066_v47 = vld [vmem:[%s15636_s16 + $0x178] sm:$0xff]  }
 0xe8e   : > { %12374 = vmatpush3.bf16.msra.mxu1 %v13038_v33  ;;  %v7681_v53 = vpop.f32.mrb[160].mxu0  ;;  %12327 = vmatprep.mubr.bf16.mxu0 %v7731_v61  ;;  %v8072_v5 = vrot.slane %v15312_v45, 3  ;;  %v8571_v24 = vor.u32 %v8570_v11, %v8567_v2  ;;  %v13054_v33 = vld [vmem:[%s15636_s16 + $0x148] sm:$0xff]   ;;  %v13064_v45 = vld [vmem:[%s15636_s16 + $0x170] sm:$0xff]   ;;  %v13074_v61 = vld [vmem:[%s15636_s16 + $0x1d8] sm:$0xff]  }
 0xe8f   : > { %v15331_v7 = vpack.c.bf16 %v7681_v53, %v15309_v37  ;;  %12328 = vmatmul.mubr.bf16.vlgmr.msra.gmra.mrb[164].mxu0 %v7734_v60  ;;  %12375 = vmatprep.subr.bf16.mxu1 %v13040_v52  ;;  %v8198_v12 = vrot.slane %v8196_v56, 3  ;;  %v8201_v28 = vrot.slane %v8199_v13, 4  ;;  %v12310_v46 = vpop.f32.mrb[161].mxu0  ;;  %v13067_v6 = vld [vmem:[%s15636_s16 + $0x130] sm:$0xff]   ;;  %v13070_v58 = vld [vmem:[%s15636_s16 + $0x1c8] sm:$0xff]   ;;  %v13071_v56 = vld [vmem:[%s15636_s16 + $0x180] sm:$0xff]  }
 0xe90   : > { %12352 = vmatpush3.bf16.msra.mxu0 %v13039_v10  ;;  %12367 = vmatprep.mubr.bf16.mxu0 %v7950_v50  ;;  %v8073_v55 = vsel %vm1808_vm3, %v8071_v63, %v8072_v5  ;;  %v13068_v50 = vld [vmem:[%s15636_s16 + $0x1c0] sm:$0xff]   ;;  %v13072_v37 = vld [vmem:[%s15636_s16 + $0x1d0] sm:$0xff]   ;;  %v13073_v13 = vld [vmem:[%s15636_s16 + $0x188] sm:$0xff]  }
 0xe91   : > { %v8573_v4 = vshrl.u32 %v15331_v7, 16  ;;  %v8576_v54 = vshll.u32 %v15331_v7, 16  ;;  %12387 = vmatprep.mubr.bf16.mxu1 %v8073_v55  ;;  %12353 = vmatprep.subr.bf16.mxu0 %v13041_v25  ;;  %v15345_v8 = vor.u32 %v8201_v28, %v8198_v12  ;;  %v8444_v15 = vrot.slane %v15331_v7, 2  ;;  %v13075_v60 = vld [vmem:[%s15636_s16 + $0x190] sm:$0xff]   ;;  %v13077_v53 = vld [vmem:[%s15636_s16 + $0x198] sm:$0xff]   ;;  %v13078_v63 = vld [vmem:[%s15636_s16 + $0x1e8] sm:$0xff]  }
 0xe92   : > { %12376 = vmatpush3.bf16.msra.mxu1 %v13040_v52  ;;  %v8700_v16 = vrot.slane %v15331_v7, 3  ;;  %v13069_v52 = vld [vmem:[%s15636_s16 + $0x138] sm:$0xff]   ;;  %v13083_v28 = vld [vmem:[%s15636_s16 + $0x1b0] sm:$0xff]   ;;  %v13084_v46 = vld [vmem:[%s15638_s18] sm:$0xff]  }
 0xe93   : > { %12377 = vmatprep.subr.bf16.mxu1 %v13042_v9  ;;  %v8203_v48 = vsel %vm4392_vm9, %v8194_v30, %v15345_v8  ;;  %v8575_v3 = vrot.slane %v8573_v4, 2  ;;  %v8578_v20 = vrot.slane %v8576_v54, 3  ;;  %v15358_v21 = vsel %vm4644_vm10, %v8443_v62, %v8444_v15  ;;  %v13081_v30 = vld [vmem:[%s15636_s16 + $0x1a8] sm:$0xff]   ;;  %v13082_v12 = vld [vmem:[%s15636_s16 + $0x1f8] sm:$0xff]   ;;  %v13087_v11 = vld [vmem:[%s15636_s16 + $0x200] sm:$0xff]  }
 0xe94   : > { %12354 = vmatpush3.bf16.msra.mxu0 %v13041_v25  ;;  %v15363_v1 = vsel %vm1808_vm3, %v8699_v14, %v8700_v16  ;;  %v13076_v25 = vld [vmem:[%s15636_s16 + $0x1e0] sm:$0xff]   ;;  %v13085_v55 = vld [vmem:[%s15636_s16 + $0x1b8] sm:$0xff]   ;;  %v13086_v2 = vld [vmem:[%s15638_s18 + $0x8] sm:$0xff]  }
 0xe95   : > { %12355 = vmatprep.subr.bf16.mxu0 %v13043_v49  ;;  %v15368_v10 = vor.u32 %v8578_v20, %v8575_v3  ;;  %v13088_v62 = vld [vmem:[%s15638_s18 + $0x10] sm:$0xff]   ;;  %v13089_v4 = vld [vmem:[%s15636_s16 + $0x208] sm:$0xff]   ;;  %v13095_v14 = vld [vmem:[%s15636_s16 + $0x220] sm:$0xff]  }
 0xe96   : > { %12378 = vmatpush3.bf16.msra.mxu1 %v13042_v9  ;;  %v13080_v9 = vld [vmem:[%s15636_s16 + $0x1f0] sm:$0xff]   ;;  %v13098_v3 = vld [vmem:[%s15638_s18 + $0x38] sm:$0xff]  }
 0xe97   : > { %12379 = vmatprep.subr.bf16.mxu1 %v13044_v17  ;;  %v15375_v38 = vsel %vm1679_vm5, %v8571_v24, %v15368_v10  ;;  %v13091_v54 = vld [vmem:[%s15636_s16 + $0x210] sm:$0xff]  }
 0xe98   : > { %12356 = vmatpush3.bf16.msra.mxu0 %v13043_v49  ;;  %v13092_v49 = vld [vmem:[%s15638_s18 + $0x20] sm:$0xff]   ;;  %v13099_v20 = vld [vmem:[%s15636_s16 + $0x230] sm:$0xff]  }
 0xe99   : > { %12357 = vmatprep.subr.bf16.mxu0 %v13045_v22 }
 0xe9a   : > { %12380 = vmatpush3.bf16.msra.mxu1 %v13044_v17  ;;  %v13096_v17 = vld [vmem:[%s15638_s18 + $0x30] sm:$0xff]  }
 0xe9b   : > { %12381 = vmatprep.subr.bf16.mxu1 %v13046_v26 }
 0xe9c   : > { %12358 = vmatpush3.bf16.msra.mxu0 %v13045_v22 }
 0xe9d   : > { %12359 = vmatprep.subr.bf16.mxu0 %v13047_v59 }
 0xe9e   : > { %12382 = vmatpush3.bf16.msra.mxu1 %v13046_v26 }
 0xe9f   : > { %12383 = vmatprep.subr.bf16.mxu1 %v13048_v44 }
 0xea0   : > { %12360 = vmatpush3.bf16.msra.mxu0 %v13047_v59 }
 0xea1   : > { %12361 = vmatprep.subr.bf16.mxu0 %v13049_v42 }
 0xea2   : > { %12384 = vmatpush3.bf16.msra.mxu1 %v13048_v44 }
 0xea3   : > { %12385 = vmatprep.subr.bf16.mxu1 %v13050_v27 }
 0xea4   : > { %12362 = vmatpush3.bf16.msra.mxu0 %v13049_v42 }
 0xea5   : > { %12363 = vmatprep.subr.bf16.mxu0 %v13051_v19 }
 0xea6   : > { %12386 = vmatpush3.bf16.msra.mxu1 %v13050_v27 }
 0xea7   : > { %12411 = vmatprep.subr.bf16.mxu1 %v13052_v29 }
 0xea8   : > { %12364 = vmatpush3.bf16.msra.mxu0 %v13051_v19 }
 0xea9   : > { %12388 = vmatmul.mubr.bf16.vlgmr.msra.gmra.mrb[152].mxu1 %v8072_v5  ;;  %12365 = vmatprep.subr.bf16.mxu0 %v13053_v31  ;;  %v13079_v5 = vld [vmem:[%s15636_s16 + $0x1a0] sm:$0xff]  }
 0xeaa   : > { %12412 = vmatpush3.bf16.msra.mxu1 %v13052_v29  ;;  %12427 = vmatprep.mubr.bf16.mxu1 %v15301_v18  ;;  %v13058_v18 = vld [vmem:[%s15636_s16 + $0x158] sm:$0xff]  }
 0xeab   : > { %12413 = vmatprep.subr.bf16.mxu1 %v13054_v33 }
 0xeac   : > { %12366 = vmatpush3.bf16.msra.mxu0 %v13053_v31 }
 0xead   : > { %12391 = vmatprep.subr.bf16.mxu0 %v13055_v35 }
 0xeae   : > { %12414 = vmatpush3.bf16.msra.mxu1 %v13054_v33 }
 0xeaf   : > { %12368 = vmatmul.mubr.bf16.vlgmr.msra.gmra.mrb[168].mxu0 %v7949_v34  ;;  %12415 = vmatprep.subr.bf16.mxu1 %v13056_v36  ;;  %v13062_v34 = vld [vmem:[%s15636_s16 + $0x168] sm:$0xff]  }
 0xeb0   : > { %12392 = vmatpush3.bf16.msra.mxu0 %v13055_v35  ;;  %12407 = vmatprep.mubr.bf16.mxu0 %v8203_v48  ;;  %v13097_v48 = vld [vmem:[%s15636_s16 + $0x228] sm:$0xff]  }
 0xeb1   : > { %12393 = vmatprep.subr.bf16.mxu0 %v13057_v32 }
 0xeb2   : > { %12416 = vmatpush3.bf16.msra.mxu1 %v13056_v36 }
 0xeb3   : > { %12417 = vmatprep.subr.bf16.mxu1 %v13058_v18 }
 0xeb4   : > { %12394 = vmatpush3.bf16.msra.mxu0 %v13057_v32 }
 0xeb5   : > { %12395 = vmatprep.subr.bf16.mxu0 %v13059_v40 }
 0xeb6   : > { %12418 = vmatpush3.bf16.msra.mxu1 %v13058_v18 }
 0xeb7   : > { %12419 = vmatprep.subr.bf16.mxu1 %v13060_v41 }
 0xeb8   : > { %12396 = vmatpush3.bf16.msra.mxu0 %v13059_v40 }
 0xeb9   : > { %12397 = vmatprep.subr.bf16.mxu0 %v13061_v0 }
 0xeba   : > { %12420 = vmatpush3.bf16.msra.mxu1 %v13060_v41 }
 0xebb   : > { %12421 = vmatprep.subr.bf16.mxu1 %v13062_v34 }
 0xebc   : > { %12398 = vmatpush3.bf16.msra.mxu0 %v13061_v0 }
 0xebd   : > { %12399 = vmatprep.subr.bf16.mxu0 %v13063_v43 }
 0xebe   : > { %12422 = vmatpush3.bf16.msra.mxu1 %v13062_v34 }
 0xebf   : > { %12423 = vmatprep.subr.bf16.mxu1 %v13064_v45 }
 0xec0   : > { %12400 = vmatpush3.bf16.msra.mxu0 %v13063_v43 }
 0xec1   : > { %12401 = vmatprep.subr.bf16.mxu0 %v13065_v51 }
 0xec2   : > { %12424 = vmatpush3.bf16.msra.mxu1 %v13064_v45 }
 0xec3   : > { %12425 = vmatprep.subr.bf16.mxu1 %v13066_v47 }
 0xec4   : > { %12402 = vmatpush3.bf16.msra.mxu0 %v13065_v51 }
 0xec5   : > { %12403 = vmatprep.subr.bf16.mxu0 %v13067_v6 }
 0xec6   : > { %12426 = vmatpush3.bf16.msra.mxu1 %v13066_v47 }
 0xec7   : > { %12451 = vmatprep.subr.bf16.mxu1 %v13068_v50 }
 0xec8   : > { %12404 = vmatpush3.bf16.msra.mxu0 %v13067_v6 }
 0xec9   : > { %12428 = vmatmul.mubr.bf16.vlgmr.msra.gmra.mrb[156].mxu1 %v8306_v23  ;;  %12405 = vmatprep.subr.bf16.mxu0 %v13069_v52 }
 0xeca   : > { %12452 = vmatpush3.bf16.msra.mxu1 %v13068_v50  ;;  %12467 = vmatprep.mubr.bf16.mxu1 %v15375_v38 }
 0xecb   : > { %12453 = vmatprep.subr.bf16.mxu1 %v13070_v58 }
 0xecc   : > { %12406 = vmatpush3.bf16.msra.mxu0 %v13069_v52 }
 0xecd   : > { %12431 = vmatprep.subr.bf16.mxu0 %v13071_v56 }
 0xece   : > { %12454 = vmatpush3.bf16.msra.mxu1 %v13070_v58 }
 0xecf   : > { %12408 = vmatmul.mubr.bf16.vlgmr.msra.gmra.mrb[172].mxu0 %v15345_v8  ;;  %12455 = vmatprep.subr.bf16.mxu1 %v13072_v37  ;;  %v13093_v8 = vld [vmem:[%s15636_s16 + $0x218] sm:$0xff]  }
 0xed0   : > { %12432 = vmatpush3.bf16.msra.mxu0 %v13071_v56  ;;  %12447 = vmatprep.mubr.bf16.mxu0 %v15358_v21  ;;  %v13100_v21 = vld [vmem:[%s15636_s16 + $0x238] sm:$0xff]  }
 0xed1   : > { %12433 = vmatprep.subr.bf16.mxu0 %v13073_v13 }
 0xed2   : > { %12456 = vmatpush3.bf16.msra.mxu1 %v13072_v37 }
 0xed3   : > { %12457 = vmatprep.subr.bf16.mxu1 %v13074_v61 }
 0xed4   : > { %12434 = vmatpush3.bf16.msra.mxu0 %v13073_v13 }
 0xed5   : > { %12435 = vmatprep.subr.bf16.mxu0 %v13075_v60 }
 0xed6   : > { %12458 = vmatpush3.bf16.msra.mxu1 %v13074_v61 }
 0xed7   : > { %12459 = vmatprep.subr.bf16.mxu1 %v13076_v25 }
 0xed8   : > { %12436 = vmatpush3.bf16.msra.mxu0 %v13075_v60 }
 0xed9   : > { %12437 = vmatprep.subr.bf16.mxu0 %v13077_v53 }
 0xeda   : > { %12460 = vmatpush3.bf16.msra.mxu1 %v13076_v25 }
 0xedb   : > { %12461 = vmatprep.subr.bf16.mxu1 %v13078_v63 }
 0xedc   : > { %12438 = vmatpush3.bf16.msra.mxu0 %v13077_v53 }
 0xedd   : > { %12439 = vmatprep.subr.bf16.mxu0 %v13079_v5 }
 0xede   : > { %12462 = vmatpush3.bf16.msra.mxu1 %v13078_v63 }
 0xedf   : > { %12463 = vmatprep.subr.bf16.mxu1 %v13080_v9 }
 0xee0   : > { %12440 = vmatpush3.bf16.msra.mxu0 %v13079_v5 }
 0xee1   : > { %12441 = vmatprep.subr.bf16.mxu0 %v13081_v30 }
 0xee2   : > { %12464 = vmatpush3.bf16.msra.mxu1 %v13080_v9 }
 0xee3   : > { %12465 = vmatprep.subr.bf16.mxu1 %v13082_v12 }
 0xee4   : > { %12442 = vmatpush3.bf16.msra.mxu0 %v13081_v30 }
 0xee5   : > { %12443 = vmatprep.subr.bf16.mxu0 %v13083_v28 }
 0xee6   : > { %12466 = vmatpush3.bf16.msra.mxu1 %v13082_v12 }
 0xee7   : > { %12491 = vmatprep.subr.bf16.mxu1 %v13084_v46 }
 0xee8   : > { %12444 = vmatpush3.bf16.msra.mxu0 %v13083_v28 }
 0xee9   : > { %12468 = vmatmul.mubr.bf16.vlgmr.msra.gmra.mrb[160].mxu1 %v15368_v10  ;;  %12445 = vmatprep.subr.bf16.mxu0 %v13085_v55 }
 0xeea   : > { %12492 = vmatpush3.bf16.msra.mxu1 %v13084_v46  ;;  %12507 = vmatprep.mubr.bf16.mxu1 %v14973_v57  ;;  %v13090_v57 = vld [vmem:[%s15638_s18 + $0x18] sm:$0xff]  }
 0xeeb   : > { %12493 = vmatprep.subr.bf16.mxu1 %v13086_v2 }
 0xeec   : > { %12446 = vmatpush3.bf16.msra.mxu0 %v13085_v55 }
 0xeed   : > { %12471 = vmatprep.subr.bf16.mxu0 %v13087_v11 }
 0xeee   : > { %12494 = vmatpush3.bf16.msra.mxu1 %v13086_v2 }
 0xeef   : > { %12448 = vmatmul.mubr.bf16.vlgmr.msra.gmra.mrb[176].mxu0 %v8444_v15  ;;  %12495 = vmatprep.subr.bf16.mxu1 %v13088_v62  ;;  %v13094_v15 = vld [vmem:[%s15638_s18 + $0x28] sm:$0xff]  }
 0xef0   : > { %12472 = vmatpush3.bf16.msra.mxu0 %v13087_v11  ;;  %12487 = vmatprep.mubr.bf16.mxu0 %v15363_v1 }
 0xef1   : > { %12473 = vmatprep.subr.bf16.mxu0 %v13089_v4 }
 0xef2   : > { %12496 = vmatpush3.bf16.msra.mxu1 %v13088_v62 }
 0xef3   : > { %12497 = vmatprep.subr.bf16.mxu1 %v13090_v57 }
 0xef4   : > { %12474 = vmatpush3.bf16.msra.mxu0 %v13089_v4 }
 0xef5   : > { %12475 = vmatprep.subr.bf16.mxu0 %v13091_v54 }
 0xef6   : > { %12498 = vmatpush3.bf16.msra.mxu1 %v13090_v57 }
 0xef7   : > { %12499 = vmatprep.subr.bf16.mxu1 %v13092_v49 }
 0xef8   : > { %12476 = vmatpush3.bf16.msra.mxu0 %v13091_v54 }
 0xef9   : > { %12477 = vmatprep.subr.bf16.mxu0 %v13093_v8 }
 0xefa   : > { %12500 = vmatpush3.bf16.msra.mxu1 %v13092_v49 }
 0xefb   : > { %12501 = vmatprep.subr.bf16.mxu1 %v13094_v15 }
 0xefc   : > { %12478 = vmatpush3.bf16.msra.mxu0 %v13093_v8 }
 0xefd   : > { %12479 = vmatprep.subr.bf16.mxu0 %v13095_v14 }
 0xefe   : > { %12502 = vmatpush3.bf16.msra.mxu1 %v13094_v15 }
 0xeff   : > { %12503 = vmatprep.subr.bf16.mxu1 %v13096_v17 }
 0xf00   : > { %12480 = vmatpush3.bf16.msra.mxu0 %v13095_v14 }
 0xf01   : > { %12481 = vmatprep.subr.bf16.mxu0 %v13097_v48 }
 0xf02   : > { %12504 = vmatpush3.bf16.msra.mxu1 %v13096_v17 }
 0xf03   : > { %12505 = vmatprep.subr.bf16.mxu1 %v13098_v3 }
 0xf04   : > { %12482 = vmatpush3.bf16.msra.mxu0 %v13097_v48 }
 0xf05   : > { %12483 = vmatprep.subr.bf16.mxu0 %v13099_v20 }
 0xf06   : > { %12506 = vmatpush3.bf16.msra.mxu1 %v13098_v3 }
 0xf08   : > { %12484 = vmatpush3.bf16.msra.mxu0 %v13099_v20 }
 0xf09   : > { %12508 = vmatmul.mubr.bf16.vlgmr.msra.gmra.mrb[164].mxu1 %v14969_v39  ;;  %12485 = vmatprep.subr.bf16.mxu0 %v13100_v21  ;;  %v8949_v39 = vld [vmem:[%s15639_s19] sm:$0xff] }
 0xf0c   : > { %12486 = vmatpush3.bf16.msra.mxu0 %v13100_v21 }
 0xf0f   : > { %12488 = vmatmul.mubr.bf16.vlgmr.msra.gmra.mrb[180].mxu0 %v8700_v16 }
 0xf10   : > { %12517 = vmatprep.mubr.msk.f32.mxu0 %vm5035_vm11, %v8949_v39 }
 0xf5c   : > { %v12349_v1 = vpop.f32.mrb[148].mxu1 }
 0xf5d   : > { %v7915_v22 = vpop.f32.mrb[149].mxu1 }
 0xf5e   : > { %v12350_v24 = vpop.f32.mrb[150].mxu1 }
 0xf5f   : > { %v7918_v10 = vpop.f32.mrb[151].mxu1 }
 0xf62   : > { %v12329_v26 = vpop.f32.mrb[164].mxu0 }
 0xf63   : > { %v7924_v38 = vadd.f32 %v12349_v1, %v12329_v26  ;;  %v7819_v59 = vpop.f32.mrb[165].mxu0 }
 0xf64   : > { %v7916_v44 = vadd.f32 %v7915_v22, %v7819_v59  ;;  %v12330_v42 = vpop.f32.mrb[166].mxu0 }
 0xf65   : > { %v7822_v27 = vpop.f32.mrb[167].mxu0 }
 0xf66   : > { %v7919_v19 = vadd.f32 %v7918_v10, %v7822_v27  ;;  %v10446_v10 = vld [vmem:[%s15637_s17] ss:$0 sm:$0xff]  ;;  %v8950_v27 = vld [vmem:[%s15639_s19 + $0x8] sm:$0xff] }
 0xf7c   : > { %v12389_v29 = vpop.f32.mrb[152].mxu1 }
 0xf7d   : > { %v8158_v7 = vpop.f32.mrb[153].mxu1 }
 0xf7e   : > { %v12390_v16 = vpop.f32.mrb[154].mxu1 }
 0xf7f   : > { %v8161_v31 = vpop.f32.mrb[155].mxu1 }
 0xf82   : > { %v12369_v33 = vpop.f32.mrb[168].mxu0 }
 0xf83   : > { %v8051_v35 = vadd.f32 %v12369_v33, %v7924_v38  ;;  %v8035_v36 = vpop.f32.mrb[169].mxu0 }
 0xf84   : > { %v8049_v32 = vadd.f32 %v8035_v36, %v7916_v44  ;;  %v12370_v18 = vpop.f32.mrb[170].mxu0 }
 0xf85   : > { %v8038_v40 = vpop.f32.mrb[171].mxu0  ;;  %v8174_v41 = vadd.f32 %v12389_v29, %v8051_v35 }
 0xf86   : > { %v8050_v0 = vadd.f32 %v8038_v40, %v7919_v19  ;;  %v8172_v34 = vadd.f32 %v8158_v7, %v8049_v32 }
 0xf88   : > { %v8173_v43 = vadd.f32 %v8161_v31, %v8050_v0 }
 0xf9c   : > { %v12429_v45 = vpop.f32.mrb[156].mxu1 }
 0xf9d   : > { %v8406_v51 = vpop.f32.mrb[157].mxu1 }
 0xf9e   : > { %v12430_v47 = vpop.f32.mrb[158].mxu1 }
 0xf9f   : > { %v8409_v6 = vpop.f32.mrb[159].mxu1 }
 0xfa2   : > { %v12409_v50 = vpop.f32.mrb[172].mxu0 }
 0xfa3   : > { %v8304_v52 = vadd.f32 %v12409_v50, %v8174_v41  ;;  %v8288_v23 = vpop.f32.mrb[173].mxu0 }
 0xfa4   : > { %v8302_v58 = vadd.f32 %v8288_v23, %v8172_v34  ;;  %v12410_v56 = vpop.f32.mrb[174].mxu0 }
 0xfa5   : > { %v8291_v37 = vpop.f32.mrb[175].mxu0  ;;  %v8422_v13 = vadd.f32 %v12429_v45, %v8304_v52 }
 0xfa6   : > { %v8303_v61 = vadd.f32 %v8291_v37, %v8173_v43  ;;  %v8420_v60 = vadd.f32 %v8406_v51, %v8302_v58 }
 0xfa8   : > { %v8421_v25 = vadd.f32 %v8409_v6, %v8303_v61 }
 0xfbc   : > { %v12469_v53 = vpop.f32.mrb[160].mxu1 }
 0xfbd   : > { %v8665_v63 = vpop.f32.mrb[161].mxu1 }
 0xfbe   : > { %v12470_v5 = vpop.f32.mrb[162].mxu1 }
 0xfbf   : > { %v8668_v9 = vpop.f32.mrb[163].mxu1 }
 0xfc2   : > { %v12449_v30 = vpop.f32.mrb[176].mxu0 }
 0xfc3   : > { %v8546_v12 = vadd.f32 %v12449_v30, %v8422_v13  ;;  %v8530_v28 = vpop.f32.mrb[177].mxu0 }
 0xfc4   : > { %v8544_v46 = vadd.f32 %v8530_v28, %v8420_v60  ;;  %v12450_v55 = vpop.f32.mrb[178].mxu0 }
 0xfc5   : > { %v8533_v2 = vpop.f32.mrb[179].mxu0  ;;  %v8681_v11 = vadd.f32 %v12469_v53, %v8546_v12 }
 0xfc6   : > { %v8545_v62 = vadd.f32 %v8533_v2, %v8421_v25  ;;  %v8679_v4 = vadd.f32 %v8665_v63, %v8544_v46 }
 0xfc8   : > { %v8680_v57 = vadd.f32 %v8668_v9, %v8545_v62 }
 0xfdc   : > { %v12509_v54 = vpop.f32.mrb[164].mxu1 }
 0xfdd   : > { %v8922_v49 = vpop.f32.mrb[165].mxu1 }
 0xfde   : > { %v12510_v8 = vpop.f32.mrb[166].mxu1 }
 0xfdf   : > { %v8925_v15 = vpop.f32.mrb[167].mxu1 }
 0xfe2   : > { %v12489_v14 = vpop.f32.mrb[180].mxu0 }
 0xfe3   : > { %v8802_v17 = vadd.f32 %v12489_v14, %v8681_v11  ;;  %v8786_v48 = vpop.f32.mrb[181].mxu0 }
 0xfe4   : > { %v8800_v3 = vadd.f32 %v8786_v48, %v8679_v4  ;;  %v12490_v20 = vpop.f32.mrb[182].mxu0 }
 0xfe5   : > { %v8938_v21 = vadd.f32 %v12509_v54, %v8802_v17  ;;  %v8789_v1 = vpop.f32.mrb[183].mxu0 }
 0xfe6   : > { %v8936_v22 = vadd.f32 %v8922_v49, %v8800_v3  ;;  %v8801_v24 = vadd.f32 %v8789_v1, %v8680_v57 }
 0xfe7   : > { %v8948_v42 = vadd.f32 %v10446_v10, %v8938_v21 }
 0xfe8   : > { %v8937_v26 = vadd.f32 %v8925_v15, %v8801_v24  ;;  %v8946_v38 = vadd.f32 %v10446_v10, %v8936_v22 }
 0xfea   : > { %v8947_v59 = vadd.f32 %v10446_v10, %v8937_v26 }
 0xfec   : > { %v12596_v44 = vpack.c.bf16 %v8947_v59, %v8946_v38 }
 0xfee   : > { %12597 = vmatprep.subr.bf16.mxu0 %v12596_v44 }
 0xfef   : > { %12599 = vmatpush3.bf16.msra.mxu0 %v12596_v44 }
 0xff0   : > { %12515 = vmatprep.subr.msk.mxu0 %vm4644_vm10, %v8948_v42 }
 0xff3   : > { %12516 = vmatpush3.msk.msra.mxu0 %vm4644_vm10, %v8948_v42 }
 0xff4   : > { %12518 = vmatmul.mubr.msk.f32.vlgmr.msra.gmra.mrb[162].mxu0 %vm5035_vm11, %v8950_v27 }
0x10c7   : > { %v12519_v19 = vpop.f32.mrb[162].mxu0 }
0x10c8   : > { %v9026_v39 = vpop.f32.mrb[163].mxu0  ;;  %v9036_v7 = vand.u32 2147483647, %v12519_v19 }
0x10c9   : > { %v9035_v29 = vand.u32 2147483647, %v9026_v39 }
0x10cb   : > { %9037 = vmax.xlane.f32.xlu0 %v9035_v29 }
0x10cf   : > { %9039 = vmax.xlane.f32.xlu0 %v9036_v7 }
0x1158   : > { %v9038_v16 = vpop.xlane.xlu0 %9037 }
0x1159   : > { %13157 = vrcp.f32 %v9038_v16 }
0x115c   : > { %v9040_v31 = vpop.xlane.xlu0 %9039 }
0x115d   : > { %13159 = vrcp.f32 %v9040_v31 }
0x1163   : > { %v13158_v33 = vpop.eup %13157 }
0x1164   : > { %v9043_v35 = vmul.f32 %v13158_v33, %v9026_v39 }
0x1166   : > { %9045 = vst [vmem:[%s622_s30] sm:$0xff] %v9043_v35 }
0x1167   : > { %v13160_v36 = vpop.eup %13159 }
0x1168   : > { %v9044_v32 = vmul.f32 %v13160_v36, %v12519_v19 }
0x116a   : > { %9046 = vst [vmem:[%s622_s30 + $0x8] sm:$0xff] %v9044_v32 }
0x116b   : > { %13174 = shalt.err (!%p13171_p3)
}
0x116c   : > { %s13175_s24 = scalar_lea.hbm %s15575_s25, 256  ;;  %s13179_s28 = scalar_lea.hbm %s15640_s20, 512 }
0x116d   : > { %p13176_p4 = scmp.ne.s32.totalorder %s15575_s25, %s13175_s24  ;;  %p13180_p9 = scmp.lt.u32.totalorder %s15575_s25, %s15640_s20 }
0x116e   : > { %p13181_p10 = scmp.lt.u32.totalorder %s13179_s28, %s13175_s24  ;;  %p13183_p12 = scmp.lt.u32.totalorder %s13175_s24, %s15575_s25 }
0x116f   : > { %p13177_p7 = pnand %p13176_p4, %p13374_p5 }
0x1170   : > { %p13182_p11 = por %p13181_p10, %p13180_p9 }
0x1171   : > { %p13178_p8 = pneg %p13177_p7 }
0x1172   : > { %p13184_p13 = por %p13183_p12, %p13182_p11 }
0x1174   : > { %p13185_p0 = pnand %p13184_p13, %p13178_p8 }
0x1176   : > { %13188 = shalt.err (!%p13185_p0)
}
0x1177   : > { %s13229_s26 = smov 128   ;;  %s13230_s23 = smov 8  }
0x1178   : > { %12601 = dma.vmem_to_hbm [thread:$0]  (%p13374_p5), %s15577_s1, 256, %s15575_s25, %s15579_s21, %s13229_s26, %s13229_s26, %s13230_s23  }
0x1179 PF: > { %s15670_s29 = sld [smem:[#allocation7_spill]]  ;;  %s15671_s30 = sld [smem:[#allocation5_spill]] }
0x117f   : > { %p12607_p1 = scmp.ge.s32.totalorder %s15670_s29, 2  ;;  %s9076_s2 = sand.u32 1, %s15671_s30  }
0x1180   : > { %s9077_s24 = scalar_lea.sflag [#allocation3], %s9076_s2 }
0x1181   : > { %p12604_p2 = pnand %p12607_p1, %p13378_p6 }
0x1183   : > { %13206 = dma.done.wait (!%p12604_p2), %s9077_s24, 256  }
0x1184   : > { %13208 = vsyncadd (!%p12604_p2), %s9077_s24, 4294967040  ;;  %s15673_s24 = sld [smem:[#allocation8_spill]]  ;;  %s15674_s28 = sld [smem:[#allocation6_spill]] }
0x1185   : > { %s15675_s23 = sld [smem:[#allocation9_spill]]  ;;  %s15676_s1 = smov %s13215_s22 }
0x118a   : > { %p30_p3 = scmp.ge.s32.totalorder %s15673_s24, 4   ;;  %s15677_s22 = smov %s15674_s28 }
0x118c   :  { %32 = sbr.rel (!%p30_p3) target bundleno = 9 (0x9), region = 188 }
0x1193   :  { %9082 = vsyncpa [#allocation3], 1 }
0x1194   :  { %9084 = vsyncpa [#allocation3 + $0x1], 1 }

</bundles_post_ra>
